<compile_context>
chip_gen: v6e
topology: v6e:2x2x1
jax: 0.10.0
libtpu: 0.0.40
codegen_flags: <defaults>
</compile_context>

<pallas_src>
import functools

import jax
import jax.numpy as jnp
from jax import lax
from jax.experimental import pallas as pl
from jax.experimental.pallas import tpu as pltpu

K = 7          # conv kernel size
PAD = K // 2   # "same" padding


def _round_up(v, m):
    return (v + m - 1) // m * m


def spatial_attention_kernel(w_ref, b_ref, x_ref, o_ref,
                             max_acc, sum_acc, pad_buf, shift_buf,
                             *, nb, H, W, Ho, Hp, Wp):
    # w_ref: (2*K*K,) f32 SMEM  — [max-channel taps, avg-channel taps * (1/C)]
    # b_ref: (1,)     f32 SMEM
    # x_ref: (nb, cb, H, W)   VMEM block of the UNPADDED input
    # o_ref: (nb, Ho, Wp)     VMEM lane-dense output block (wrapper crops)
    # max_acc: (nb, H, W) input-dtype running channel max
    # sum_acc: (nb, H, W) f32 running channel sum
    # pad_buf: (Hp, Wp)   f32 zero-bordered working plane
    # shift_buf: (2*K, Hp, Wp) f32 kw-shifted padded planes
    ci = pl.program_id(1)

    # ---- phase 1: running channel max / sum over the C grid axis ----------
    @pl.when(ci == 0)
    def _init():
        max_acc[...] = jnp.full((nb, H, W), -jnp.inf, max_acc.dtype)
        sum_acc[...] = jnp.zeros((nb, H, W), jnp.float32)

    xb = x_ref[...]                                       # (nb, cb, H, W)
    # max in the input dtype (exact); sum accumulates in f32 via the reduction
    # dtype — no materialised f32 copy of the whole block.
    max_acc[...] = jnp.maximum(max_acc[...], jnp.max(xb, axis=1))
    sum_acc[...] = sum_acc[...] + jnp.sum(xb, axis=1, dtype=jnp.float32)

    # ---- phase 2 (last C step): 7x7 conv (2 -> 1 ch) + sigmoid -------------
    @pl.when(ci == pl.num_programs(1) - 1)
    def _finalize():
        # Hoist all 98 SMEM scalar weight reads (and the bias) out of the
        # MAC loops / batch loop.
        wv = [w_ref[i] for i in range(2 * K * K)]
        bias = b_ref[0]

        # Row-strip size for the MAC: keeps the 98-term accumulator
        # vreg-resident even for FPN-scale planes.
        rs = 8
        for cand in (32, 16):
            if Ho % cand == 0:
                rs = cand
                break

        for bi in range(nb):
            # Build kw-shifted copies of the two zero-padded reduction planes.
            # Only kw needs cross-lane movement (one lane roll per kw != PAD);
            # the row padding is one sublane roll; the kh taps below are
            # sublane-offset VMEM loads.
            for p in range(2):
                plane = (max_acc[bi].astype(jnp.float32) if p == 0
                         else sum_acc[bi])                         # (H, W) f32
                pad_buf[...] = jnp.zeros((Hp, Wp), jnp.float32)
                pad_buf[pl.ds(0, H), pl.ds(0, W)] = plane          # aligned start
                # Row r of `rolled` holds reduction row r - PAD (top/bottom
                # conv padding comes from the zero rows >= H of pad_buf).
                rolled = pltpu.roll(pad_buf[...], shift=PAD, axis=0)
                for kw in range(K):
                    s = (PAD - kw) % Wp
                    shift_buf[p * K + kw] = (
                        rolled if s == 0
                        else pltpu.roll(rolled, shift=s, axis=1))
                # Lane wraparound only touches columns >= Wp - PAD >= W + PAD,
                # and their outputs are cropped by the wrapper.

            # 98 taps per output strip = sublane-offset VMEM loads + scalar
            # MACs (VALU/vld bound); sigmoid + store in the output dtype.
            for r0 in range(0, Ho, rs):
                acc = jnp.full((rs, Wp), bias, jnp.float32)
                for p in range(2):
                    for kh in range(K):
                        for kw in range(K):
                            tap = shift_buf[p * K + kw, pl.ds(r0 + kh, rs), :]
                            acc = acc + wv[p * K * K + kh * K + kw] * tap
                o_ref[bi, pl.ds(r0, rs), :] = (
                    jax.nn.sigmoid(acc).astype(o_ref.dtype))


def spatial_attention(x, weight, bias, *, nb=1):
    """x: (N, C, H, W); weight: (1, 2, K, K); bias: (1,). Returns (N,1,H,W)."""
    N, C, H, W = x.shape
    Ho = _round_up(H, 8)                      # sublane-aligned output rows
    Hp = _round_up(Ho + 2 * PAD, 8)           # padded working rows
    Wp = _round_up(W + 2 * PAD, 128)          # padded, lane-dense columns

    out_dtype = x.dtype
    acc_max_dtype = x.dtype                   # channel max is exact in x dtype

    # Fold the 1/C of the channel mean into the avg-channel conv taps.
    w_max = weight[0, 0].astype(jnp.float32).reshape(-1)
    w_avg = (weight[0, 1].astype(jnp.float32) / C).reshape(-1)
    w_flat = jnp.concatenate([w_max, w_avg])            # (2*K*K,)
    b = bias.astype(jnp.float32).reshape(1)

    if N % nb != 0:
        nb = 1

    # ---- generation-aware VMEM budgeting -----------------------------------
    try:
        vmem_physical = int(pltpu.get_tpu_info().vmem_capacity_bytes)
    except Exception:
        vmem_physical = 64 * 1024 * 1024      # conservative (v7x-sized)
    vmem_limit = min(vmem_physical * 3 // 4, 112 * 1024 * 1024)

    def tile_bytes(h, w, itemsize):
        # VMEM footprint of one (h, w) plane after (sublane, lane) tiling.
        sub = 8 * max(1, 4 // itemsize)
        return _round_up(h, sub) * _round_up(w, 128) * itemsize

    in_plane = tile_bytes(H, W, x.dtype.itemsize)
    f32_pad_plane = tile_bytes(Hp, Wp, 4)
    scratch_bytes = (nb * tile_bytes(H, W, jnp.dtype(acc_max_dtype).itemsize)
                     + nb * tile_bytes(H, W, 4)
                     + f32_pad_plane
                     + 2 * K * f32_pad_plane)
    out_bytes = 2 * nb * tile_bytes(Ho, Wp, jnp.dtype(out_dtype).itemsize)
    headroom = 4 * 1024 * 1024
    budget_x = vmem_limit - scratch_bytes - out_bytes - headroom
    per_c = 2 * nb * in_plane                  # double-buffered x block, per channel
    cb = 1
    for d in range(C, 0, -1):
        if C % d == 0 and d * per_c <= budget_x:
            cb = d
            break
    need = scratch_bytes + out_bytes + cb * per_c + headroom
    if need > vmem_limit:                      # cb == 1 fallback: keep limit honest
        vmem_limit = min(vmem_physical, need)
    num_c = C // cb

    kernel = functools.partial(spatial_attention_kernel,
                               nb=nb, H=H, W=W, Ho=Ho, Hp=Hp, Wp=Wp)

    out_padded = pl.pallas_call(
        kernel,
        out_shape=jax.ShapeDtypeStruct((N, Ho, Wp), out_dtype),
        grid=(N // nb, num_c),
        in_specs=[
            pl.BlockSpec(memory_space=pltpu.MemorySpace.SMEM),        # weights
            pl.BlockSpec(memory_space=pltpu.MemorySpace.SMEM),        # bias
            pl.BlockSpec((nb, cb, H, W), lambda n, c: (n, c, 0, 0)),  # unpadded x
        ],
        out_specs=pl.BlockSpec((nb, Ho, Wp), lambda n, c: (n, 0, 0)),
        scratch_shapes=[
            pltpu.VMEM((nb, H, W), acc_max_dtype),     # running channel max
            pltpu.VMEM((nb, H, W), jnp.float32),       # running channel sum
            pltpu.VMEM((Hp, Wp), jnp.float32),         # zero-bordered plane
            pltpu.VMEM((2 * K, Hp, Wp), jnp.float32),  # kw-shifted planes
        ],
        compiler_params=pltpu.CompilerParams(
            dimension_semantics=("parallel", "arbitrary"),
            vmem_limit_bytes=int(vmem_limit)),
    )(w_flat, b, x)

    # Crop the lane-dense slab back to the module's (N, 1, H, W) output.
    return out_padded[:, :H, :W].reshape(N, 1, H, W)


def spatial_attention_reference(x, weight, bias):
    max_map = jnp.max(x, axis=1, keepdims=True)
    avg_map = jnp.mean(x, axis=1, keepdims=True)
    r = jnp.concatenate([max_map, avg_map], axis=1)          # (N, 2, H, W)
    out = lax.conv_general_dilated(
        r, weight, window_strides=(1, 1),
        padding=[(PAD, PAD), (PAD, PAD)],
        dimension_numbers=("NCHW", "OIHW", "NCHW"))
    return jax.nn.sigmoid(out + bias.reshape(1, 1, 1, 1))


if __name__ == "__main__":
    key = jax.random.PRNGKey(0)
    kx, kw = jax.random.split(key)

    N, C, H, W = 2, 4, 16, 16
    x = jax.random.normal(kx, (N, C, H, W), dtype=jnp.float32)

    # Deterministic synthetic parameters (Conv2d(2, 1, 7, padding=3) shapes).
    weight = (jax.random.normal(kw, (1, 2, K, K), dtype=jnp.float32) * 0.1)
    bias = jnp.array([0.01], dtype=jnp.float32)

    out = spatial_attention(x, weight, bias)
    out = jax.block_until_ready(out)

    ref = spatial_attention_reference(x, weight, bias)
    assert out.shape == (N, 1, H, W)
    assert jnp.allclose(out, ref, atol=1e-5, rtol=1e-5), (
        float(jnp.max(jnp.abs(out - ref))))

    print("KERNEL_OK")
</pallas_src>

<mosaic_0001>
module attributes {stable_mosaic.version = 11 : i64} {
  func.func @spatial_attention_kernel(%arg0: i32, %arg1: i32, %arg2: memref<98xf32, #tpu.memory_space<smem>>, %arg3: memref<1xf32, #tpu.memory_space<smem>>, %arg4: memref<1x4x16x16xf32, #tpu.memory_space<vmem>>, %arg5: memref<1x16x128xf32, #tpu.memory_space<vmem>>, %arg6: memref<1x16x16xf32, #tpu.memory_space<vmem>>, %arg7: memref<1x16x16xf32, #tpu.memory_space<vmem>>, %arg8: memref<24x128xf32, #tpu.memory_space<vmem>>, %arg9: memref<14x24x128xf32, #tpu.memory_space<vmem>>) attributes {dimension_semantics = [#tpu.dimension_semantics<parallel>, #tpu.dimension_semantics<arbitrary>], iteration_bounds = array<i64: 2, 1>, scalar_prefetch = 0 : i64, scratch_operands = 4 : i64, tpu.core_type = #tpu.core_type<tc>, window_params = [{transform_indices = @transform_0, window_bounds = array<i64: 98>}, {transform_indices = @transform_1, window_bounds = array<i64: 1>}, {transform_indices = @transform_2, window_bounds = array<i64: 1, 4, 16, 16>}, {transform_indices = @transform_3, window_bounds = array<i64: 1, 16, 128>}]} {
    %c0_i32 = arith.constant 0 : i32
    %0 = arith.cmpi eq, %arg1, %c0_i32 : i32
    %1 = arith.extui %0 : i1 to i32
    %c0_i32_0 = arith.constant 0 : i32
    %2 = arith.cmpi ne, %1, %c0_i32_0 : i32
    scf.if %2 {
      %cst_19 = arith.constant 0xFF800000 : f32
      %15 = vector.broadcast %cst_19 : f32 to vector<1x16x16xf32>
      %c0_20 = arith.constant 0 : index
      %c0_21 = arith.constant 0 : index
      %c0_22 = arith.constant 0 : index
      %16 = vector.load %arg6[%c0_20, %c0_21, %c0_22] : memref<1x16x16xf32, #tpu.memory_space<vmem>>, vector<1x16x16xf32>
      tpu.vector_store %arg6[%c0_20, %c0_21, %c0_22], %15 {strides = array<i32>} : memref<1x16x16xf32, #tpu.memory_space<vmem>>, vector<1x16x16xf32>,
      %cst_23 = arith.constant 0.000000e+00 : f32
      %17 = vector.broadcast %cst_23 : f32 to vector<1x16x16xf32>
      %c0_24 = arith.constant 0 : index
      %c0_25 = arith.constant 0 : index
      %c0_26 = arith.constant 0 : index
      %18 = vector.load %arg7[%c0_24, %c0_25, %c0_26] : memref<1x16x16xf32, #tpu.memory_space<vmem>>, vector<1x16x16xf32>
      tpu.vector_store %arg7[%c0_24, %c0_25, %c0_26], %17 {strides = array<i32>} : memref<1x16x16xf32, #tpu.memory_space<vmem>>, vector<1x16x16xf32>,
    } else {
    }
    %c0 = arith.constant 0 : index
    %c0_1 = arith.constant 0 : index
    %c0_2 = arith.constant 0 : index
    %c0_3 = arith.constant 0 : index
    %3 = vector.load %arg4[%c0, %c0_1, %c0_2, %c0_3] : memref<1x4x16x16xf32, #tpu.memory_space<vmem>>, vector<1x4x16x16xf32>
    %c0_4 = arith.constant 0 : index
    %c0_5 = arith.constant 0 : index
    %c0_6 = arith.constant 0 : index
    %4 = vector.load %arg6[%c0_4, %c0_5, %c0_6] : memref<1x16x16xf32, #tpu.memory_space<vmem>>, vector<1x16x16xf32>
    %cst = arith.constant dense<0xFF800000> : vector<1x16x16xf32>
    %5 = vector.multi_reduction <maximumf>, %3, %cst [1] : vector<1x4x16x16xf32> to vector<1x16x16xf32>
    %6 = arith.maximumf %4, %5 : vector<1x16x16xf32>
    %c0_7 = arith.constant 0 : index
    %c0_8 = arith.constant 0 : index
    %c0_9 = arith.constant 0 : index
    %7 = vector.load %arg6[%c0_7, %c0_8, %c0_9] : memref<1x16x16xf32, #tpu.memory_space<vmem>>, vector<1x16x16xf32>
    tpu.vector_store %arg6[%c0_7, %c0_8, %c0_9], %6 {strides = array<i32>} : memref<1x16x16xf32, #tpu.memory_space<vmem>>, vector<1x16x16xf32>,
    %c0_10 = arith.constant 0 : index
    %c0_11 = arith.constant 0 : index
    %c0_12 = arith.constant 0 : index
    %8 = vector.load %arg7[%c0_10, %c0_11, %c0_12] : memref<1x16x16xf32, #tpu.memory_space<vmem>>, vector<1x16x16xf32>
    %cst_13 = arith.constant dense<0.000000e+00> : vector<1x16x16xf32>
    %9 = vector.multi_reduction <add>, %3, %cst_13 [1] : vector<1x4x16x16xf32> to vector<1x16x16xf32>
    %10 = arith.addf %8, %9 : vector<1x16x16xf32>
    %c0_14 = arith.constant 0 : index
    %c0_15 = arith.constant 0 : index
    %c0_16 = arith.constant 0 : index
    %11 = vector.load %arg7[%c0_14, %c0_15, %c0_16] : memref<1x16x16xf32, #tpu.memory_space<vmem>>, vector<1x16x16xf32>
    tpu.vector_store %arg7[%c0_14, %c0_15, %c0_16], %10 {strides = array<i32>} : memref<1x16x16xf32, #tpu.memory_space<vmem>>, vector<1x16x16xf32>,
    %c0_i32_17 = arith.constant 0 : i32
    %12 = arith.cmpi eq, %arg1, %c0_i32_17 : i32
    %13 = arith.extui %12 : i1 to i32
    %c0_i32_18 = arith.constant 0 : i32
    %14 = arith.cmpi ne, %13, %c0_i32_18 : i32
    scf.if %14 {
      %c0_19 = arith.constant 0 : index
      %15 = memref.load %arg2[%c0_19] : memref<98xf32, #tpu.memory_space<smem>>
      %c1 = arith.constant 1 : index
      %16 = memref.load %arg2[%c1] : memref<98xf32, #tpu.memory_space<smem>>
      %c2 = arith.constant 2 : index
      %17 = memref.load %arg2[%c2] : memref<98xf32, #tpu.memory_space<smem>>
      %c3 = arith.constant 3 : index
      %18 = memref.load %arg2[%c3] : memref<98xf32, #tpu.memory_space<smem>>
      %c4 = arith.constant 4 : index
      %19 = memref.load %arg2[%c4] : memref<98xf32, #tpu.memory_space<smem>>
      %c5 = arith.constant 5 : index
      %20 = memref.load %arg2[%c5] : memref<98xf32, #tpu.memory_space<smem>>
      %c6 = arith.constant 6 : index
      %21 = memref.load %arg2[%c6] : memref<98xf32, #tpu.memory_space<smem>>
      %c7 = arith.constant 7 : index
      %22 = memref.load %arg2[%c7] : memref<98xf32, #tpu.memory_space<smem>>
      %c8 = arith.constant 8 : index
      %23 = memref.load %arg2[%c8] : memref<98xf32, #tpu.memory_space<smem>>
      %c9 = arith.constant 9 : index
      %24 = memref.load %arg2[%c9] : memref<98xf32, #tpu.memory_space<smem>>
      %c10 = arith.constant 10 : index
      %25 = memref.load %arg2[%c10] : memref<98xf32, #tpu.memory_space<smem>>
      %c11 = arith.constant 11 : index
      %26 = memref.load %arg2[%c11] : memref<98xf32, #tpu.memory_space<smem>>
      %c12 = arith.constant 12 : index
      %27 = memref.load %arg2[%c12] : memref<98xf32, #tpu.memory_space<smem>>
      %c13 = arith.constant 13 : index
      %28 = memref.load %arg2[%c13] : memref<98xf32, #tpu.memory_space<smem>>
      %c14 = arith.constant 14 : index
      %29 = memref.load %arg2[%c14] : memref<98xf32, #tpu.memory_space<smem>>
      %c15 = arith.constant 15 : index
      %30 = memref.load %arg2[%c15] : memref<98xf32, #tpu.memory_space<smem>>
      %c16 = arith.constant 16 : index
      %31 = memref.load %arg2[%c16] : memref<98xf32, #tpu.memory_space<smem>>
      %c17 = arith.constant 17 : index
      %32 = memref.load %arg2[%c17] : memref<98xf32, #tpu.memory_space<smem>>
      %c18 = arith.constant 18 : index
      %33 = memref.load %arg2[%c18] : memref<98xf32, #tpu.memory_space<smem>>
      %c19 = arith.constant 19 : index
      %34 = memref.load %arg2[%c19] : memref<98xf32, #tpu.memory_space<smem>>
      %c20 = arith.constant 20 : index
      %35 = memref.load %arg2[%c20] : memref<98xf32, #tpu.memory_space<smem>>
      %c21 = arith.constant 21 : index
      %36 = memref.load %arg2[%c21] : memref<98xf32, #tpu.memory_space<smem>>
      %c22 = arith.constant 22 : index
      %37 = memref.load %arg2[%c22] : memref<98xf32, #tpu.memory_space<smem>>
      %c23 = arith.constant 23 : index
      %38 = memref.load %arg2[%c23] : memref<98xf32, #tpu.memory_space<smem>>
      %c24 = arith.constant 24 : index
      %39 = memref.load %arg2[%c24] : memref<98xf32, #tpu.memory_space<smem>>
      %c25 = arith.constant 25 : index
      %40 = memref.load %arg2[%c25] : memref<98xf32, #tpu.memory_space<smem>>
      %c26 = arith.constant 26 : index
      %41 = memref.load %arg2[%c26] : memref<98xf32, #tpu.memory_space<smem>>
      %c27 = arith.constant 27 : index
      %42 = memref.load %arg2[%c27] : memref<98xf32, #tpu.memory_space<smem>>
      %c28 = arith.constant 28 : index
      %43 = memref.load %arg2[%c28] : memref<98xf32, #tpu.memory_space<smem>>
      %c29 = arith.constant 29 : index
      %44 = memref.load %arg2[%c29] : memref<98xf32, #tpu.memory_space<smem>>
      %c30 = arith.constant 30 : index
      %45 = memref.load %arg2[%c30] : memref<98xf32, #tpu.memory_space<smem>>
      %c31 = arith.constant 31 : index
      %46 = memref.load %arg2[%c31] : memref<98xf32, #tpu.memory_space<smem>>
      %c32 = arith.constant 32 : index
      %47 = memref.load %arg2[%c32] : memref<98xf32, #tpu.memory_space<smem>>
      %c33 = arith.constant 33 : index
      %48 = memref.load %arg2[%c33] : memref<98xf32, #tpu.memory_space<smem>>
      %c34 = arith.constant 34 : index
      %49 = memref.load %arg2[%c34] : memref<98xf32, #tpu.memory_space<smem>>
      %c35 = arith.constant 35 : index
      %50 = memref.load %arg2[%c35] : memref<98xf32, #tpu.memory_space<smem>>
      %c36 = arith.constant 36 : index
      %51 = memref.load %arg2[%c36] : memref<98xf32, #tpu.memory_space<smem>>
      %c37 = arith.constant 37 : index
      %52 = memref.load %arg2[%c37] : memref<98xf32, #tpu.memory_space<smem>>
      %c38 = arith.constant 38 : index
      %53 = memref.load %arg2[%c38] : memref<98xf32, #tpu.memory_space<smem>>
      %c39 = arith.constant 39 : index
      %54 = memref.load %arg2[%c39] : memref<98xf32, #tpu.memory_space<smem>>
      %c40 = arith.constant 40 : index
      %55 = memref.load %arg2[%c40] : memref<98xf32, #tpu.memory_space<smem>>
      %c41 = arith.constant 41 : index
      %56 = memref.load %arg2[%c41] : memref<98xf32, #tpu.memory_space<smem>>
      %c42 = arith.constant 42 : index
      %57 = memref.load %arg2[%c42] : memref<98xf32, #tpu.memory_space<smem>>
      %c43 = arith.constant 43 : index
      %58 = memref.load %arg2[%c43] : memref<98xf32, #tpu.memory_space<smem>>
      %c44 = arith.constant 44 : index
      %59 = memref.load %arg2[%c44] : memref<98xf32, #tpu.memory_space<smem>>
      %c45 = arith.constant 45 : index
      %60 = memref.load %arg2[%c45] : memref<98xf32, #tpu.memory_space<smem>>
      %c46 = arith.constant 46 : index
      %61 = memref.load %arg2[%c46] : memref<98xf32, #tpu.memory_space<smem>>
      %c47 = arith.constant 47 : index
      %62 = memref.load %arg2[%c47] : memref<98xf32, #tpu.memory_space<smem>>
      %c48 = arith.constant 48 : index
      %63 = memref.load %arg2[%c48] : memref<98xf32, #tpu.memory_space<smem>>
      %c49 = arith.constant 49 : index
      %64 = memref.load %arg2[%c49] : memref<98xf32, #tpu.memory_space<smem>>
      %c50 = arith.constant 50 : index
      %65 = memref.load %arg2[%c50] : memref<98xf32, #tpu.memory_space<smem>>
      %c51 = arith.constant 51 : index
      %66 = memref.load %arg2[%c51] : memref<98xf32, #tpu.memory_space<smem>>
      %c52 = arith.constant 52 : index
      %67 = memref.load %arg2[%c52] : memref<98xf32, #tpu.memory_space<smem>>
      %c53 = arith.constant 53 : index
      %68 = memref.load %arg2[%c53] : memref<98xf32, #tpu.memory_space<smem>>
      %c54 = arith.constant 54 : index
      %69 = memref.load %arg2[%c54] : memref<98xf32, #tpu.memory_space<smem>>
      %c55 = arith.constant 55 : index
      %70 = memref.load %arg2[%c55] : memref<98xf32, #tpu.memory_space<smem>>
      %c56 = arith.constant 56 : index
      %71 = memref.load %arg2[%c56] : memref<98xf32, #tpu.memory_space<smem>>
      %c57 = arith.constant 57 : index
      %72 = memref.load %arg2[%c57] : memref<98xf32, #tpu.memory_space<smem>>
      %c58 = arith.constant 58 : index
      %73 = memref.load %arg2[%c58] : memref<98xf32, #tpu.memory_space<smem>>
      %c59 = arith.constant 59 : index
      %74 = memref.load %arg2[%c59] : memref<98xf32, #tpu.memory_space<smem>>
      %c60 = arith.constant 60 : index
      %75 = memref.load %arg2[%c60] : memref<98xf32, #tpu.memory_space<smem>>
      %c61 = arith.constant 61 : index
      %76 = memref.load %arg2[%c61] : memref<98xf32, #tpu.memory_space<smem>>
      %c62 = arith.constant 62 : index
      %77 = memref.load %arg2[%c62] : memref<98xf32, #tpu.memory_space<smem>>
      %c63 = arith.constant 63 : index
      %78 = memref.load %arg2[%c63] : memref<98xf32, #tpu.memory_space<smem>>
      %c64 = arith.constant 64 : index
      %79 = memref.load %arg2[%c64] : memref<98xf32, #tpu.memory_space<smem>>
      %c65 = arith.constant 65 : index
      %80 = memref.load %arg2[%c65] : memref<98xf32, #tpu.memory_space<smem>>
      %c66 = arith.constant 66 : index
      %81 = memref.load %arg2[%c66] : memref<98xf32, #tpu.memory_space<smem>>
      %c67 = arith.constant 67 : index
      %82 = memref.load %arg2[%c67] : memref<98xf32, #tpu.memory_space<smem>>
      %c68 = arith.constant 68 : index
      %83 = memref.load %arg2[%c68] : memref<98xf32, #tpu.memory_space<smem>>
      %c69 = arith.constant 69 : index
      %84 = memref.load %arg2[%c69] : memref<98xf32, #tpu.memory_space<smem>>
      %c70 = arith.constant 70 : index
      %85 = memref.load %arg2[%c70] : memref<98xf32, #tpu.memory_space<smem>>
      %c71 = arith.constant 71 : index
      %86 = memref.load %arg2[%c71] : memref<98xf32, #tpu.memory_space<smem>>
      %c72 = arith.constant 72 : index
      %87 = memref.load %arg2[%c72] : memref<98xf32, #tpu.memory_space<smem>>
      %c73 = arith.constant 73 : index
      %88 = memref.load %arg2[%c73] : memref<98xf32, #tpu.memory_space<smem>>
      %c74 = arith.constant 74 : index
      %89 = memref.load %arg2[%c74] : memref<98xf32, #tpu.memory_space<smem>>
      %c75 = arith.constant 75 : index
      %90 = memref.load %arg2[%c75] : memref<98xf32, #tpu.memory_space<smem>>
      %c76 = arith.constant 76 : index
      %91 = memref.load %arg2[%c76] : memref<98xf32, #tpu.memory_space<smem>>
      %c77 = arith.constant 77 : index
      %92 = memref.load %arg2[%c77] : memref<98xf32, #tpu.memory_space<smem>>
      %c78 = arith.constant 78 : index
      %93 = memref.load %arg2[%c78] : memref<98xf32, #tpu.memory_space<smem>>
      %c79 = arith.constant 79 : index
      %94 = memref.load %arg2[%c79] : memref<98xf32, #tpu.memory_space<smem>>
      %c80 = arith.constant 80 : index
      %95 = memref.load %arg2[%c80] : memref<98xf32, #tpu.memory_space<smem>>
      %c81 = arith.constant 81 : index
      %96 = memref.load %arg2[%c81] : memref<98xf32, #tpu.memory_space<smem>>
      %c82 = arith.constant 82 : index
      %97 = memref.load %arg2[%c82] : memref<98xf32, #tpu.memory_space<smem>>
      %c83 = arith.constant 83 : index
      %98 = memref.load %arg2[%c83] : memref<98xf32, #tpu.memory_space<smem>>
      %c84 = arith.constant 84 : index
      %99 = memref.load %arg2[%c84] : memref<98xf32, #tpu.memory_space<smem>>
      %c85 = arith.constant 85 : index
      %100 = memref.load %arg2[%c85] : memref<98xf32, #tpu.memory_space<smem>>
      %c86 = arith.constant 86 : index
      %101 = memref.load %arg2[%c86] : memref<98xf32, #tpu.memory_space<smem>>
      %c87 = arith.constant 87 : index
      %102 = memref.load %arg2[%c87] : memref<98xf32, #tpu.memory_space<smem>>
      %c88 = arith.constant 88 : index
      %103 = memref.load %arg2[%c88] : memref<98xf32, #tpu.memory_space<smem>>
      %c89 = arith.constant 89 : index
      %104 = memref.load %arg2[%c89] : memref<98xf32, #tpu.memory_space<smem>>
      %c90 = arith.constant 90 : index
      %105 = memref.load %arg2[%c90] : memref<98xf32, #tpu.memory_space<smem>>
      %c91 = arith.constant 91 : index
      %106 = memref.load %arg2[%c91] : memref<98xf32, #tpu.memory_space<smem>>
      %c92 = arith.constant 92 : index
      %107 = memref.load %arg2[%c92] : memref<98xf32, #tpu.memory_space<smem>>
      %c93 = arith.constant 93 : index
      %108 = memref.load %arg2[%c93] : memref<98xf32, #tpu.memory_space<smem>>
      %c94 = arith.constant 94 : index
      %109 = memref.load %arg2[%c94] : memref<98xf32, #tpu.memory_space<smem>>
      %c95 = arith.constant 95 : index
      %110 = memref.load %arg2[%c95] : memref<98xf32, #tpu.memory_space<smem>>
      %c96 = arith.constant 96 : index
      %111 = memref.load %arg2[%c96] : memref<98xf32, #tpu.memory_space<smem>>
      %c97 = arith.constant 97 : index
      %112 = memref.load %arg2[%c97] : memref<98xf32, #tpu.memory_space<smem>>
      %c0_20 = arith.constant 0 : index
      %113 = memref.load %arg3[%c0_20] : memref<1xf32, #tpu.memory_space<smem>>
      %c0_21 = arith.constant 0 : index
      %c0_22 = arith.constant 0 : index
      %c0_23 = arith.constant 0 : index
      %114 = vector.load %arg6[%c0_21, %c0_22, %c0_23] : memref<1x16x16xf32, #tpu.memory_space<vmem>>, vector<1x16x16xf32>
      %115 = vector.shape_cast %114 : vector<1x16x16xf32> to vector<16x16xf32>
      %cst_24 = arith.constant 0.000000e+00 : f32
      %116 = vector.broadcast %cst_24 : f32 to vector<24x128xf32>
      %c0_25 = arith.constant 0 : index
      %c0_26 = arith.constant 0 : index
      %117 = vector.load %arg8[%c0_25, %c0_26] : memref<24x128xf32, #tpu.memory_space<vmem>>, vector<24x128xf32>
      tpu.vector_store %arg8[%c0_25, %c0_26], %116 {strides = array<i32>} : memref<24x128xf32, #tpu.memory_space<vmem>>, vector<24x128xf32>,
      %c0_27 = arith.constant 0 : index
      %c0_28 = arith.constant 0 : index
      %118 = vector.load %arg8[%c0_27, %c0_28] : memref<24x128xf32, #tpu.memory_space<vmem>>, vector<16x16xf32>
      tpu.vector_store %arg8[%c0_27, %c0_28], %115 {strides = array<i32>} : memref<24x128xf32, #tpu.memory_space<vmem>>, vector<16x16xf32>,
      %c0_29 = arith.constant 0 : index
      %c0_30 = arith.constant 0 : index
      %119 = vector.load %arg8[%c0_29, %c0_30] : memref<24x128xf32, #tpu.memory_space<vmem>>, vector<24x128xf32>
      %c3_i32 = arith.constant 3 : i32
      %120 = tpu.dynamic_rotate %119 by %c3_i32 dim 0 : vector<24x128xf32>, i32 -> vector<24x128xf32>
      %c3_i32_31 = arith.constant 3 : i32
      %121 = tpu.dynamic_rotate %120 by %c3_i32_31 dim 1 : vector<24x128xf32>, i32 -> vector<24x128xf32>
      %c0_32 = arith.constant 0 : index
      %c0_33 = arith.constant 0 : index
      %c0_34 = arith.constant 0 : index
      %122 = vector.load %arg9[%c0_32, %c0_33, %c0_34] : memref<14x24x128xf32, #tpu.memory_space<vmem>>, vector<1x24x128xf32>
      %123 = vector.shape_cast %122 : vector<1x24x128xf32> to vector<24x128xf32>
      %124 = vector.shape_cast %121 : vector<24x128xf32> to vector<1x24x128xf32>
      tpu.vector_store %arg9[%c0_32, %c0_33, %c0_34], %124 {strides = array<i32>} : memref<14x24x128xf32, #tpu.memory_space<vmem>>, vector<1x24x128xf32>,
      %c2_i32 = arith.constant 2 : i32
      %125 = tpu.dynamic_rotate %120 by %c2_i32 dim 1 : vector<24x128xf32>, i32 -> vector<24x128xf32>
      %c1_35 = arith.constant 1 : index
      %c0_36 = arith.constant 0 : index
      %c0_37 = arith.constant 0 : index
      %126 = vector.load %arg9[%c1_35, %c0_36, %c0_37] : memref<14x24x128xf32, #tpu.memory_space<vmem>>, vector<1x24x128xf32>
      %127 = vector.shape_cast %126 : vector<1x24x128xf32> to vector<24x128xf32>
      %128 = vector.shape_cast %125 : vector<24x128xf32> to vector<1x24x128xf32>
      tpu.vector_store %arg9[%c1_35, %c0_36, %c0_37], %128 {strides = array<i32>} : memref<14x24x128xf32, #tpu.memory_space<vmem>>, vector<1x24x128xf32>,
      %c1_i32 = arith.constant 1 : i32
      %129 = tpu.dynamic_rotate %120 by %c1_i32 dim 1 : vector<24x128xf32>, i32 -> vector<24x128xf32>
      %c2_38 = arith.constant 2 : index
      %c0_39 = arith.constant 0 : index
      %c0_40 = arith.constant 0 : index
      %130 = vector.load %arg9[%c2_38, %c0_39, %c0_40] : memref<14x24x128xf32, #tpu.memory_space<vmem>>, vector<1x24x128xf32>
      %131 = vector.shape_cast %130 : vector<1x24x128xf32> to vector<24x128xf32>
      %132 = vector.shape_cast %129 : vector<24x128xf32> to vector<1x24x128xf32>
      tpu.vector_store %arg9[%c2_38, %c0_39, %c0_40], %132 {strides = array<i32>} : memref<14x24x128xf32, #tpu.memory_space<vmem>>, vector<1x24x128xf32>,
      %c3_41 = arith.constant 3 : index
      %c0_42 = arith.constant 0 : index
      %c0_43 = arith.constant 0 : index
      %133 = vector.load %arg9[%c3_41, %c0_42, %c0_43] : memref<14x24x128xf32, #tpu.memory_space<vmem>>, vector<1x24x128xf32>
      %134 = vector.shape_cast %133 : vector<1x24x128xf32> to vector<24x128xf32>
      %135 = vector.shape_cast %120 : vector<24x128xf32> to vector<1x24x128xf32>
      tpu.vector_store %arg9[%c3_41, %c0_42, %c0_43], %135 {strides = array<i32>} : memref<14x24x128xf32, #tpu.memory_space<vmem>>, vector<1x24x128xf32>,
      %c127_i32 = arith.constant 127 : i32
      %136 = tpu.dynamic_rotate %120 by %c127_i32 dim 1 : vector<24x128xf32>, i32 -> vector<24x128xf32>
      %c4_44 = arith.constant 4 : index
      %c0_45 = arith.constant 0 : index
      %c0_46 = arith.constant 0 : index
      %137 = vector.load %arg9[%c4_44, %c0_45, %c0_46] : memref<14x24x128xf32, #tpu.memory_space<vmem>>, vector<1x24x128xf32>
      %138 = vector.shape_cast %137 : vector<1x24x128xf32> to vector<24x128xf32>
      %139 = vector.shape_cast %136 : vector<24x128xf32> to vector<1x24x128xf32>
      tpu.vector_store %arg9[%c4_44, %c0_45, %c0_46], %139 {strides = array<i32>} : memref<14x24x128xf32, #tpu.memory_space<vmem>>, vector<1x24x128xf32>,
      %c126_i32 = arith.constant 126 : i32
      %140 = tpu.dynamic_rotate %120 by %c126_i32 dim 1 : vector<24x128xf32>, i32 -> vector<24x128xf32>
      %c5_47 = arith.constant 5 : index
      %c0_48 = arith.constant 0 : index
      %c0_49 = arith.constant 0 : index
      %141 = vector.load %arg9[%c5_47, %c0_48, %c0_49] : memref<14x24x128xf32, #tpu.memory_space<vmem>>, vector<1x24x128xf32>
      %142 = vector.shape_cast %141 : vector<1x24x128xf32> to vector<24x128xf32>
      %143 = vector.shape_cast %140 : vector<24x128xf32> to vector<1x24x128xf32>
      tpu.vector_store %arg9[%c5_47, %c0_48, %c0_49], %143 {strides = array<i32>} : memref<14x24x128xf32, #tpu.memory_space<vmem>>, vector<1x24x128xf32>,
      %c125_i32 = arith.constant 125 : i32
      %144 = tpu.dynamic_rotate %120 by %c125_i32 dim 1 : vector<24x128xf32>, i32 -> vector<24x128xf32>
      %c6_50 = arith.constant 6 : index
      %c0_51 = arith.constant 0 : index
      %c0_52 = arith.constant 0 : index
      %145 = vector.load %arg9[%c6_50, %c0_51, %c0_52] : memref<14x24x128xf32, #tpu.memory_space<vmem>>, vector<1x24x128xf32>
      %146 = vector.shape_cast %145 : vector<1x24x128xf32> to vector<24x128xf32>
      %147 = vector.shape_cast %144 : vector<24x128xf32> to vector<1x24x128xf32>
      tpu.vector_store %arg9[%c6_50, %c0_51, %c0_52], %147 {strides = array<i32>} : memref<14x24x128xf32, #tpu.memory_space<vmem>>, vector<1x24x128xf32>,
      %c0_53 = arith.constant 0 : index
      %c0_54 = arith.constant 0 : index
      %c0_55 = arith.constant 0 : index
      %148 = vector.load %arg7[%c0_53, %c0_54, %c0_55] : memref<1x16x16xf32, #tpu.memory_space<vmem>>, vector<1x16x16xf32>
      %149 = vector.shape_cast %148 : vector<1x16x16xf32> to vector<16x16xf32>
      %cst_56 = arith.constant 0.000000e+00 : f32
      %150 = vector.broadcast %cst_56 : f32 to vector<24x128xf32>
      %c0_57 = arith.constant 0 : index
      %c0_58 = arith.constant 0 : index
      %151 = vector.load %arg8[%c0_57, %c0_58] : memref<24x128xf32, #tpu.memory_space<vmem>>, vector<24x128xf32>
      tpu.vector_store %arg8[%c0_57, %c0_58], %150 {strides = array<i32>} : memref<24x128xf32, #tpu.memory_space<vmem>>, vector<24x128xf32>,
      %c0_59 = arith.constant 0 : index
      %c0_60 = arith.constant 0 : index
      %152 = vector.load %arg8[%c0_59, %c0_60] : memref<24x128xf32, #tpu.memory_space<vmem>>, vector<16x16xf32>
      tpu.vector_store %arg8[%c0_59, %c0_60], %149 {strides = array<i32>} : memref<24x128xf32, #tpu.memory_space<vmem>>, vector<16x16xf32>,
      %c0_61 = arith.constant 0 : index
      %c0_62 = arith.constant 0 : index
      %153 = vector.load %arg8[%c0_61, %c0_62] : memref<24x128xf32, #tpu.memory_space<vmem>>, vector<24x128xf32>
      %c3_i32_63 = arith.constant 3 : i32
      %154 = tpu.dynamic_rotate %153 by %c3_i32_63 dim 0 : vector<24x128xf32>, i32 -> vector<24x128xf32>
      %c3_i32_64 = arith.constant 3 : i32
      %155 = tpu.dynamic_rotate %154 by %c3_i32_64 dim 1 : vector<24x128xf32>, i32 -> vector<24x128xf32>
      %c7_65 = arith.constant 7 : index
      %c0_66 = arith.constant 0 : index
      %c0_67 = arith.constant 0 : index
      %156 = vector.load %arg9[%c7_65, %c0_66, %c0_67] : memref<14x24x128xf32, #tpu.memory_space<vmem>>, vector<1x24x128xf32>
      %157 = vector.shape_cast %156 : vector<1x24x128xf32> to vector<24x128xf32>
      %158 = vector.shape_cast %155 : vector<24x128xf32> to vector<1x24x128xf32>
      tpu.vector_store %arg9[%c7_65, %c0_66, %c0_67], %158 {strides = array<i32>} : memref<14x24x128xf32, #tpu.memory_space<vmem>>, vector<1x24x128xf32>,
      %c2_i32_68 = arith.constant 2 : i32
      %159 = tpu.dynamic_rotate %154 by %c2_i32_68 dim 1 : vector<24x128xf32>, i32 -> vector<24x128xf32>
      %c8_69 = arith.constant 8 : index
      %c0_70 = arith.constant 0 : index
      %c0_71 = arith.constant 0 : index
      %160 = vector.load %arg9[%c8_69, %c0_70, %c0_71] : memref<14x24x128xf32, #tpu.memory_space<vmem>>, vector<1x24x128xf32>
      %161 = vector.shape_cast %160 : vector<1x24x128xf32> to vector<24x128xf32>
      %162 = vector.shape_cast %159 : vector<24x128xf32> to vector<1x24x128xf32>
      tpu.vector_store %arg9[%c8_69, %c0_70, %c0_71], %162 {strides = array<i32>} : memref<14x24x128xf32, #tpu.memory_space<vmem>>, vector<1x24x128xf32>,
      %c1_i32_72 = arith.constant 1 : i32
      %163 = tpu.dynamic_rotate %154 by %c1_i32_72 dim 1 : vector<24x128xf32>, i32 -> vector<24x128xf32>
      %c9_73 = arith.constant 9 : index
      %c0_74 = arith.constant 0 : index
      %c0_75 = arith.constant 0 : index
      %164 = vector.load %arg9[%c9_73, %c0_74, %c0_75] : memref<14x24x128xf32, #tpu.memory_space<vmem>>, vector<1x24x128xf32>
      %165 = vector.shape_cast %164 : vector<1x24x128xf32> to vector<24x128xf32>
      %166 = vector.shape_cast %163 : vector<24x128xf32> to vector<1x24x128xf32>
      tpu.vector_store %arg9[%c9_73, %c0_74, %c0_75], %166 {strides = array<i32>} : memref<14x24x128xf32, #tpu.memory_space<vmem>>, vector<1x24x128xf32>,
      %c10_76 = arith.constant 10 : index
      %c0_77 = arith.constant 0 : index
      %c0_78 = arith.constant 0 : index
      %167 = vector.load %arg9[%c10_76, %c0_77, %c0_78] : memref<14x24x128xf32, #tpu.memory_space<vmem>>, vector<1x24x128xf32>
      %168 = vector.shape_cast %167 : vector<1x24x128xf32> to vector<24x128xf32>
      %169 = vector.shape_cast %154 : vector<24x128xf32> to vector<1x24x128xf32>
      tpu.vector_store %arg9[%c10_76, %c0_77, %c0_78], %169 {strides = array<i32>} : memref<14x24x128xf32, #tpu.memory_space<vmem>>, vector<1x24x128xf32>,
      %c127_i32_79 = arith.constant 127 : i32
      %170 = tpu.dynamic_rotate %154 by %c127_i32_79 dim 1 : vector<24x128xf32>, i32 -> vector<24x128xf32>
      %c11_80 = arith.constant 11 : index
      %c0_81 = arith.constant 0 : index
      %c0_82 = arith.constant 0 : index
      %171 = vector.load %arg9[%c11_80, %c0_81, %c0_82] : memref<14x24x128xf32, #tpu.memory_space<vmem>>, vector<1x24x128xf32>
      %172 = vector.shape_cast %171 : vector<1x24x128xf32> to vector<24x128xf32>
      %173 = vector.shape_cast %170 : vector<24x128xf32> to vector<1x24x128xf32>
      tpu.vector_store %arg9[%c11_80, %c0_81, %c0_82], %173 {strides = array<i32>} : memref<14x24x128xf32, #tpu.memory_space<vmem>>, vector<1x24x128xf32>,
      %c126_i32_83 = arith.constant 126 : i32
      %174 = tpu.dynamic_rotate %154 by %c126_i32_83 dim 1 : vector<24x128xf32>, i32 -> vector<24x128xf32>
      %c12_84 = arith.constant 12 : index
      %c0_85 = arith.constant 0 : index
      %c0_86 = arith.constant 0 : index
      %175 = vector.load %arg9[%c12_84, %c0_85, %c0_86] : memref<14x24x128xf32, #tpu.memory_space<vmem>>, vector<1x24x128xf32>
      %176 = vector.shape_cast %175 : vector<1x24x128xf32> to vector<24x128xf32>
      %177 = vector.shape_cast %174 : vector<24x128xf32> to vector<1x24x128xf32>
      tpu.vector_store %arg9[%c12_84, %c0_85, %c0_86], %177 {strides = array<i32>} : memref<14x24x128xf32, #tpu.memory_space<vmem>>, vector<1x24x128xf32>,
      %c125_i32_87 = arith.constant 125 : i32
      %178 = tpu.dynamic_rotate %154 by %c125_i32_87 dim 1 : vector<24x128xf32>, i32 -> vector<24x128xf32>
      %c13_88 = arith.constant 13 : index
      %c0_89 = arith.constant 0 : index
      %c0_90 = arith.constant 0 : index
      %179 = vector.load %arg9[%c13_88, %c0_89, %c0_90] : memref<14x24x128xf32, #tpu.memory_space<vmem>>, vector<1x24x128xf32>
      %180 = vector.shape_cast %179 : vector<1x24x128xf32> to vector<24x128xf32>
      %181 = vector.shape_cast %178 : vector<24x128xf32> to vector<1x24x128xf32>
      tpu.vector_store %arg9[%c13_88, %c0_89, %c0_90], %181 {strides = array<i32>} : memref<14x24x128xf32, #tpu.memory_space<vmem>>, vector<1x24x128xf32>,
      %182 = vector.broadcast %113 : f32 to vector<16x128xf32>
      %c0_91 = arith.constant 0 : index
      %c0_92 = arith.constant 0 : index
      %c0_93 = arith.constant 0 : index
      %183 = vector.load %arg9[%c0_91, %c0_92, %c0_93] : memref<14x24x128xf32, #tpu.memory_space<vmem>>, vector<1x16x128xf32>
      %184 = vector.shape_cast %183 : vector<1x16x128xf32> to vector<16x128xf32>
      %185 = vector.broadcast %15 : f32 to vector<16x128xf32>
      %186 = arith.mulf %185, %184 : vector<16x128xf32>
      %187 = arith.addf %182, %186 : vector<16x128xf32>
      %c1_94 = arith.constant 1 : index
      %c0_95 = arith.constant 0 : index
      %c0_96 = arith.constant 0 : index
      %188 = vector.load %arg9[%c1_94, %c0_95, %c0_96] : memref<14x24x128xf32, #tpu.memory_space<vmem>>, vector<1x16x128xf32>
      %189 = vector.shape_cast %188 : vector<1x16x128xf32> to vector<16x128xf32>
      %190 = vector.broadcast %16 : f32 to vector<16x128xf32>
      %191 = arith.mulf %190, %189 : vector<16x128xf32>
      %192 = arith.addf %187, %191 : vector<16x128xf32>
      %c2_97 = arith.constant 2 : index
      %c0_98 = arith.constant 0 : index
      %c0_99 = arith.constant 0 : index
      %193 = vector.load %arg9[%c2_97, %c0_98, %c0_99] : memref<14x24x128xf32, #tpu.memory_space<vmem>>, vector<1x16x128xf32>
      %194 = vector.shape_cast %193 : vector<1x16x128xf32> to vector<16x128xf32>
      %195 = vector.broadcast %17 : f32 to vector<16x128xf32>
      %196 = arith.mulf %195, %194 : vector<16x128xf32>
      %197 = arith.addf %192, %196 : vector<16x128xf32>
      %c3_100 = arith.constant 3 : index
      %c0_101 = arith.constant 0 : index
      %c0_102 = arith.constant 0 : index
      %198 = vector.load %arg9[%c3_100, %c0_101, %c0_102] : memref<14x24x128xf32, #tpu.memory_space<vmem>>, vector<1x16x128xf32>
      %199 = vector.shape_cast %198 : vector<1x16x128xf32> to vector<16x128xf32>
      %200 = vector.broadcast %18 : f32 to vector<16x128xf32>
      %201 = arith.mulf %200, %199 : vector<16x128xf32>
      %202 = arith.addf %197, %201 : vector<16x128xf32>
      %c4_103 = arith.constant 4 : index
      %c0_104 = arith.constant 0 : index
      %c0_105 = arith.constant 0 : index
      %203 = vector.load %arg9[%c4_103, %c0_104, %c0_105] : memref<14x24x128xf32, #tpu.memory_space<vmem>>, vector<1x16x128xf32>
      %204 = vector.shape_cast %203 : vector<1x16x128xf32> to vector<16x128xf32>
      %205 = vector.broadcast %19 : f32 to vector<16x128xf32>
      %206 = arith.mulf %205, %204 : vector<16x128xf32>
      %207 = arith.addf %202, %206 : vector<16x128xf32>
      %c5_106 = arith.constant 5 : index
      %c0_107 = arith.constant 0 : index
      %c0_108 = arith.constant 0 : index
      %208 = vector.load %arg9[%c5_106, %c0_107, %c0_108] : memref<14x24x128xf32, #tpu.memory_space<vmem>>, vector<1x16x128xf32>
      %209 = vector.shape_cast %208 : vector<1x16x128xf32> to vector<16x128xf32>
      %210 = vector.broadcast %20 : f32 to vector<16x128xf32>
      %211 = arith.mulf %210, %209 : vector<16x128xf32>
      %212 = arith.addf %207, %211 : vector<16x128xf32>
      %c6_109 = arith.constant 6 : index
      %c0_110 = arith.constant 0 : index
      %c0_111 = arith.constant 0 : index
      %213 = vector.load %arg9[%c6_109, %c0_110, %c0_111] : memref<14x24x128xf32, #tpu.memory_space<vmem>>, vector<1x16x128xf32>
      %214 = vector.shape_cast %213 : vector<1x16x128xf32> to vector<16x128xf32>
      %215 = vector.broadcast %21 : f32 to vector<16x128xf32>
      %216 = arith.mulf %215, %214 : vector<16x128xf32>
      %217 = arith.addf %212, %216 : vector<16x128xf32>
      %c0_112 = arith.constant 0 : index
      %c1_113 = arith.constant 1 : index
      %c0_114 = arith.constant 0 : index
      %218 = vector.load %arg9[%c0_112, %c1_113, %c0_114] : memref<14x24x128xf32, #tpu.memory_space<vmem>>, vector<1x16x128xf32>
      %219 = vector.shape_cast %218 : vector<1x16x128xf32> to vector<16x128xf32>
      %220 = vector.broadcast %22 : f32 to vector<16x128xf32>
      %221 = arith.mulf %220, %219 : vector<16x128xf32>
      %222 = arith.addf %217, %221 : vector<16x128xf32>
      %c1_115 = arith.constant 1 : index
      %c1_116 = arith.constant 1 : index
      %c0_117 = arith.constant 0 : index
      %223 = vector.load %arg9[%c1_115, %c1_116, %c0_117] : memref<14x24x128xf32, #tpu.memory_space<vmem>>, vector<1x16x128xf32>
      %224 = vector.shape_cast %223 : vector<1x16x128xf32> to vector<16x128xf32>
      %225 = vector.broadcast %23 : f32 to vector<16x128xf32>
      %226 = arith.mulf %225, %224 : vector<16x128xf32>
      %227 = arith.addf %222, %226 : vector<16x128xf32>
      %c2_118 = arith.constant 2 : index
      %c1_119 = arith.constant 1 : index
      %c0_120 = arith.constant 0 : index
      %228 = vector.load %arg9[%c2_118, %c1_119, %c0_120] : memref<14x24x128xf32, #tpu.memory_space<vmem>>, vector<1x16x128xf32>
      %229 = vector.shape_cast %228 : vector<1x16x128xf32> to vector<16x128xf32>
      %230 = vector.broadcast %24 : f32 to vector<16x128xf32>
      %231 = arith.mulf %230, %229 : vector<16x128xf32>
      %232 = arith.addf %227, %231 : vector<16x128xf32>
      %c3_121 = arith.constant 3 : index
      %c1_122 = arith.constant 1 : index
      %c0_123 = arith.constant 0 : index
      %233 = vector.load %arg9[%c3_121, %c1_122, %c0_123] : memref<14x24x128xf32, #tpu.memory_space<vmem>>, vector<1x16x128xf32>
      %234 = vector.shape_cast %233 : vector<1x16x128xf32> to vector<16x128xf32>
      %235 = vector.broadcast %25 : f32 to vector<16x128xf32>
      %236 = arith.mulf %235, %234 : vector<16x128xf32>
      %237 = arith.addf %232, %236 : vector<16x128xf32>
      %c4_124 = arith.constant 4 : index
      %c1_125 = arith.constant 1 : index
      %c0_126 = arith.constant 0 : index
      %238 = vector.load %arg9[%c4_124, %c1_125, %c0_126] : memref<14x24x128xf32, #tpu.memory_space<vmem>>, vector<1x16x128xf32>
      %239 = vector.shape_cast %238 : vector<1x16x128xf32> to vector<16x128xf32>
      %240 = vector.broadcast %26 : f32 to vector<16x128xf32>
      %241 = arith.mulf %240, %239 : vector<16x128xf32>
      %242 = arith.addf %237, %241 : vector<16x128xf32>
      %c5_127 = arith.constant 5 : index
      %c1_128 = arith.constant 1 : index
      %c0_129 = arith.constant 0 : index
      %243 = vector.load %arg9[%c5_127, %c1_128, %c0_129] : memref<14x24x128xf32, #tpu.memory_space<vmem>>, vector<1x16x128xf32>
      %244 = vector.shape_cast %243 : vector<1x16x128xf32> to vector<16x128xf32>
      %245 = vector.broadcast %27 : f32 to vector<16x128xf32>
      %246 = arith.mulf %245, %244 : vector<16x128xf32>
      %247 = arith.addf %242, %246 : vector<16x128xf32>
      %c6_130 = arith.constant 6 : index
      %c1_131 = arith.constant 1 : index
      %c0_132 = arith.constant 0 : index
      %248 = vector.load %arg9[%c6_130, %c1_131, %c0_132] : memref<14x24x128xf32, #tpu.memory_space<vmem>>, vector<1x16x128xf32>
      %249 = vector.shape_cast %248 : vector<1x16x128xf32> to vector<16x128xf32>
      %250 = vector.broadcast %28 : f32 to vector<16x128xf32>
      %251 = arith.mulf %250, %249 : vector<16x128xf32>
      %252 = arith.addf %247, %251 : vector<16x128xf32>
      %c0_133 = arith.constant 0 : index
      %c2_134 = arith.constant 2 : index
      %c0_135 = arith.constant 0 : index
      %253 = vector.load %arg9[%c0_133, %c2_134, %c0_135] : memref<14x24x128xf32, #tpu.memory_space<vmem>>, vector<1x16x128xf32>
      %254 = vector.shape_cast %253 : vector<1x16x128xf32> to vector<16x128xf32>
      %255 = vector.broadcast %29 : f32 to vector<16x128xf32>
      %256 = arith.mulf %255, %254 : vector<16x128xf32>
      %257 = arith.addf %252, %256 : vector<16x128xf32>
      %c1_136 = arith.constant 1 : index
      %c2_137 = arith.constant 2 : index
      %c0_138 = arith.constant 0 : index
      %258 = vector.load %arg9[%c1_136, %c2_137, %c0_138] : memref<14x24x128xf32, #tpu.memory_space<vmem>>, vector<1x16x128xf32>
      %259 = vector.shape_cast %258 : vector<1x16x128xf32> to vector<16x128xf32>
      %260 = vector.broadcast %30 : f32 to vector<16x128xf32>
      %261 = arith.mulf %260, %259 : vector<16x128xf32>
      %262 = arith.addf %257, %261 : vector<16x128xf32>
      %c2_139 = arith.constant 2 : index
      %c2_140 = arith.constant 2 : index
      %c0_141 = arith.constant 0 : index
      %263 = vector.load %arg9[%c2_139, %c2_140, %c0_141] : memref<14x24x128xf32, #tpu.memory_space<vmem>>, vector<1x16x128xf32>
      %264 = vector.shape_cast %263 : vector<1x16x128xf32> to vector<16x128xf32>
      %265 = vector.broadcast %31 : f32 to vector<16x128xf32>
      %266 = arith.mulf %265, %264 : vector<16x128xf32>
      %267 = arith.addf %262, %266 : vector<16x128xf32>
      %c3_142 = arith.constant 3 : index
      %c2_143 = arith.constant 2 : index
      %c0_144 = arith.constant 0 : index
      %268 = vector.load %arg9[%c3_142, %c2_143, %c0_144] : memref<14x24x128xf32, #tpu.memory_space<vmem>>, vector<1x16x128xf32>
      %269 = vector.shape_cast %268 : vector<1x16x128xf32> to vector<16x128xf32>
      %270 = vector.broadcast %32 : f32 to vector<16x128xf32>
      %271 = arith.mulf %270, %269 : vector<16x128xf32>
      %272 = arith.addf %267, %271 : vector<16x128xf32>
      %c4_145 = arith.constant 4 : index
      %c2_146 = arith.constant 2 : index
      %c0_147 = arith.constant 0 : index
      %273 = vector.load %arg9[%c4_145, %c2_146, %c0_147] : memref<14x24x128xf32, #tpu.memory_space<vmem>>, vector<1x16x128xf32>
      %274 = vector.shape_cast %273 : vector<1x16x128xf32> to vector<16x128xf32>
      %275 = vector.broadcast %33 : f32 to vector<16x128xf32>
      %276 = arith.mulf %275, %274 : vector<16x128xf32>
      %277 = arith.addf %272, %276 : vector<16x128xf32>
      %c5_148 = arith.constant 5 : index
      %c2_149 = arith.constant 2 : index
      %c0_150 = arith.constant 0 : index
      %278 = vector.load %arg9[%c5_148, %c2_149, %c0_150] : memref<14x24x128xf32, #tpu.memory_space<vmem>>, vector<1x16x128xf32>
      %279 = vector.shape_cast %278 : vector<1x16x128xf32> to vector<16x128xf32>
      %280 = vector.broadcast %34 : f32 to vector<16x128xf32>
      %281 = arith.mulf %280, %279 : vector<16x128xf32>
      %282 = arith.addf %277, %281 : vector<16x128xf32>
      %c6_151 = arith.constant 6 : index
      %c2_152 = arith.constant 2 : index
      %c0_153 = arith.constant 0 : index
      %283 = vector.load %arg9[%c6_151, %c2_152, %c0_153] : memref<14x24x128xf32, #tpu.memory_space<vmem>>, vector<1x16x128xf32>
      %284 = vector.shape_cast %283 : vector<1x16x128xf32> to vector<16x128xf32>
      %285 = vector.broadcast %35 : f32 to vector<16x128xf32>
      %286 = arith.mulf %285, %284 : vector<16x128xf32>
      %287 = arith.addf %282, %286 : vector<16x128xf32>
      %c0_154 = arith.constant 0 : index
      %c3_155 = arith.constant 3 : index
      %c0_156 = arith.constant 0 : index
      %288 = vector.load %arg9[%c0_154, %c3_155, %c0_156] : memref<14x24x128xf32, #tpu.memory_space<vmem>>, vector<1x16x128xf32>
      %289 = vector.shape_cast %288 : vector<1x16x128xf32> to vector<16x128xf32>
      %290 = vector.broadcast %36 : f32 to vector<16x128xf32>
      %291 = arith.mulf %290, %289 : vector<16x128xf32>
      %292 = arith.addf %287, %291 : vector<16x128xf32>
      %c1_157 = arith.constant 1 : index
      %c3_158 = arith.constant 3 : index
      %c0_159 = arith.constant 0 : index
      %293 = vector.load %arg9[%c1_157, %c3_158, %c0_159] : memref<14x24x128xf32, #tpu.memory_space<vmem>>, vector<1x16x128xf32>
      %294 = vector.shape_cast %293 : vector<1x16x128xf32> to vector<16x128xf32>
      %295 = vector.broadcast %37 : f32 to vector<16x128xf32>
      %296 = arith.mulf %295, %294 : vector<16x128xf32>
      %297 = arith.addf %292, %296 : vector<16x128xf32>
      %c2_160 = arith.constant 2 : index
      %c3_161 = arith.constant 3 : index
      %c0_162 = arith.constant 0 : index
      %298 = vector.load %arg9[%c2_160, %c3_161, %c0_162] : memref<14x24x128xf32, #tpu.memory_space<vmem>>, vector<1x16x128xf32>
      %299 = vector.shape_cast %298 : vector<1x16x128xf32> to vector<16x128xf32>
      %300 = vector.broadcast %38 : f32 to vector<16x128xf32>
      %301 = arith.mulf %300, %299 : vector<16x128xf32>
      %302 = arith.addf %297, %301 : vector<16x128xf32>
      %c3_163 = arith.constant 3 : index
      %c3_164 = arith.constant 3 : index
      %c0_165 = arith.constant 0 : index
      %303 = vector.load %arg9[%c3_163, %c3_164, %c0_165] : memref<14x24x128xf32, #tpu.memory_space<vmem>>, vector<1x16x128xf32>
      %304 = vector.shape_cast %303 : vector<1x16x128xf32> to vector<16x128xf32>
      %305 = vector.broadcast %39 : f32 to vector<16x128xf32>
      %306 = arith.mulf %305, %304 : vector<16x128xf32>
      %307 = arith.addf %302, %306 : vector<16x128xf32>
      %c4_166 = arith.constant 4 : index
      %c3_167 = arith.constant 3 : index
      %c0_168 = arith.constant 0 : index
      %308 = vector.load %arg9[%c4_166, %c3_167, %c0_168] : memref<14x24x128xf32, #tpu.memory_space<vmem>>, vector<1x16x128xf32>
      %309 = vector.shape_cast %308 : vector<1x16x128xf32> to vector<16x128xf32>
      %310 = vector.broadcast %40 : f32 to vector<16x128xf32>
      %311 = arith.mulf %310, %309 : vector<16x128xf32>
      %312 = arith.addf %307, %311 : vector<16x128xf32>
      %c5_169 = arith.constant 5 : index
      %c3_170 = arith.constant 3 : index
      %c0_171 = arith.constant 0 : index
      %313 = vector.load %arg9[%c5_169, %c3_170, %c0_171] : memref<14x24x128xf32, #tpu.memory_space<vmem>>, vector<1x16x128xf32>
      %314 = vector.shape_cast %313 : vector<1x16x128xf32> to vector<16x128xf32>
      %315 = vector.broadcast %41 : f32 to vector<16x128xf32>
      %316 = arith.mulf %315, %314 : vector<16x128xf32>
      %317 = arith.addf %312, %316 : vector<16x128xf32>
      %c6_172 = arith.constant 6 : index
      %c3_173 = arith.constant 3 : index
      %c0_174 = arith.constant 0 : index
      %318 = vector.load %arg9[%c6_172, %c3_173, %c0_174] : memref<14x24x128xf32, #tpu.memory_space<vmem>>, vector<1x16x128xf32>
      %319 = vector.shape_cast %318 : vector<1x16x128xf32> to vector<16x128xf32>
      %320 = vector.broadcast %42 : f32 to vector<16x128xf32>
      %321 = arith.mulf %320, %319 : vector<16x128xf32>
      %322 = arith.addf %317, %321 : vector<16x128xf32>
      %c0_175 = arith.constant 0 : index
      %c4_176 = arith.constant 4 : index
      %c0_177 = arith.constant 0 : index
      %323 = vector.load %arg9[%c0_175, %c4_176, %c0_177] : memref<14x24x128xf32, #tpu.memory_space<vmem>>, vector<1x16x128xf32>
      %324 = vector.shape_cast %323 : vector<1x16x128xf32> to vector<16x128xf32>
      %325 = vector.broadcast %43 : f32 to vector<16x128xf32>
      %326 = arith.mulf %325, %324 : vector<16x128xf32>
      %327 = arith.addf %322, %326 : vector<16x128xf32>
      %c1_178 = arith.constant 1 : index
      %c4_179 = arith.constant 4 : index
      %c0_180 = arith.constant 0 : index
      %328 = vector.load %arg9[%c1_178, %c4_179, %c0_180] : memref<14x24x128xf32, #tpu.memory_space<vmem>>, vector<1x16x128xf32>
      %329 = vector.shape_cast %328 : vector<1x16x128xf32> to vector<16x128xf32>
      %330 = vector.broadcast %44 : f32 to vector<16x128xf32>
      %331 = arith.mulf %330, %329 : vector<16x128xf32>
      %332 = arith.addf %327, %331 : vector<16x128xf32>
      %c2_181 = arith.constant 2 : index
      %c4_182 = arith.constant 4 : index
      %c0_183 = arith.constant 0 : index
      %333 = vector.load %arg9[%c2_181, %c4_182, %c0_183] : memref<14x24x128xf32, #tpu.memory_space<vmem>>, vector<1x16x128xf32>
      %334 = vector.shape_cast %333 : vector<1x16x128xf32> to vector<16x128xf32>
      %335 = vector.broadcast %45 : f32 to vector<16x128xf32>
      %336 = arith.mulf %335, %334 : vector<16x128xf32>
      %337 = arith.addf %332, %336 : vector<16x128xf32>
      %c3_184 = arith.constant 3 : index
      %c4_185 = arith.constant 4 : index
      %c0_186 = arith.constant 0 : index
      %338 = vector.load %arg9[%c3_184, %c4_185, %c0_186] : memref<14x24x128xf32, #tpu.memory_space<vmem>>, vector<1x16x128xf32>
      %339 = vector.shape_cast %338 : vector<1x16x128xf32> to vector<16x128xf32>
      %340 = vector.broadcast %46 : f32 to vector<16x128xf32>
      %341 = arith.mulf %340, %339 : vector<16x128xf32>
      %342 = arith.addf %337, %341 : vector<16x128xf32>
      %c4_187 = arith.constant 4 : index
      %c4_188 = arith.constant 4 : index
      %c0_189 = arith.constant 0 : index
      %343 = vector.load %arg9[%c4_187, %c4_188, %c0_189] : memref<14x24x128xf32, #tpu.memory_space<vmem>>, vector<1x16x128xf32>
      %344 = vector.shape_cast %343 : vector<1x16x128xf32> to vector<16x128xf32>
      %345 = vector.broadcast %47 : f32 to vector<16x128xf32>
      %346 = arith.mulf %345, %344 : vector<16x128xf32>
      %347 = arith.addf %342, %346 : vector<16x128xf32>
      %c5_190 = arith.constant 5 : index
      %c4_191 = arith.constant 4 : index
      %c0_192 = arith.constant 0 : index
      %348 = vector.load %arg9[%c5_190, %c4_191, %c0_192] : memref<14x24x128xf32, #tpu.memory_space<vmem>>, vector<1x16x128xf32>
      %349 = vector.shape_cast %348 : vector<1x16x128xf32> to vector<16x128xf32>
      %350 = vector.broadcast %48 : f32 to vector<16x128xf32>
      %351 = arith.mulf %350, %349 : vector<16x128xf32>
      %352 = arith.addf %347, %351 : vector<16x128xf32>
      %c6_193 = arith.constant 6 : index
      %c4_194 = arith.constant 4 : index
      %c0_195 = arith.constant 0 : index
      %353 = vector.load %arg9[%c6_193, %c4_194, %c0_195] : memref<14x24x128xf32, #tpu.memory_space<vmem>>, vector<1x16x128xf32>
      %354 = vector.shape_cast %353 : vector<1x16x128xf32> to vector<16x128xf32>
      %355 = vector.broadcast %49 : f32 to vector<16x128xf32>
      %356 = arith.mulf %355, %354 : vector<16x128xf32>
      %357 = arith.addf %352, %356 : vector<16x128xf32>
      %c0_196 = arith.constant 0 : index
      %c5_197 = arith.constant 5 : index
      %c0_198 = arith.constant 0 : index
      %358 = vector.load %arg9[%c0_196, %c5_197, %c0_198] : memref<14x24x128xf32, #tpu.memory_space<vmem>>, vector<1x16x128xf32>
      %359 = vector.shape_cast %358 : vector<1x16x128xf32> to vector<16x128xf32>
      %360 = vector.broadcast %50 : f32 to vector<16x128xf32>
      %361 = arith.mulf %360, %359 : vector<16x128xf32>
      %362 = arith.addf %357, %361 : vector<16x128xf32>
      %c1_199 = arith.constant 1 : index
      %c5_200 = arith.constant 5 : index
      %c0_201 = arith.constant 0 : index
      %363 = vector.load %arg9[%c1_199, %c5_200, %c0_201] : memref<14x24x128xf32, #tpu.memory_space<vmem>>, vector<1x16x128xf32>
      %364 = vector.shape_cast %363 : vector<1x16x128xf32> to vector<16x128xf32>
      %365 = vector.broadcast %51 : f32 to vector<16x128xf32>
      %366 = arith.mulf %365, %364 : vector<16x128xf32>
      %367 = arith.addf %362, %366 : vector<16x128xf32>
      %c2_202 = arith.constant 2 : index
      %c5_203 = arith.constant 5 : index
      %c0_204 = arith.constant 0 : index
      %368 = vector.load %arg9[%c2_202, %c5_203, %c0_204] : memref<14x24x128xf32, #tpu.memory_space<vmem>>, vector<1x16x128xf32>
      %369 = vector.shape_cast %368 : vector<1x16x128xf32> to vector<16x128xf32>
      %370 = vector.broadcast %52 : f32 to vector<16x128xf32>
      %371 = arith.mulf %370, %369 : vector<16x128xf32>
      %372 = arith.addf %367, %371 : vector<16x128xf32>
      %c3_205 = arith.constant 3 : index
      %c5_206 = arith.constant 5 : index
      %c0_207 = arith.constant 0 : index
      %373 = vector.load %arg9[%c3_205, %c5_206, %c0_207] : memref<14x24x128xf32, #tpu.memory_space<vmem>>, vector<1x16x128xf32>
      %374 = vector.shape_cast %373 : vector<1x16x128xf32> to vector<16x128xf32>
      %375 = vector.broadcast %53 : f32 to vector<16x128xf32>
      %376 = arith.mulf %375, %374 : vector<16x128xf32>
      %377 = arith.addf %372, %376 : vector<16x128xf32>
      %c4_208 = arith.constant 4 : index
      %c5_209 = arith.constant 5 : index
      %c0_210 = arith.constant 0 : index
      %378 = vector.load %arg9[%c4_208, %c5_209, %c0_210] : memref<14x24x128xf32, #tpu.memory_space<vmem>>, vector<1x16x128xf32>
      %379 = vector.shape_cast %378 : vector<1x16x128xf32> to vector<16x128xf32>
      %380 = vector.broadcast %54 : f32 to vector<16x128xf32>
      %381 = arith.mulf %380, %379 : vector<16x128xf32>
      %382 = arith.addf %377, %381 : vector<16x128xf32>
      %c5_211 = arith.constant 5 : index
      %c5_212 = arith.constant 5 : index
      %c0_213 = arith.constant 0 : index
      %383 = vector.load %arg9[%c5_211, %c5_212, %c0_213] : memref<14x24x128xf32, #tpu.memory_space<vmem>>, vector<1x16x128xf32>
      %384 = vector.shape_cast %383 : vector<1x16x128xf32> to vector<16x128xf32>
      %385 = vector.broadcast %55 : f32 to vector<16x128xf32>
      %386 = arith.mulf %385, %384 : vector<16x128xf32>
      %387 = arith.addf %382, %386 : vector<16x128xf32>
      %c6_214 = arith.constant 6 : index
      %c5_215 = arith.constant 5 : index
      %c0_216 = arith.constant 0 : index
      %388 = vector.load %arg9[%c6_214, %c5_215, %c0_216] : memref<14x24x128xf32, #tpu.memory_space<vmem>>, vector<1x16x128xf32>
      %389 = vector.shape_cast %388 : vector<1x16x128xf32> to vector<16x128xf32>
      %390 = vector.broadcast %56 : f32 to vector<16x128xf32>
      %391 = arith.mulf %390, %389 : vector<16x128xf32>
      %392 = arith.addf %387, %391 : vector<16x128xf32>
      %c0_217 = arith.constant 0 : index
      %c6_218 = arith.constant 6 : index
      %c0_219 = arith.constant 0 : index
      %393 = vector.load %arg9[%c0_217, %c6_218, %c0_219] : memref<14x24x128xf32, #tpu.memory_space<vmem>>, vector<1x16x128xf32>
      %394 = vector.shape_cast %393 : vector<1x16x128xf32> to vector<16x128xf32>
      %395 = vector.broadcast %57 : f32 to vector<16x128xf32>
      %396 = arith.mulf %395, %394 : vector<16x128xf32>
      %397 = arith.addf %392, %396 : vector<16x128xf32>
      %c1_220 = arith.constant 1 : index
      %c6_221 = arith.constant 6 : index
      %c0_222 = arith.constant 0 : index
      %398 = vector.load %arg9[%c1_220, %c6_221, %c0_222] : memref<14x24x128xf32, #tpu.memory_space<vmem>>, vector<1x16x128xf32>
      %399 = vector.shape_cast %398 : vector<1x16x128xf32> to vector<16x128xf32>
      %400 = vector.broadcast %58 : f32 to vector<16x128xf32>
      %401 = arith.mulf %400, %399 : vector<16x128xf32>
      %402 = arith.addf %397, %401 : vector<16x128xf32>
      %c2_223 = arith.constant 2 : index
      %c6_224 = arith.constant 6 : index
      %c0_225 = arith.constant 0 : index
      %403 = vector.load %arg9[%c2_223, %c6_224, %c0_225] : memref<14x24x128xf32, #tpu.memory_space<vmem>>, vector<1x16x128xf32>
      %404 = vector.shape_cast %403 : vector<1x16x128xf32> to vector<16x128xf32>
      %405 = vector.broadcast %59 : f32 to vector<16x128xf32>
      %406 = arith.mulf %405, %404 : vector<16x128xf32>
      %407 = arith.addf %402, %406 : vector<16x128xf32>
      %c3_226 = arith.constant 3 : index
      %c6_227 = arith.constant 6 : index
      %c0_228 = arith.constant 0 : index
      %408 = vector.load %arg9[%c3_226, %c6_227, %c0_228] : memref<14x24x128xf32, #tpu.memory_space<vmem>>, vector<1x16x128xf32>
      %409 = vector.shape_cast %408 : vector<1x16x128xf32> to vector<16x128xf32>
      %410 = vector.broadcast %60 : f32 to vector<16x128xf32>
      %411 = arith.mulf %410, %409 : vector<16x128xf32>
      %412 = arith.addf %407, %411 : vector<16x128xf32>
      %c4_229 = arith.constant 4 : index
      %c6_230 = arith.constant 6 : index
      %c0_231 = arith.constant 0 : index
      %413 = vector.load %arg9[%c4_229, %c6_230, %c0_231] : memref<14x24x128xf32, #tpu.memory_space<vmem>>, vector<1x16x128xf32>
      %414 = vector.shape_cast %413 : vector<1x16x128xf32> to vector<16x128xf32>
      %415 = vector.broadcast %61 : f32 to vector<16x128xf32>
      %416 = arith.mulf %415, %414 : vector<16x128xf32>
      %417 = arith.addf %412, %416 : vector<16x128xf32>
      %c5_232 = arith.constant 5 : index
      %c6_233 = arith.constant 6 : index
      %c0_234 = arith.constant 0 : index
      %418 = vector.load %arg9[%c5_232, %c6_233, %c0_234] : memref<14x24x128xf32, #tpu.memory_space<vmem>>, vector<1x16x128xf32>
      %419 = vector.shape_cast %418 : vector<1x16x128xf32> to vector<16x128xf32>
      %420 = vector.broadcast %62 : f32 to vector<16x128xf32>
      %421 = arith.mulf %420, %419 : vector<16x128xf32>
      %422 = arith.addf %417, %421 : vector<16x128xf32>
      %c6_235 = arith.constant 6 : index
      %c6_236 = arith.constant 6 : index
      %c0_237 = arith.constant 0 : index
      %423 = vector.load %arg9[%c6_235, %c6_236, %c0_237] : memref<14x24x128xf32, #tpu.memory_space<vmem>>, vector<1x16x128xf32>
      %424 = vector.shape_cast %423 : vector<1x16x128xf32> to vector<16x128xf32>
      %425 = vector.broadcast %63 : f32 to vector<16x128xf32>
      %426 = arith.mulf %425, %424 : vector<16x128xf32>
      %427 = arith.addf %422, %426 : vector<16x128xf32>
      %c7_238 = arith.constant 7 : index
      %c0_239 = arith.constant 0 : index
      %c0_240 = arith.constant 0 : index
      %428 = vector.load %arg9[%c7_238, %c0_239, %c0_240] : memref<14x24x128xf32, #tpu.memory_space<vmem>>, vector<1x16x128xf32>
      %429 = vector.shape_cast %428 : vector<1x16x128xf32> to vector<16x128xf32>
      %430 = vector.broadcast %64 : f32 to vector<16x128xf32>
      %431 = arith.mulf %430, %429 : vector<16x128xf32>
      %432 = arith.addf %427, %431 : vector<16x128xf32>
      %c8_241 = arith.constant 8 : index
      %c0_242 = arith.constant 0 : index
      %c0_243 = arith.constant 0 : index
      %433 = vector.load %arg9[%c8_241, %c0_242, %c0_243] : memref<14x24x128xf32, #tpu.memory_space<vmem>>, vector<1x16x128xf32>
      %434 = vector.shape_cast %433 : vector<1x16x128xf32> to vector<16x128xf32>
      %435 = vector.broadcast %65 : f32 to vector<16x128xf32>
      %436 = arith.mulf %435, %434 : vector<16x128xf32>
      %437 = arith.addf %432, %436 : vector<16x128xf32>
      %c9_244 = arith.constant 9 : index
      %c0_245 = arith.constant 0 : index
      %c0_246 = arith.constant 0 : index
      %438 = vector.load %arg9[%c9_244, %c0_245, %c0_246] : memref<14x24x128xf32, #tpu.memory_space<vmem>>, vector<1x16x128xf32>
      %439 = vector.shape_cast %438 : vector<1x16x128xf32> to vector<16x128xf32>
      %440 = vector.broadcast %66 : f32 to vector<16x128xf32>
      %441 = arith.mulf %440, %439 : vector<16x128xf32>
      %442 = arith.addf %437, %441 : vector<16x128xf32>
      %c10_247 = arith.constant 10 : index
      %c0_248 = arith.constant 0 : index
      %c0_249 = arith.constant 0 : index
      %443 = vector.load %arg9[%c10_247, %c0_248, %c0_249] : memref<14x24x128xf32, #tpu.memory_space<vmem>>, vector<1x16x128xf32>
      %444 = vector.shape_cast %443 : vector<1x16x128xf32> to vector<16x128xf32>
      %445 = vector.broadcast %67 : f32 to vector<16x128xf32>
      %446 = arith.mulf %445, %444 : vector<16x128xf32>
      %447 = arith.addf %442, %446 : vector<16x128xf32>
      %c11_250 = arith.constant 11 : index
      %c0_251 = arith.constant 0 : index
      %c0_252 = arith.constant 0 : index
      %448 = vector.load %arg9[%c11_250, %c0_251, %c0_252] : memref<14x24x128xf32, #tpu.memory_space<vmem>>, vector<1x16x128xf32>
      %449 = vector.shape_cast %448 : vector<1x16x128xf32> to vector<16x128xf32>
      %450 = vector.broadcast %68 : f32 to vector<16x128xf32>
      %451 = arith.mulf %450, %449 : vector<16x128xf32>
      %452 = arith.addf %447, %451 : vector<16x128xf32>
      %c12_253 = arith.constant 12 : index
      %c0_254 = arith.constant 0 : index
      %c0_255 = arith.constant 0 : index
      %453 = vector.load %arg9[%c12_253, %c0_254, %c0_255] : memref<14x24x128xf32, #tpu.memory_space<vmem>>, vector<1x16x128xf32>
      %454 = vector.shape_cast %453 : vector<1x16x128xf32> to vector<16x128xf32>
      %455 = vector.broadcast %69 : f32 to vector<16x128xf32>
      %456 = arith.mulf %455, %454 : vector<16x128xf32>
      %457 = arith.addf %452, %456 : vector<16x128xf32>
      %c13_256 = arith.constant 13 : index
      %c0_257 = arith.constant 0 : index
      %c0_258 = arith.constant 0 : index
      %458 = vector.load %arg9[%c13_256, %c0_257, %c0_258] : memref<14x24x128xf32, #tpu.memory_space<vmem>>, vector<1x16x128xf32>
      %459 = vector.shape_cast %458 : vector<1x16x128xf32> to vector<16x128xf32>
      %460 = vector.broadcast %70 : f32 to vector<16x128xf32>
      %461 = arith.mulf %460, %459 : vector<16x128xf32>
      %462 = arith.addf %457, %461 : vector<16x128xf32>
      %c7_259 = arith.constant 7 : index
      %c1_260 = arith.constant 1 : index
      %c0_261 = arith.constant 0 : index
      %463 = vector.load %arg9[%c7_259, %c1_260, %c0_261] : memref<14x24x128xf32, #tpu.memory_space<vmem>>, vector<1x16x128xf32>
      %464 = vector.shape_cast %463 : vector<1x16x128xf32> to vector<16x128xf32>
      %465 = vector.broadcast %71 : f32 to vector<16x128xf32>
      %466 = arith.mulf %465, %464 : vector<16x128xf32>
      %467 = arith.addf %462, %466 : vector<16x128xf32>
      %c8_262 = arith.constant 8 : index
      %c1_263 = arith.constant 1 : index
      %c0_264 = arith.constant 0 : index
      %468 = vector.load %arg9[%c8_262, %c1_263, %c0_264] : memref<14x24x128xf32, #tpu.memory_space<vmem>>, vector<1x16x128xf32>
      %469 = vector.shape_cast %468 : vector<1x16x128xf32> to vector<16x128xf32>
      %470 = vector.broadcast %72 : f32 to vector<16x128xf32>
      %471 = arith.mulf %470, %469 : vector<16x128xf32>
      %472 = arith.addf %467, %471 : vector<16x128xf32>
      %c9_265 = arith.constant 9 : index
      %c1_266 = arith.constant 1 : index
      %c0_267 = arith.constant 0 : index
      %473 = vector.load %arg9[%c9_265, %c1_266, %c0_267] : memref<14x24x128xf32, #tpu.memory_space<vmem>>, vector<1x16x128xf32>
      %474 = vector.shape_cast %473 : vector<1x16x128xf32> to vector<16x128xf32>
      %475 = vector.broadcast %73 : f32 to vector<16x128xf32>
      %476 = arith.mulf %475, %474 : vector<16x128xf32>
      %477 = arith.addf %472, %476 : vector<16x128xf32>
      %c10_268 = arith.constant 10 : index
      %c1_269 = arith.constant 1 : index
      %c0_270 = arith.constant 0 : index
      %478 = vector.load %arg9[%c10_268, %c1_269, %c0_270] : memref<14x24x128xf32, #tpu.memory_space<vmem>>, vector<1x16x128xf32>
      %479 = vector.shape_cast %478 : vector<1x16x128xf32> to vector<16x128xf32>
      %480 = vector.broadcast %74 : f32 to vector<16x128xf32>
      %481 = arith.mulf %480, %479 : vector<16x128xf32>
      %482 = arith.addf %477, %481 : vector<16x128xf32>
      %c11_271 = arith.constant 11 : index
      %c1_272 = arith.constant 1 : index
      %c0_273 = arith.constant 0 : index
      %483 = vector.load %arg9[%c11_271, %c1_272, %c0_273] : memref<14x24x128xf32, #tpu.memory_space<vmem>>, vector<1x16x128xf32>
      %484 = vector.shape_cast %483 : vector<1x16x128xf32> to vector<16x128xf32>
      %485 = vector.broadcast %75 : f32 to vector<16x128xf32>
      %486 = arith.mulf %485, %484 : vector<16x128xf32>
      %487 = arith.addf %482, %486 : vector<16x128xf32>
      %c12_274 = arith.constant 12 : index
      %c1_275 = arith.constant 1 : index
      %c0_276 = arith.constant 0 : index
      %488 = vector.load %arg9[%c12_274, %c1_275, %c0_276] : memref<14x24x128xf32, #tpu.memory_space<vmem>>, vector<1x16x128xf32>
      %489 = vector.shape_cast %488 : vector<1x16x128xf32> to vector<16x128xf32>
      %490 = vector.broadcast %76 : f32 to vector<16x128xf32>
      %491 = arith.mulf %490, %489 : vector<16x128xf32>
      %492 = arith.addf %487, %491 : vector<16x128xf32>
      %c13_277 = arith.constant 13 : index
      %c1_278 = arith.constant 1 : index
      %c0_279 = arith.constant 0 : index
      %493 = vector.load %arg9[%c13_277, %c1_278, %c0_279] : memref<14x24x128xf32, #tpu.memory_space<vmem>>, vector<1x16x128xf32>
      %494 = vector.shape_cast %493 : vector<1x16x128xf32> to vector<16x128xf32>
      %495 = vector.broadcast %77 : f32 to vector<16x128xf32>
      %496 = arith.mulf %495, %494 : vector<16x128xf32>
      %497 = arith.addf %492, %496 : vector<16x128xf32>
      %c7_280 = arith.constant 7 : index
      %c2_281 = arith.constant 2 : index
      %c0_282 = arith.constant 0 : index
      %498 = vector.load %arg9[%c7_280, %c2_281, %c0_282] : memref<14x24x128xf32, #tpu.memory_space<vmem>>, vector<1x16x128xf32>
      %499 = vector.shape_cast %498 : vector<1x16x128xf32> to vector<16x128xf32>
      %500 = vector.broadcast %78 : f32 to vector<16x128xf32>
      %501 = arith.mulf %500, %499 : vector<16x128xf32>
      %502 = arith.addf %497, %501 : vector<16x128xf32>
      %c8_283 = arith.constant 8 : index
      %c2_284 = arith.constant 2 : index
      %c0_285 = arith.constant 0 : index
      %503 = vector.load %arg9[%c8_283, %c2_284, %c0_285] : memref<14x24x128xf32, #tpu.memory_space<vmem>>, vector<1x16x128xf32>
      %504 = vector.shape_cast %503 : vector<1x16x128xf32> to vector<16x128xf32>
      %505 = vector.broadcast %79 : f32 to vector<16x128xf32>
      %506 = arith.mulf %505, %504 : vector<16x128xf32>
      %507 = arith.addf %502, %506 : vector<16x128xf32>
      %c9_286 = arith.constant 9 : index
      %c2_287 = arith.constant 2 : index
      %c0_288 = arith.constant 0 : index
      %508 = vector.load %arg9[%c9_286, %c2_287, %c0_288] : memref<14x24x128xf32, #tpu.memory_space<vmem>>, vector<1x16x128xf32>
      %509 = vector.shape_cast %508 : vector<1x16x128xf32> to vector<16x128xf32>
      %510 = vector.broadcast %80 : f32 to vector<16x128xf32>
      %511 = arith.mulf %510, %509 : vector<16x128xf32>
      %512 = arith.addf %507, %511 : vector<16x128xf32>
      %c10_289 = arith.constant 10 : index
      %c2_290 = arith.constant 2 : index
      %c0_291 = arith.constant 0 : index
      %513 = vector.load %arg9[%c10_289, %c2_290, %c0_291] : memref<14x24x128xf32, #tpu.memory_space<vmem>>, vector<1x16x128xf32>
      %514 = vector.shape_cast %513 : vector<1x16x128xf32> to vector<16x128xf32>
      %515 = vector.broadcast %81 : f32 to vector<16x128xf32>
      %516 = arith.mulf %515, %514 : vector<16x128xf32>
      %517 = arith.addf %512, %516 : vector<16x128xf32>
      %c11_292 = arith.constant 11 : index
      %c2_293 = arith.constant 2 : index
      %c0_294 = arith.constant 0 : index
      %518 = vector.load %arg9[%c11_292, %c2_293, %c0_294] : memref<14x24x128xf32, #tpu.memory_space<vmem>>, vector<1x16x128xf32>
      %519 = vector.shape_cast %518 : vector<1x16x128xf32> to vector<16x128xf32>
      %520 = vector.broadcast %82 : f32 to vector<16x128xf32>
      %521 = arith.mulf %520, %519 : vector<16x128xf32>
      %522 = arith.addf %517, %521 : vector<16x128xf32>
      %c12_295 = arith.constant 12 : index
      %c2_296 = arith.constant 2 : index
      %c0_297 = arith.constant 0 : index
      %523 = vector.load %arg9[%c12_295, %c2_296, %c0_297] : memref<14x24x128xf32, #tpu.memory_space<vmem>>, vector<1x16x128xf32>
      %524 = vector.shape_cast %523 : vector<1x16x128xf32> to vector<16x128xf32>
      %525 = vector.broadcast %83 : f32 to vector<16x128xf32>
      %526 = arith.mulf %525, %524 : vector<16x128xf32>
      %527 = arith.addf %522, %526 : vector<16x128xf32>
      %c13_298 = arith.constant 13 : index
      %c2_299 = arith.constant 2 : index
      %c0_300 = arith.constant 0 : index
      %528 = vector.load %arg9[%c13_298, %c2_299, %c0_300] : memref<14x24x128xf32, #tpu.memory_space<vmem>>, vector<1x16x128xf32>
      %529 = vector.shape_cast %528 : vector<1x16x128xf32> to vector<16x128xf32>
      %530 = vector.broadcast %84 : f32 to vector<16x128xf32>
      %531 = arith.mulf %530, %529 : vector<16x128xf32>
      %532 = arith.addf %527, %531 : vector<16x128xf32>
      %c7_301 = arith.constant 7 : index
      %c3_302 = arith.constant 3 : index
      %c0_303 = arith.constant 0 : index
      %533 = vector.load %arg9[%c7_301, %c3_302, %c0_303] : memref<14x24x128xf32, #tpu.memory_space<vmem>>, vector<1x16x128xf32>
      %534 = vector.shape_cast %533 : vector<1x16x128xf32> to vector<16x128xf32>
      %535 = vector.broadcast %85 : f32 to vector<16x128xf32>
      %536 = arith.mulf %535, %534 : vector<16x128xf32>
      %537 = arith.addf %532, %536 : vector<16x128xf32>
      %c8_304 = arith.constant 8 : index
      %c3_305 = arith.constant 3 : index
      %c0_306 = arith.constant 0 : index
      %538 = vector.load %arg9[%c8_304, %c3_305, %c0_306] : memref<14x24x128xf32, #tpu.memory_space<vmem>>, vector<1x16x128xf32>
      %539 = vector.shape_cast %538 : vector<1x16x128xf32> to vector<16x128xf32>
      %540 = vector.broadcast %86 : f32 to vector<16x128xf32>
      %541 = arith.mulf %540, %539 : vector<16x128xf32>
      %542 = arith.addf %537, %541 : vector<16x128xf32>
      %c9_307 = arith.constant 9 : index
      %c3_308 = arith.constant 3 : index
      %c0_309 = arith.constant 0 : index
      %543 = vector.load %arg9[%c9_307, %c3_308, %c0_309] : memref<14x24x128xf32, #tpu.memory_space<vmem>>, vector<1x16x128xf32>
      %544 = vector.shape_cast %543 : vector<1x16x128xf32> to vector<16x128xf32>
      %545 = vector.broadcast %87 : f32 to vector<16x128xf32>
      %546 = arith.mulf %545, %544 : vector<16x128xf32>
      %547 = arith.addf %542, %546 : vector<16x128xf32>
      %c10_310 = arith.constant 10 : index
      %c3_311 = arith.constant 3 : index
      %c0_312 = arith.constant 0 : index
      %548 = vector.load %arg9[%c10_310, %c3_311, %c0_312] : memref<14x24x128xf32, #tpu.memory_space<vmem>>, vector<1x16x128xf32>
      %549 = vector.shape_cast %548 : vector<1x16x128xf32> to vector<16x128xf32>
      %550 = vector.broadcast %88 : f32 to vector<16x128xf32>
      %551 = arith.mulf %550, %549 : vector<16x128xf32>
      %552 = arith.addf %547, %551 : vector<16x128xf32>
      %c11_313 = arith.constant 11 : index
      %c3_314 = arith.constant 3 : index
      %c0_315 = arith.constant 0 : index
      %553 = vector.load %arg9[%c11_313, %c3_314, %c0_315] : memref<14x24x128xf32, #tpu.memory_space<vmem>>, vector<1x16x128xf32>
      %554 = vector.shape_cast %553 : vector<1x16x128xf32> to vector<16x128xf32>
      %555 = vector.broadcast %89 : f32 to vector<16x128xf32>
      %556 = arith.mulf %555, %554 : vector<16x128xf32>
      %557 = arith.addf %552, %556 : vector<16x128xf32>
      %c12_316 = arith.constant 12 : index
      %c3_317 = arith.constant 3 : index
      %c0_318 = arith.constant 0 : index
      %558 = vector.load %arg9[%c12_316, %c3_317, %c0_318] : memref<14x24x128xf32, #tpu.memory_space<vmem>>, vector<1x16x128xf32>
      %559 = vector.shape_cast %558 : vector<1x16x128xf32> to vector<16x128xf32>
      %560 = vector.broadcast %90 : f32 to vector<16x128xf32>
      %561 = arith.mulf %560, %559 : vector<16x128xf32>
      %562 = arith.addf %557, %561 : vector<16x128xf32>
      %c13_319 = arith.constant 13 : index
      %c3_320 = arith.constant 3 : index
      %c0_321 = arith.constant 0 : index
      %563 = vector.load %arg9[%c13_319, %c3_320, %c0_321] : memref<14x24x128xf32, #tpu.memory_space<vmem>>, vector<1x16x128xf32>
      %564 = vector.shape_cast %563 : vector<1x16x128xf32> to vector<16x128xf32>
      %565 = vector.broadcast %91 : f32 to vector<16x128xf32>
      %566 = arith.mulf %565, %564 : vector<16x128xf32>
      %567 = arith.addf %562, %566 : vector<16x128xf32>
      %c7_322 = arith.constant 7 : index
      %c4_323 = arith.constant 4 : index
      %c0_324 = arith.constant 0 : index
      %568 = vector.load %arg9[%c7_322, %c4_323, %c0_324] : memref<14x24x128xf32, #tpu.memory_space<vmem>>, vector<1x16x128xf32>
      %569 = vector.shape_cast %568 : vector<1x16x128xf32> to vector<16x128xf32>
      %570 = vector.broadcast %92 : f32 to vector<16x128xf32>
      %571 = arith.mulf %570, %569 : vector<16x128xf32>
      %572 = arith.addf %567, %571 : vector<16x128xf32>
      %c8_325 = arith.constant 8 : index
      %c4_326 = arith.constant 4 : index
      %c0_327 = arith.constant 0 : index
      %573 = vector.load %arg9[%c8_325, %c4_326, %c0_327] : memref<14x24x128xf32, #tpu.memory_space<vmem>>, vector<1x16x128xf32>
      %574 = vector.shape_cast %573 : vector<1x16x128xf32> to vector<16x128xf32>
      %575 = vector.broadcast %93 : f32 to vector<16x128xf32>
      %576 = arith.mulf %575, %574 : vector<16x128xf32>
      %577 = arith.addf %572, %576 : vector<16x128xf32>
      %c9_328 = arith.constant 9 : index
      %c4_329 = arith.constant 4 : index
      %c0_330 = arith.constant 0 : index
      %578 = vector.load %arg9[%c9_328, %c4_329, %c0_330] : memref<14x24x128xf32, #tpu.memory_space<vmem>>, vector<1x16x128xf32>
      %579 = vector.shape_cast %578 : vector<1x16x128xf32> to vector<16x128xf32>
      %580 = vector.broadcast %94 : f32 to vector<16x128xf32>
      %581 = arith.mulf %580, %579 : vector<16x128xf32>
      %582 = arith.addf %577, %581 : vector<16x128xf32>
      %c10_331 = arith.constant 10 : index
      %c4_332 = arith.constant 4 : index
      %c0_333 = arith.constant 0 : index
      %583 = vector.load %arg9[%c10_331, %c4_332, %c0_333] : memref<14x24x128xf32, #tpu.memory_space<vmem>>, vector<1x16x128xf32>
      %584 = vector.shape_cast %583 : vector<1x16x128xf32> to vector<16x128xf32>
      %585 = vector.broadcast %95 : f32 to vector<16x128xf32>
      %586 = arith.mulf %585, %584 : vector<16x128xf32>
      %587 = arith.addf %582, %586 : vector<16x128xf32>
      %c11_334 = arith.constant 11 : index
      %c4_335 = arith.constant 4 : index
      %c0_336 = arith.constant 0 : index
      %588 = vector.load %arg9[%c11_334, %c4_335, %c0_336] : memref<14x24x128xf32, #tpu.memory_space<vmem>>, vector<1x16x128xf32>
      %589 = vector.shape_cast %588 : vector<1x16x128xf32> to vector<16x128xf32>
      %590 = vector.broadcast %96 : f32 to vector<16x128xf32>
      %591 = arith.mulf %590, %589 : vector<16x128xf32>
      %592 = arith.addf %587, %591 : vector<16x128xf32>
      %c12_337 = arith.constant 12 : index
      %c4_338 = arith.constant 4 : index
      %c0_339 = arith.constant 0 : index
      %593 = vector.load %arg9[%c12_337, %c4_338, %c0_339] : memref<14x24x128xf32, #tpu.memory_space<vmem>>, vector<1x16x128xf32>
      %594 = vector.shape_cast %593 : vector<1x16x128xf32> to vector<16x128xf32>
      %595 = vector.broadcast %97 : f32 to vector<16x128xf32>
      %596 = arith.mulf %595, %594 : vector<16x128xf32>
      %597 = arith.addf %592, %596 : vector<16x128xf32>
      %c13_340 = arith.constant 13 : index
      %c4_341 = arith.constant 4 : index
      %c0_342 = arith.constant 0 : index
      %598 = vector.load %arg9[%c13_340, %c4_341, %c0_342] : memref<14x24x128xf32, #tpu.memory_space<vmem>>, vector<1x16x128xf32>
      %599 = vector.shape_cast %598 : vector<1x16x128xf32> to vector<16x128xf32>
      %600 = vector.broadcast %98 : f32 to vector<16x128xf32>
      %601 = arith.mulf %600, %599 : vector<16x128xf32>
      %602 = arith.addf %597, %601 : vector<16x128xf32>
      %c7_343 = arith.constant 7 : index
      %c5_344 = arith.constant 5 : index
      %c0_345 = arith.constant 0 : index
      %603 = vector.load %arg9[%c7_343, %c5_344, %c0_345] : memref<14x24x128xf32, #tpu.memory_space<vmem>>, vector<1x16x128xf32>
      %604 = vector.shape_cast %603 : vector<1x16x128xf32> to vector<16x128xf32>
      %605 = vector.broadcast %99 : f32 to vector<16x128xf32>
      %606 = arith.mulf %605, %604 : vector<16x128xf32>
      %607 = arith.addf %602, %606 : vector<16x128xf32>
      %c8_346 = arith.constant 8 : index
      %c5_347 = arith.constant 5 : index
      %c0_348 = arith.constant 0 : index
      %608 = vector.load %arg9[%c8_346, %c5_347, %c0_348] : memref<14x24x128xf32, #tpu.memory_space<vmem>>, vector<1x16x128xf32>
      %609 = vector.shape_cast %608 : vector<1x16x128xf32> to vector<16x128xf32>
      %610 = vector.broadcast %100 : f32 to vector<16x128xf32>
      %611 = arith.mulf %610, %609 : vector<16x128xf32>
      %612 = arith.addf %607, %611 : vector<16x128xf32>
      %c9_349 = arith.constant 9 : index
      %c5_350 = arith.constant 5 : index
      %c0_351 = arith.constant 0 : index
      %613 = vector.load %arg9[%c9_349, %c5_350, %c0_351] : memref<14x24x128xf32, #tpu.memory_space<vmem>>, vector<1x16x128xf32>
      %614 = vector.shape_cast %613 : vector<1x16x128xf32> to vector<16x128xf32>
      %615 = vector.broadcast %101 : f32 to vector<16x128xf32>
      %616 = arith.mulf %615, %614 : vector<16x128xf32>
      %617 = arith.addf %612, %616 : vector<16x128xf32>
      %c10_352 = arith.constant 10 : index
      %c5_353 = arith.constant 5 : index
      %c0_354 = arith.constant 0 : index
      %618 = vector.load %arg9[%c10_352, %c5_353, %c0_354] : memref<14x24x128xf32, #tpu.memory_space<vmem>>, vector<1x16x128xf32>
      %619 = vector.shape_cast %618 : vector<1x16x128xf32> to vector<16x128xf32>
      %620 = vector.broadcast %102 : f32 to vector<16x128xf32>
      %621 = arith.mulf %620, %619 : vector<16x128xf32>
      %622 = arith.addf %617, %621 : vector<16x128xf32>
      %c11_355 = arith.constant 11 : index
      %c5_356 = arith.constant 5 : index
      %c0_357 = arith.constant 0 : index
      %623 = vector.load %arg9[%c11_355, %c5_356, %c0_357] : memref<14x24x128xf32, #tpu.memory_space<vmem>>, vector<1x16x128xf32>
      %624 = vector.shape_cast %623 : vector<1x16x128xf32> to vector<16x128xf32>
      %625 = vector.broadcast %103 : f32 to vector<16x128xf32>
      %626 = arith.mulf %625, %624 : vector<16x128xf32>
      %627 = arith.addf %622, %626 : vector<16x128xf32>
      %c12_358 = arith.constant 12 : index
      %c5_359 = arith.constant 5 : index
      %c0_360 = arith.constant 0 : index
      %628 = vector.load %arg9[%c12_358, %c5_359, %c0_360] : memref<14x24x128xf32, #tpu.memory_space<vmem>>, vector<1x16x128xf32>
      %629 = vector.shape_cast %628 : vector<1x16x128xf32> to vector<16x128xf32>
      %630 = vector.broadcast %104 : f32 to vector<16x128xf32>
      %631 = arith.mulf %630, %629 : vector<16x128xf32>
      %632 = arith.addf %627, %631 : vector<16x128xf32>
      %c13_361 = arith.constant 13 : index
      %c5_362 = arith.constant 5 : index
      %c0_363 = arith.constant 0 : index
      %633 = vector.load %arg9[%c13_361, %c5_362, %c0_363] : memref<14x24x128xf32, #tpu.memory_space<vmem>>, vector<1x16x128xf32>
      %634 = vector.shape_cast %633 : vector<1x16x128xf32> to vector<16x128xf32>
      %635 = vector.broadcast %105 : f32 to vector<16x128xf32>
      %636 = arith.mulf %635, %634 : vector<16x128xf32>
      %637 = arith.addf %632, %636 : vector<16x128xf32>
      %c7_364 = arith.constant 7 : index
      %c6_365 = arith.constant 6 : index
      %c0_366 = arith.constant 0 : index
      %638 = vector.load %arg9[%c7_364, %c6_365, %c0_366] : memref<14x24x128xf32, #tpu.memory_space<vmem>>, vector<1x16x128xf32>
      %639 = vector.shape_cast %638 : vector<1x16x128xf32> to vector<16x128xf32>
      %640 = vector.broadcast %106 : f32 to vector<16x128xf32>
      %641 = arith.mulf %640, %639 : vector<16x128xf32>
      %642 = arith.addf %637, %641 : vector<16x128xf32>
      %c8_367 = arith.constant 8 : index
      %c6_368 = arith.constant 6 : index
      %c0_369 = arith.constant 0 : index
      %643 = vector.load %arg9[%c8_367, %c6_368, %c0_369] : memref<14x24x128xf32, #tpu.memory_space<vmem>>, vector<1x16x128xf32>
      %644 = vector.shape_cast %643 : vector<1x16x128xf32> to vector<16x128xf32>
      %645 = vector.broadcast %107 : f32 to vector<16x128xf32>
      %646 = arith.mulf %645, %644 : vector<16x128xf32>
      %647 = arith.addf %642, %646 : vector<16x128xf32>
      %c9_370 = arith.constant 9 : index
      %c6_371 = arith.constant 6 : index
      %c0_372 = arith.constant 0 : index
      %648 = vector.load %arg9[%c9_370, %c6_371, %c0_372] : memref<14x24x128xf32, #tpu.memory_space<vmem>>, vector<1x16x128xf32>
      %649 = vector.shape_cast %648 : vector<1x16x128xf32> to vector<16x128xf32>
      %650 = vector.broadcast %108 : f32 to vector<16x128xf32>
      %651 = arith.mulf %650, %649 : vector<16x128xf32>
      %652 = arith.addf %647, %651 : vector<16x128xf32>
      %c10_373 = arith.constant 10 : index
      %c6_374 = arith.constant 6 : index
      %c0_375 = arith.constant 0 : index
      %653 = vector.load %arg9[%c10_373, %c6_374, %c0_375] : memref<14x24x128xf32, #tpu.memory_space<vmem>>, vector<1x16x128xf32>
      %654 = vector.shape_cast %653 : vector<1x16x128xf32> to vector<16x128xf32>
      %655 = vector.broadcast %109 : f32 to vector<16x128xf32>
      %656 = arith.mulf %655, %654 : vector<16x128xf32>
      %657 = arith.addf %652, %656 : vector<16x128xf32>
      %c11_376 = arith.constant 11 : index
      %c6_377 = arith.constant 6 : index
      %c0_378 = arith.constant 0 : index
      %658 = vector.load %arg9[%c11_376, %c6_377, %c0_378] : memref<14x24x128xf32, #tpu.memory_space<vmem>>, vector<1x16x128xf32>
      %659 = vector.shape_cast %658 : vector<1x16x128xf32> to vector<16x128xf32>
      %660 = vector.broadcast %110 : f32 to vector<16x128xf32>
      %661 = arith.mulf %660, %659 : vector<16x128xf32>
      %662 = arith.addf %657, %661 : vector<16x128xf32>
      %c12_379 = arith.constant 12 : index
      %c6_380 = arith.constant 6 : index
      %c0_381 = arith.constant 0 : index
      %663 = vector.load %arg9[%c12_379, %c6_380, %c0_381] : memref<14x24x128xf32, #tpu.memory_space<vmem>>, vector<1x16x128xf32>
      %664 = vector.shape_cast %663 : vector<1x16x128xf32> to vector<16x128xf32>
      %665 = vector.broadcast %111 : f32 to vector<16x128xf32>
      %666 = arith.mulf %665, %664 : vector<16x128xf32>
      %667 = arith.addf %662, %666 : vector<16x128xf32>
      %c13_382 = arith.constant 13 : index
      %c6_383 = arith.constant 6 : index
      %c0_384 = arith.constant 0 : index
      %668 = vector.load %arg9[%c13_382, %c6_383, %c0_384] : memref<14x24x128xf32, #tpu.memory_space<vmem>>, vector<1x16x128xf32>
      %669 = vector.shape_cast %668 : vector<1x16x128xf32> to vector<16x128xf32>
      %670 = vector.broadcast %112 : f32 to vector<16x128xf32>
      %671 = arith.mulf %670, %669 : vector<16x128xf32>
      %672 = arith.addf %667, %671 : vector<16x128xf32>
      %673 = arith.negf %672 : vector<16x128xf32>
      %674 = math.exp %673 : vector<16x128xf32>
      %cst_385 = arith.constant 1.000000e+00 : f32
      %675 = vector.broadcast %cst_385 : f32 to vector<16x128xf32>
      %676 = arith.addf %675, %674 : vector<16x128xf32>
      %677 = arith.divf %675, %676 : vector<16x128xf32>
      %c0_386 = arith.constant 0 : index
      %c0_387 = arith.constant 0 : index
      %c0_388 = arith.constant 0 : index
      %678 = vector.load %arg5[%c0_386, %c0_387, %c0_388] : memref<1x16x128xf32, #tpu.memory_space<vmem>>, vector<1x16x128xf32>
      %679 = vector.shape_cast %678 : vector<1x16x128xf32> to vector<16x128xf32>
      %680 = vector.shape_cast %677 : vector<16x128xf32> to vector<1x16x128xf32>
      tpu.vector_store %arg5[%c0_386, %c0_387, %c0_388], %680 {strides = array<i32>} : memref<1x16x128xf32, #tpu.memory_space<vmem>>, vector<1x16x128xf32>,
    } else {
    }
    return
  }
  func.func @transform_0(%arg0: i32, %arg1: i32) -> i32 {
    %c0_i32 = arith.constant 0 : i32
    %c0_i32_0 = arith.constant 0 : i32
    return %c0_i32 : i32
  }
  func.func @transform_1(%arg0: i32, %arg1: i32) -> i32 {
    %c0_i32 = arith.constant 0 : i32
    %c0_i32_0 = arith.constant 0 : i32
    return %c0_i32 : i32
  }
  func.func @transform_2(%arg0: i32, %arg1: i32) -> (i32, i32, i32, i32) {
    %c0_i32 = arith.constant 0 : i32
    %c0_i32_0 = arith.constant 0 : i32
    %c0_i32_1 = arith.constant 0 : i32
    return %arg0, %arg1, %c0_i32, %c0_i32_0 : i32, i32, i32, i32
  }
  func.func @transform_3(%arg0: i32, %arg1: i32) -> (i32, i32, i32) {
    %c0_i32 = arith.constant 0 : i32
    %c0_i32_0 = arith.constant 0 : i32
    %c0_i32_1 = arith.constant 0 : i32
    return %arg0, %c0_i32, %c0_i32_0 : i32, i32, i32
  }
}

</mosaic_0001>

<bundles_post_ra>
// kernel: tpu_custom_call.1
= control target key start
LH: loop header
LB: loop body
LE: loop exit
PB: predicated region body
PF: predicated region fallthrough
CT: control target
= control target key end

     0   :  { %s2420_s0 = inlined_call_operand.vmem [shape: f32[98], index: 0, kind: input, shape index: {}]   ;;  %s2421_s1 = inlined_call_operand.<no memory space> [shape: f32[1], index: 1, kind: input, shape index: {}]   ;;  %s2422_s2 = inlined_call_operand.hbm [shape: f32[2,4,16,16], index: 2, kind: input, shape index: {}]   ;;  %s2423_s3 = inlined_call_operand.hbm [shape: f32[2,16,128], index: 3, kind: output, shape index: {}]  }
   0x1   :  { %8 = sst [smem:[#allocation6]] %s2421_s1 }
   0x2   :  { %9 = vsyncpa [#allocation10], 0 }
   0x3   :  { %10 = vsyncpa [#allocation8], 0 }
   0x4   :  { %12 = vsyncpa [#allocation8 + $0x1], 0 }
   0x5   :  { %13 = vsyncpa [#allocation9], 0 }
   0x6   :  { %15 = vsyncpa [#allocation9 + $0x1], 0  ;;  %s1733_s14 = smov 0   ;;  %s1735_s15 = smov 0  }
   0x7   :  { %s1737_s16 = smov 0   ;;  %s1739_s17 = smov 0  }
   0x8   :  { %s1741_s18 = smov 0   ;;  %s1743_s19 = smov 0  }
   0x9 LB: > { %s1355_s1 = sadd.s32 4294967295, %s1693_s19   ;;  %s1356_s20 = sadd.s32 4294967294, %s1693_s19   ;;  %s1693_s19 = sphi %s1743_s19, %s21_s19   ;;  %s1689_s18 = sphi %s1741_s18, %s2441_s18   ;;  %s1685_s17 = sphi %s1739_s17, %s2440_s17   ;;  %s1681_s16 = sphi %s1737_s16, %s2439_s16   ;;  %s1677_s15 = sphi %s1735_s15, %s2438_s15   ;;  %s1673_s14 = sphi %s1733_s14, %s2437_s14  }
   0xa   : > { %s84_s21 = sadd.s32 1, %s1681_s16  ;;  %p91_p0 = scmp.ne.s32.totalorder %s1681_s16, %s1677_s15 }
   0xb   : > { %p92_p1 = scmp.eq.s32.totalorder %s1693_s19, 0  ;;  %p97_p2 = scmp.ne.s32.totalorder %s1677_s15, %s1673_s14 }
   0xc   : > { %p1771_p3 = scmp.eq.s32.totalorder %s1355_s1, 0  ;;  %p121_p4 = scmp.eq.s32.totalorder %s1355_s1, 1 }
   0xd   : > { %p1775_p5 = por %p92_p1, %p91_p0  ;;  %p127_p6 = scmp.eq.s32.totalorder %s1356_s20, 1 }
   0xe   : > { %p1781_p7 = por %p1771_p3, %p97_p2  ;;  %p1785_p8 = por %p121_p4, %p91_p0 }
   0xf   : > { %p1789_p9 = por %p127_p6, %p97_p2  ;;  %p1357_p10 = scmp.ge.s32.totalorder %s1693_s19, 1 }
  0x10   : > { %s2428_s25 = scalar_select %p1785_p8, 1, 0 }
  0x11   : > { %s2429_s26 = scalar_select %p1789_p9, 1, 0 }
  0x12   : > { %p134_p11 = scmp.lt.s32.totalorder %s1693_s19, 3  ;;  %s147_s29 = sshll.u32 %s2420_s0, 4  ;;  %s148_s29 = int_to_ptr.vmem [resolvable:$true] %s147_s29 }
  0x13   : > { %p1494_p0 = scmp.lt.s32.totalorder %s1693_s19, 2  ;;  %s33_s6 = sadd.s32 1, %s1689_s18 }
  0x14   : > { %p1798_p12 = pnand %p1357_p10, %p134_p11  ;;  %p1819_p6 = scmp.ge.s32.totalorder %s33_s6, 2 }
  0x15   : > { %p1808_p2 = pnand %p1494_p0, %p1775_p5  ;;  %s161_s8 = sand.u32 1, %s1681_s16  }
  0x16   : > { %p1481_p1 = pneg %p1798_p12  ;;  %s1566_s9 = scalar_lea.vmem %s148_s29, 16 }
  0x17   : > { %p1567_p10 = scmp.ne.s32.totalorder %s148_s29, %s1566_s9  ;;  %p1574_p13 = scmp.lt.s32.totalorder %s148_s29, %s148_s29 }
  0x18   : > { %p1814_p4 = pnand %p1481_p1, %p1771_p3  ;;  %p1575_p9 = scmp.lt.s32.totalorder %s1566_s9, %s1566_s9 }
  0x1a   : > { %p1568_p11 = pneg %p1814_p4  ;;  %p1576_p8 = por %p1575_p9, %p1574_p13 }
  0x1c   : > { %p1569_p5 = pnand %p1568_p11, %p1567_p10 }
  0x1e   : > { %p1570_p0 = pneg %p1569_p5 }
  0x20   : > { %p1577_p1 = pnand %p1576_p8, %p1570_p0 }
  0x22   : > { %1580 = shalt.err (!%p1577_p1)
}
  0x23   : > { %s1695_s10 = smov [#allocation7]   ;;  %s2443_s6 = smov (%p1819_p6, %s33_s6), 0 }
  0x24   : > { %1484 = dma.vmem_to_smem (!%p1814_p4), %s148_s29, 16, %s1695_s10, [#allocation10]  }
  0x25   : > { %s1360_s11 = sshll.u32 %s161_s8, 6  ;;  %s79_s12 = ssub.s32 %s1689_s18, %s2443_s6 }
  0x26   : > { %p82_p10 = scmp.eq.s32.totalorder %s79_s12, 0  ;;  %s1471_s13 = sshll.u32 %s1689_s18, 10 }
  0x27   : > { %s174_s23 = scalar_lea.hbm %s2422_s2, %s1471_s13  ;;  %s165_s27 = scalar_lea.vmem [#allocation11], %s1360_s11 }
  0x28   : > { %s175_s28 = sshll.u32 %s165_s27, 4  ;;  %s162_s9 = scalar_lea.sflag [#allocation8], %s161_s8  ;;  %s176_s28 = int_to_ptr.vmem [resolvable:$true] %s175_s28 }
  0x29   : > { %s1841_s5 = scalar_select %p82_p10, %s1681_s16, %s84_s21  }
  0x2a   : > { %p1583_p8 = pneg %p1808_p2  ;;  %s1594_s29 = scalar_lea.vmem %s176_s28, 1024 }
  0x2b   : > { %p1595_p9 = scmp.ne.s32.totalorder %s176_s28, %s1594_s29  ;;  %s1696_s7 = smov [#allocation11]  }
  0x2c   : > { %s1599_s10 = sshll.u32 %s1696_s7, 4  ;;  %s1600_s10 = int_to_ptr.vmem [resolvable:$false] %s1599_s10 }
  0x2d   : > { %p1597_p13 = pnand %p1595_p9, %p1583_p8  ;;  %s1601_s12 = scalar_lea.vmem %s1600_s10, 2048 }
  0x2e   : > { %p1602_p6 = scmp.lt.s32.totalorder %s176_s28, %s1600_s10  ;;  %p1603_p11 = scmp.lt.s32.totalorder %s1601_s12, %s1594_s29 }
  0x2f   : > { %p1598_p4 = pneg %p1597_p13 }
  0x30   : > { %p1604_p5 = por %p1603_p11, %p1602_p6 }
  0x32   : > { %p1605_p0 = pnand %p1604_p5, %p1598_p4 }
  0x34   : > { %1608 = shalt.err (!%p1605_p0)
}
  0x35   : > { %s1697_s11 = smov 128   ;;  %s1698_s21 = smov 8  }
  0x36   : > { %1488 = dma.hbm_to_vmem [thread:$0]  (!%p1808_p2), %s174_s23, 1024, %s176_s28, %s162_s9, %s1697_s11, %s1697_s11, %s1698_s21  }
  0x37   : > { %187 = sbr.rel (%p1798_p12) target bundleno = 474 (0x1da), region = 32 }
  0x3c   : > { %1660 = dma.done.wait (%p1771_p3), [#allocation10], 16  }
  0x3d   : > { %1662 = vsyncadd (%p1771_p3), [#allocation10], 4294967280  ;;  %s1854_s8 = sand.u32 1, %s1677_s15  }
  0x3e   : > { %s1365_s13 = sshll.u32 %s1854_s8, 6  ;;  %s194_s1 = scalar_lea.sflag [#allocation8], %s1854_s8 }
  0x3f   : > { %s197_s20 = scalar_lea.vmem [#allocation11], %s1365_s13 }
  0x40   : > { %1664 = dma.done.wait (%p1781_p7), %s194_s1, 1024  }
  0x41   : > { %1666 = vsyncadd (%p1781_p7), %s194_s1, 4294966272 }
  0x42   : > { %202 = sfence }
  0x43   : > { %vm226_vm0 = vcmask 130048   ;;  %v231_v0 = vld [vmem:[%s197_s20] sm:$0xff]  ;;  %v233_v1 = vld [vmem:[%s197_s20 + $0x10] sm:$0xff]  ;;  %v1699_v2 = vmov -inf   ;;  %v1700_v3 = vmov 0.0   ;;  %v232_v4 = vld [vmem:[%s197_s20 + $0x8] sm:$0xff]  ;;  %v395_v47 = vlaneseq }
  0x44   : > { %227 = vst.msk [vmem:[#allocation2] sm:$0xff] %vm226_vm0, %v1699_v2  ;;  %229 = vst.msk [vmem:[#allocation3] sm:$0xff] %vm226_vm0, %v1700_v3  ;;  %v235_v5 = vld [vmem:[%s197_s20 + $0x20] sm:$0xff]  ;;  %v242_v6 = vsel %vm226_vm0, %v231_v0, -inf  ;;  %v243_v7 = vsel %vm226_vm0, %v233_v1, -inf  ;;  %v262_v8 = vsel %vm226_vm0, %v231_v0, 0.0 }
  0x45   : > { %230 = vst.msk [vmem:[#allocation3 + $0x8] sm:$0xff] %vm226_vm0, %v1700_v3  ;;  %384 = vst [vmem:[#allocation4] sm:$0xff] %v1700_v3  ;;  %v237_v9 = vld [vmem:[%s197_s20 + $0x30] sm:$0xff]  ;;  %v238_v10 = vld [vmem:[%s197_s20 + $0x38] sm:$0xff]  ;;  %v244_v11 = vsel %vm226_vm0, %v235_v5, -inf  ;;  %v263_v12 = vsel %vm226_vm0, %v233_v1, 0.0 }
  0x46   : > { %228 = vst.msk [vmem:[#allocation2 + $0x8] sm:$0xff] %vm226_vm0, %v1699_v2  ;;  %385 = vst [vmem:[#allocation4 + $0x8] sm:$0xff] %v1700_v3  ;;  %v265_v13 = vsel %vm226_vm0, %v235_v5, 0.0  ;;  %v269_v14 = vsel %vm226_vm0, %v232_v4, 0.0  ;;  %v234_v15 = vld [vmem:[%s197_s20 + $0x18] sm:$0xff]  ;;  %v236_v16 = vld [vmem:[%s197_s20 + $0x28] sm:$0xff]  ;;  %v245_v17 = vmax.f32 %v242_v6, %v244_v11  ;;  %v264_v20 = vadd.f32 %v263_v12, %v262_v8 }
  0x47   : > { %v246_v18 = vsel %vm226_vm0, %v237_v9, -inf  ;;  %v253_v19 = vsel %vm226_vm0, %v238_v10, -inf  ;;  %v267_v22 = vsel %vm226_vm0, %v237_v9, 0.0  ;;  %v270_v23 = vsel %vm226_vm0, %v234_v15, 0.0  ;;  %s1701_s22 = smov 2   ;;  %s1702_s24 = smov 3  }
  0x48   : > { %v247_v21 = vmax.f32 %v243_v7, %v246_v18  ;;  %v272_v24 = vsel %vm226_vm0, %v236_v16, 0.0  ;;  %v266_v25 = vadd.f32 %v265_v13, %v264_v20  ;;  %v271_v26 = vadd.f32 %v270_v23, %v269_v14  ;;  %s1703_s30 = smov 1   ;;  %s1704_s4 = smov 127  }
  0x49   : > { %v274_v28 = vsel %vm226_vm0, %v238_v10, 0.0  ;;  %v249_v29 = vsel %vm226_vm0, %v232_v4, -inf  ;;  %v250_v30 = vsel %vm226_vm0, %v234_v15, -inf  ;;  %v251_v33 = vsel %vm226_vm0, %v236_v16, -inf  ;;  %s1705_s23 = smov 126   ;;  %s1706_s27 = smov 125  }
  0x4a   : > { %v248_v27 = vmax.f32 %v245_v17, %v247_v21  ;;  %v268_v31 = vadd.f32 %v267_v22, %v266_v25  ;;  %v273_v32 = vadd.f32 %v272_v24, %v271_v26  ;;  %v254_v34 = vmax.f32 %v250_v30, %v253_v19  ;;  %s283_s28 = sld [smem:[#allocation7]]  ;;  %p2434_p7 = scmp.ne.s32.totalorder %s2428_s25, 0 }
  0x4b   : > { %v239_v35 = vld [vmem:[#allocation2] sm:$0xff]  ;;  %v260_v36 = vld [vmem:[#allocation3] sm:$0xff]  ;;  %v252_v38 = vmax.f32 %v249_v29, %v251_v33  ;;  %v396_v49 = vshrl.u32 %v395_v47, 7  ;;  %v394_v50 = vrot.slane %v1700_v3, 5  ;;  %s1945_s9 = sld [smem:[#allocation7 + $0x1]] }
  0x4c   : > { %v261_v37 = vld [vmem:[#allocation3 + $0x8] sm:$0xff]  ;;  %v256_v39 = vmax.f32 %v239_v35, %v248_v27  ;;  %v275_v40 = vadd.f32 %v274_v28, %v273_v32  ;;  %v276_v41 = vadd.f32 %v268_v31, %v260_v36  ;;  %s1947_s29 = sld [smem:[#allocation6]] }
  0x4d   : > { %v240_v42 = vld [vmem:[#allocation2 + $0x8] sm:$0xff]  ;;  %v255_v43 = vmax.f32 %v252_v38, %v254_v34  ;;  %vm397_vm1 = vcmp.lt.s32.totalorder %v396_v49, 3  ;;  %s1949_s7 = sld [smem:[#allocation7 + $0x2]] }
  0x4e   : > { %258 = vst.msk [vmem:[#allocation2] sm:$0xff] %vm226_vm0, %v256_v39  ;;  %v277_v44 = vadd.f32 %v275_v40, %v261_v37  ;;  %278 = vst.msk [vmem:[#allocation3] sm:$0xff] %vm226_vm0, %v276_v41  ;;  %s1951_s10 = sld [smem:[#allocation7 + $0x3]] }
  0x4f   : > { %v257_v45 = vmax.f32 %v240_v42, %v255_v43  ;;  %s1956_s12 = sld [smem:[#allocation7 + $0x4]] }
  0x50   : > { %279 = vst.msk [vmem:[#allocation3 + $0x8] sm:$0xff] %vm226_vm0, %v277_v44  ;;  %v547_v4 = vstv %s283_s28  ;;  %s1958_s11 = sld [smem:[#allocation7 + $0x5]] }
  0x51   : > { %259 = vst.msk [vmem:[#allocation2 + $0x8] sm:$0xff] %vm226_vm0, %v257_v45  ;;  %v554_v7 = vstv %s1945_s9  ;;  %s1961_s21 = sld [smem:[#allocation7 + $0x6]] }
  0x52   : > { %v544_v8 = vstv %s1947_s29  ;;  %s1964_s13 = sld [smem:[#allocation7 + $0x7]] }
  0x53   : > { %v561_v11 = vstv %s1949_s7  ;;  %s1967_s1 = sld [smem:[#allocation7 + $0x8]] }
  0x54   : > { %v568_v17 = vstv %s1951_s10  ;;  %s1970_s20 = sld [smem:[#allocation7 + $0x9]] }
  0x55   : > { %v382_v46 = vld [vmem:[#allocation2] sm:$0xff]  ;;  %v464_v51 = vld [vmem:[#allocation3] sm:$0xff]  ;;  %v575_v24 = vstv %s1956_s12  ;;  %s1993_s28 = sld [smem:[#allocation7 + $0x11]] }
  0x56   : > { %387 = vst.msk [vmem:[#allocation4] sm:$0xff] %vm226_vm0, %v382_v46  ;;  %v582_v27 = vstv %s1958_s11  ;;  %s1995_s9 = sld [smem:[#allocation7 + $0x10]] }
  0x57   : > { %v465_v54 = vld [vmem:[#allocation3 + $0x8] sm:$0xff]  ;;  %v589_v35 = vstv %s1961_s21  ;;  %s2004_s29 = sld [smem:[#allocation7 + $0x12]] }
  0x58   : > { %v383_v48 = vld [vmem:[#allocation2 + $0x8] sm:$0xff]  ;;  %v596_v39 = vstv %s1964_s13  ;;  %s2015_s7 = sld [smem:[#allocation7 + $0x13]] }
  0x59   : > { %388 = vst.msk [vmem:[#allocation4 + $0x8] sm:$0xff] %vm226_vm0, %v383_v48  ;;  %v603_v45 = vstv %s1967_s1  ;;  %s2023_s10 = sld [smem:[#allocation7 + $0x14]] }
  0x5a   : > { %s2033_s12 = sld [smem:[#allocation7 + $0x15]] }
  0x5b   : > { %s2037_s11 = sld [smem:[#allocation7 + $0x16]] }
  0x5c   : > { %s2044_s21 = sld [smem:[#allocation7 + $0x18]] }
  0x5d   : > { %v389_v52 = vld [vmem:[#allocation4] sm:$0xff]  ;;  %s2054_s13 = sld [smem:[#allocation7 + $0x17]] }
  0x5e   : > { %v392_v53 = vrot.slane %v389_v52, 5  ;;  %466 = vst [vmem:[#allocation4] sm:$0xff] %v1700_v3  ;;  %s2073_s1 = sld [smem:[#allocation7 + $0x19]] }
  0x5f   : > { %469 = vst.msk [vmem:[#allocation4] sm:$0xff] %vm226_vm0, %v464_v51  ;;  %v610_v51 = vstv %s1970_s20  ;;  %s2080_s20 = sld [smem:[#allocation7 + $0x1a]] }
  0x60   : > { %v1896_v55 = vsel %vm397_vm1, %v394_v50, %v392_v53  ;;  %v390_v56 = vld [vmem:[#allocation4 + $0x8] sm:$0xff] }
  0x61   : > { %410 = vrot.lane.b32.xlu1 %v1896_v55, %s1701_s22  ;;  %431 = vst [vmem:[#allocation5 + $0x48] sm:$0xff] %v1896_v55  ;;  %401 = vrot.lane.b32.xlu0 %v1896_v55, %s1702_s24  ;;  %v393_v57 = vrot.slane %v390_v56, 5  ;;  %467 = vst [vmem:[#allocation4 + $0x8] sm:$0xff] %v1700_v3  ;;  %v569_v23 = vmul.f32 %v568_v17, %v1896_v55 }
  0x62   : > { %470 = vst.msk [vmem:[#allocation4 + $0x8] sm:$0xff] %vm226_vm0, %v465_v54 }
  0x63   : > { %v1906_v58 = vsel %vm397_vm1, %v392_v53, %v393_v57  ;;  %v398_v59 = vsel %vm397_vm1, %v393_v57, %v394_v50 }
  0x64   : > { %432 = vst [vmem:[#allocation5 + $0x50] sm:$0xff] %v1906_v58  ;;  %433 = vst [vmem:[#allocation5 + $0x58] sm:$0xff] %v398_v59  ;;  %v570_v42 = vmul.f32 %v568_v17, %v1906_v58 }
  0x65   : > { %412 = vrot.lane.b32.xlu1 %v1906_v58, %s1701_s22  ;;  %403 = vrot.lane.b32.xlu0 %v1906_v58, %s1702_s24 }
  0x66   : > { %v471_v60 = vld [vmem:[#allocation4] sm:$0xff] }
  0x67   : > { %v474_v61 = vrot.slane %v471_v60, 5 }
  0x69   : > { %422 = vrot.lane.b32.xlu1 %v1906_v58, %s1703_s30  ;;  %420 = vrot.lane.b32.xlu0 %v1896_v55, %s1703_s30  ;;  %v479_v62 = vsel %vm397_vm1, %v394_v50, %v474_v61  ;;  %v472_v63 = vld [vmem:[#allocation4 + $0x8] sm:$0xff] }
  0x6a   : > { %511 = vst [vmem:[#allocation5 + $0xf0] sm:$0xff] %v479_v62  ;;  %v475_v0 = vrot.slane %v472_v63, 5 }
  0x6b   : > { %v615_v54 = vld [vmem:[#allocation5 + $0x49] sm:$0xff] }
  0x6c   : > { %v478_v1 = vsel %vm397_vm1, %v474_v61, %v475_v0  ;;  %v477_v2 = vsel %vm397_vm1, %v475_v0, %v394_v50 }
  0x6d   : > { %436 = vrot.lane.b32.xlu1 %v1906_v58, %s1704_s4  ;;  %434 = vrot.lane.b32.xlu0 %v1896_v55, %s1704_s4  ;;  %512 = vst [vmem:[#allocation5 + $0xf8] sm:$0xff] %v478_v1  ;;  %513 = vst [vmem:[#allocation5 + $0x100] sm:$0xff] %v477_v2 }
  0x71   : > { %446 = vrot.lane.b32.xlu1 %v1906_v58, %s1705_s23  ;;  %444 = vrot.lane.b32.xlu0 %v1896_v55, %s1705_s23 }
  0x75   : > { %456 = vrot.lane.b32.xlu1 %v1906_v58, %s1706_s27  ;;  %454 = vrot.lane.b32.xlu0 %v1896_v55, %s1706_s27 }
  0x79   : > { %414 = vrot.lane.b32.xlu1 %v398_v59, %s1701_s22  ;;  %405 = vrot.lane.b32.xlu0 %v398_v59, %s1702_s24 }
  0x7d   : > { %438 = vrot.lane.b32.xlu1 %v398_v59, %s1704_s4  ;;  %424 = vrot.lane.b32.xlu0 %v398_v59, %s1703_s30 }
  0x81   : > { %458 = vrot.lane.b32.xlu1 %v398_v59, %s1706_s27  ;;  %448 = vrot.lane.b32.xlu0 %v398_v59, %s1705_s23 }
  0x85   : > { %480 = vrot.lane.b32.xlu0 %v479_v62, %s1702_s24  ;;  %482 = vrot.lane.b32.xlu1 %v478_v1, %s1702_s24 }
  0x89   : > { %490 = vrot.lane.b32.xlu0 %v479_v62, %s1701_s22  ;;  %492 = vrot.lane.b32.xlu1 %v478_v1, %s1701_s22 }
  0x8d   : > { %500 = vrot.lane.b32.xlu0 %v479_v62, %s1703_s30  ;;  %502 = vrot.lane.b32.xlu1 %v478_v1, %s1703_s30 }
  0x91   : > { %514 = vrot.lane.b32.xlu0 %v479_v62, %s1704_s4  ;;  %516 = vrot.lane.b32.xlu1 %v478_v1, %s1704_s4 }
  0x95   : > { %524 = vrot.lane.b32.xlu0 %v479_v62, %s1705_s23  ;;  %526 = vrot.lane.b32.xlu1 %v478_v1, %s1705_s23 }
  0x99   : > { %534 = vrot.lane.b32.xlu0 %v479_v62, %s1706_s27  ;;  %536 = vrot.lane.b32.xlu1 %v478_v1, %s1706_s27 }
  0x9d   : > { %484 = vrot.lane.b32.xlu0 %v477_v2, %s1702_s24  ;;  %494 = vrot.lane.b32.xlu1 %v477_v2, %s1701_s22  ;;  %s1972_s22 = sld [smem:[#allocation7 + $0xa]] }
  0x9e   : > { %s1976_s24 = sld [smem:[#allocation7 + $0xb]] }
  0xa1   : > { %504 = vrot.lane.b32.xlu0 %v477_v2, %s1703_s30  ;;  %518 = vrot.lane.b32.xlu1 %v477_v2, %s1704_s4  ;;  %s1980_s30 = sld [smem:[#allocation7 + $0xc]] }
  0xa2   : > { %s1983_s4 = sld [smem:[#allocation7 + $0xd]] }
  0xa3   : > { %v617_v53 = vstv %s1972_s22  ;;  %s2096_s22 = sld [smem:[#allocation7 + $0x1b]] }
  0xa4   : > { %v618_v0 = vmul.f32 %v617_v53, %v615_v54  ;;  %v624_v1 = vstv %s1976_s24  ;;  %v673_v54 = vstv %s2004_s29  ;;  %s2100_s24 = sld [smem:[#allocation7 + $0x1c]] }
  0xa5   : > { %528 = vrot.lane.b32.xlu0 %v477_v2, %s1705_s23  ;;  %538 = vrot.lane.b32.xlu1 %v477_v2, %s1706_s27  ;;  %s1986_s23 = sld [smem:[#allocation7 + $0xe]] }
  0xa6   : > { %s1988_s27 = sld [smem:[#allocation7 + $0xf]] }
  0xa7   : > { %s2149_s29 = sld [smem:[#allocation7 + $0x23]] }
  0xd3   : > { %v411_v3 = vpop.permute.xlu1 %410  ;;  %v402_v5 = vpop.permute.xlu0 %401 }
  0xd4   : > { %417 = vst [vmem:[#allocation5 + $0x18] sm:$0xff] %v411_v3  ;;  %407 = vst [vmem:[#allocation5] sm:$0xff] %v402_v5  ;;  %v548_v6 = vmul.f32 %v547_v4, %v402_v5  ;;  %v555_v12 = vmul.f32 %v554_v7, %v411_v3 }
  0xd6   : > { %v550_v13 = vadd.f32 %v548_v6, %v544_v8  ;;  %v631_v6 = vstv %s1980_s30  ;;  %s2108_s30 = sld [smem:[#allocation7 + $0x1d]] }
  0xd7   : > { %v413_v9 = vpop.permute.xlu1 %412  ;;  %v404_v10 = vpop.permute.xlu0 %403 }
  0xd8   : > { %418 = vst [vmem:[#allocation5 + $0x20] sm:$0xff] %v413_v9  ;;  %408 = vst [vmem:[#allocation5 + $0x8] sm:$0xff] %v404_v10  ;;  %v549_v18 = vmul.f32 %v547_v4, %v404_v10  ;;  %v557_v19 = vadd.f32 %v555_v12, %v550_v13  ;;  %v556_v25 = vmul.f32 %v554_v7, %v413_v9  ;;  %v638_v13 = vstv %s1983_s4  ;;  %s2117_s4 = sld [smem:[#allocation7 + $0x1f]] }
  0xda   : > { %v551_v26 = vadd.f32 %v549_v18, %v544_v8 }
  0xdb   : > { %v423_v14 = vpop.permute.xlu1 %422  ;;  %v421_v15 = vpop.permute.xlu0 %420 }
  0xdc   : > { %428 = vst [vmem:[#allocation5 + $0x38] sm:$0xff] %v423_v14  ;;  %427 = vst [vmem:[#allocation5 + $0x30] sm:$0xff] %v421_v15  ;;  %v562_v16 = vmul.f32 %v561_v11, %v421_v15  ;;  %v558_v32 = vadd.f32 %v556_v25, %v551_v26  ;;  %v563_v33 = vmul.f32 %v561_v11, %v423_v14 }
  0xde   : > { %v564_v22 = vadd.f32 %v562_v16, %v557_v19  ;;  %v565_v41 = vadd.f32 %v563_v33, %v558_v32  ;;  %v666_v32 = vstv %s1993_s28  ;;  %s2139_s28 = sld [smem:[#allocation7 + $0x21]] }
  0xdf   : > { %v437_v20 = vpop.permute.xlu1 %436  ;;  %v435_v21 = vpop.permute.xlu0 %434  ;;  %v594_v40 = vld [vmem:[#allocation5 + $0x1] sm:$0xff]  ;;  %v601_v46 = vld [vmem:[#allocation5 + $0x19] sm:$0xff] }
  0xe0   : > { %442 = vst [vmem:[#allocation5 + $0x68] sm:$0xff] %v437_v20  ;;  %441 = vst [vmem:[#allocation5 + $0x60] sm:$0xff] %v435_v21  ;;  %v571_v30 = vadd.f32 %v569_v23, %v564_v22  ;;  %v576_v31 = vmul.f32 %v575_v24, %v435_v21  ;;  %v597_v49 = vmul.f32 %v596_v39, %v594_v40  ;;  %v616_v21 = vld [vmem:[#allocation5 + $0x51] sm:$0xff]  ;;  %v645_v22 = vstv %s1986_s23  ;;  %v643_v23 = vld [vmem:[#allocation5 + $0x2] sm:$0xff]  ;;  %s2121_s23 = sld [smem:[#allocation7 + $0x1e]] }
  0xe1   : > { %v604_v55 = vmul.f32 %v603_v45, %v601_v46  ;;  %v572_v56 = vadd.f32 %v570_v42, %v565_v41  ;;  %v577_v57 = vmul.f32 %v575_v24, %v437_v20  ;;  %v659_v40 = vstv %s1995_s9  ;;  %s2147_s9 = sld [smem:[#allocation7 + $0x22]] }
  0xe2   : > { %v578_v38 = vadd.f32 %v576_v31, %v571_v30  ;;  %v652_v30 = vstv %s1988_s27  ;;  %v650_v31 = vld [vmem:[#allocation5 + $0x1a] sm:$0xff]  ;;  %s2134_s27 = sld [smem:[#allocation7 + $0x20]] }
  0xe3   : > { %v447_v28 = vpop.permute.xlu1 %446  ;;  %v445_v29 = vpop.permute.xlu0 %444  ;;  %v608_v52 = vld [vmem:[#allocation5 + $0x31] sm:$0xff]  ;;  %v579_v3 = vadd.f32 %v577_v57, %v572_v56 }
  0xe4   : > { %452 = vst [vmem:[#allocation5 + $0x80] sm:$0xff] %v447_v28  ;;  %451 = vst [vmem:[#allocation5 + $0x78] sm:$0xff] %v445_v29  ;;  %v583_v34 = vmul.f32 %v582_v27, %v445_v29  ;;  %v611_v61 = vmul.f32 %v610_v51, %v608_v52  ;;  %v584_v62 = vmul.f32 %v582_v27, %v447_v28  ;;  %v657_v41 = vld [vmem:[#allocation5 + $0x32] sm:$0xff] }
  0xe6   : > { %v585_v43 = vadd.f32 %v583_v34, %v578_v38  ;;  %v586_v11 = vadd.f32 %v584_v62, %v579_v3  ;;  %v619_v34 = vmul.f32 %v617_v53, %v616_v21  ;;  %v680_v62 = vstv %s2015_s7  ;;  %s2151_s7 = sld [smem:[#allocation7 + $0x24]] }
  0xe7   : > { %v457_v36 = vpop.permute.xlu1 %456  ;;  %v455_v37 = vpop.permute.xlu0 %454  ;;  %v622_v2 = vld [vmem:[#allocation5 + $0x61] sm:$0xff] }
  0xe8   : > { %462 = vst [vmem:[#allocation5 + $0x98] sm:$0xff] %v457_v36  ;;  %461 = vst [vmem:[#allocation5 + $0x90] sm:$0xff] %v455_v37  ;;  %v590_v44 = vmul.f32 %v589_v35, %v455_v37  ;;  %v591_v4 = vmul.f32 %v589_v35, %v457_v36  ;;  %v625_v10 = vmul.f32 %v624_v1, %v622_v2  ;;  %v664_v37 = vld [vmem:[#allocation5 + $0x4a] sm:$0xff] }
  0xe9   : > { %v646_v35 = vmul.f32 %v645_v22, %v643_v23  ;;  %v699_v23 = vld [vmem:[#allocation5 + $0x1b] sm:$0xff] }
  0xea   : > { %v592_v50 = vadd.f32 %v590_v44, %v585_v43  ;;  %v593_v18 = vadd.f32 %v591_v4, %v586_v11 }
  0xeb   : > { %v415_v47 = vpop.permute.xlu1 %414  ;;  %v406_v48 = vpop.permute.xlu0 %405  ;;  %v629_v7 = vld [vmem:[#allocation5 + $0x79] sm:$0xff] }
  0xec   : > { %419 = vst [vmem:[#allocation5 + $0x28] sm:$0xff] %v415_v47  ;;  %409 = vst [vmem:[#allocation5 + $0x10] sm:$0xff] %v406_v48  ;;  %v599_v58 = vadd.f32 %v597_v49, %v592_v50  ;;  %v632_v17 = vmul.f32 %v631_v6, %v629_v7  ;;  %v667_v48 = vmul.f32 %v666_v32, %v664_v37 }
  0xed   : > { %v660_v50 = vmul.f32 %v659_v40, %v657_v41 }
  0xee   : > { %v606_v63 = vadd.f32 %v604_v55, %v599_v58  ;;  %v671_v55 = vld [vmem:[#allocation5 + $0x62] sm:$0xff] }
  0xef   : > { %v439_v59 = vpop.permute.xlu1 %438  ;;  %v425_v60 = vpop.permute.xlu0 %424  ;;  %v636_v14 = vld [vmem:[#allocation5 + $0x91] sm:$0xff] }
  0xf0   : > { %443 = vst [vmem:[#allocation5 + $0x70] sm:$0xff] %v439_v59  ;;  %429 = vst [vmem:[#allocation5 + $0x40] sm:$0xff] %v425_v60  ;;  %v613_v5 = vadd.f32 %v611_v61, %v606_v63  ;;  %v639_v27 = vmul.f32 %v638_v13, %v636_v14  ;;  %v678_v63 = vld [vmem:[#allocation5 + $0x7a] sm:$0xff] }
  0xf2   : > { %v620_v12 = vadd.f32 %v618_v0, %v613_v5  ;;  %v687_v5 = vstv %s2023_s10  ;;  %s2156_s10 = sld [smem:[#allocation7 + $0x26]] }
  0xf3   : > { %v459_v8 = vpop.permute.xlu1 %458  ;;  %v449_v9 = vpop.permute.xlu0 %448  ;;  %v602_v15 = vld [vmem:[#allocation5 + $0x21] sm:$0xff]  ;;  %v595_v16 = vld [vmem:[#allocation5 + $0x9] sm:$0xff] }
  0xf4   : > { %463 = vst [vmem:[#allocation5 + $0xa0] sm:$0xff] %v459_v8  ;;  %453 = vst [vmem:[#allocation5 + $0x88] sm:$0xff] %v449_v9  ;;  %v627_v19 = vadd.f32 %v625_v10, %v620_v12  ;;  %v598_v20 = vmul.f32 %v596_v39, %v595_v16  ;;  %v605_v28 = vmul.f32 %v603_v45, %v602_v15  ;;  %v644_v0 = vld [vmem:[#allocation5 + $0xa] sm:$0xff]  ;;  %v651_v7 = vld [vmem:[#allocation5 + $0x22] sm:$0xff]  ;;  %v694_v15 = vstv %s2033_s12  ;;  %s2160_s12 = sld [smem:[#allocation7 + $0x25]] }
  0xf5   : > { %v653_v45 = vmul.f32 %v652_v30, %v650_v31  ;;  %v681_v10 = vmul.f32 %v680_v62, %v678_v63  ;;  %v647_v12 = vmul.f32 %v645_v22, %v644_v0  ;;  %v692_v16 = vld [vmem:[#allocation5 + $0x3] sm:$0xff]  ;;  %v701_v22 = vstv %s2037_s11  ;;  %s2165_s11 = sld [smem:[#allocation7 + $0x27]] }
  0xf6   : > { %v634_v26 = vadd.f32 %v632_v17, %v627_v19  ;;  %v600_v29 = vadd.f32 %v598_v20, %v593_v18  ;;  %v654_v20 = vmul.f32 %v652_v30, %v651_v7  ;;  %v695_v31 = vmul.f32 %v694_v15, %v692_v16  ;;  %v700_v7 = vld [vmem:[#allocation5 + $0x23] sm:$0xff] }
  0xf7   : > { %v2006_v24 = vpop.permute.xlu0 %480  ;;  %v2008_v25 = vpop.permute.xlu1 %482  ;;  %v609_v33 = vld [vmem:[#allocation5 + $0x39] sm:$0xff]  ;;  %v623_v42 = vld [vmem:[#allocation5 + $0x69] sm:$0xff]  ;;  %v743_v16 = vstv %s2100_s24  ;;  %s2181_s24 = sld [smem:[#allocation7 + $0x2c]] }
  0xf8   : > { %487 = vst [vmem:[#allocation5 + $0xa8] sm:$0xff] %v2006_v24  ;;  %488 = vst [vmem:[#allocation5 + $0xb0] sm:$0xff] %v2008_v25  ;;  %v641_v36 = vadd.f32 %v639_v27, %v634_v26  ;;  %v607_v38 = vadd.f32 %v605_v28, %v600_v29  ;;  %v612_v39 = vmul.f32 %v610_v51, %v609_v33  ;;  %v658_v17 = vld [vmem:[#allocation5 + $0x3a] sm:$0xff]  ;;  %v715_v26 = vstv %s2044_s21  ;;  %v672_v37 = vld [vmem:[#allocation5 + $0x6a] sm:$0xff]  ;;  %s2168_s21 = sld [smem:[#allocation7 + $0x28]] }
  0xf9   : > { %v626_v52 = vmul.f32 %v624_v1, %v623_v42  ;;  %v674_v1 = vmul.f32 %v673_v54, %v671_v55  ;;  %v661_v30 = vmul.f32 %v659_v40, %v658_v17  ;;  %v741_v17 = vld [vmem:[#allocation5 + $0x4] sm:$0xff] }
  0xfa   : > { %v648_v46 = vadd.f32 %v646_v35, %v641_v36  ;;  %v614_v47 = vadd.f32 %v612_v39, %v607_v38  ;;  %v708_v36 = vstv %s2054_s13  ;;  %v702_v38 = vmul.f32 %v701_v22, %v699_v23  ;;  %s2172_s13 = sld [smem:[#allocation7 + $0x29]] }
  0xfb   : > { %v2025_v43 = vpop.permute.xlu0 %490  ;;  %v2027_v44 = vpop.permute.xlu1 %492  ;;  %v630_v49 = vld [vmem:[#allocation5 + $0x81] sm:$0xff]  ;;  %v637_v56 = vld [vmem:[#allocation5 + $0x99] sm:$0xff]  ;;  %v703_v23 = vmul.f32 %v701_v22, %v700_v7  ;;  %v721_v22 = vld [vmem:[#allocation5 + $0x6b] sm:$0xff] }
  0xfc   : > { %497 = vst [vmem:[#allocation5 + $0xc0] sm:$0xff] %v2025_v43  ;;  %498 = vst [vmem:[#allocation5 + $0xc8] sm:$0xff] %v2027_v44  ;;  %v655_v51 = vadd.f32 %v653_v45, %v648_v46  ;;  %v621_v53 = vadd.f32 %v619_v34, %v614_v47  ;;  %v633_v61 = vmul.f32 %v631_v6, %v630_v49  ;;  %v685_v6 = vld [vmem:[#allocation5 + $0x92] sm:$0xff]  ;;  %v679_v42 = vld [vmem:[#allocation5 + $0x82] sm:$0xff] }
  0xfd   : > { %v640_v3 = vmul.f32 %v638_v13, %v637_v56  ;;  %v665_v13 = vld [vmem:[#allocation5 + $0x52] sm:$0xff]  ;;  %v688_v19 = vmul.f32 %v687_v5, %v685_v6  ;;  %v675_v49 = vmul.f32 %v673_v54, %v672_v37  ;;  %v729_v54 = vstv %s2080_s20  ;;  %s2176_s20 = sld [smem:[#allocation7 + $0x2b]] }
  0xfe   : > { %v662_v59 = vadd.f32 %v660_v50, %v655_v51  ;;  %v628_v60 = vadd.f32 %v626_v52, %v621_v53  ;;  %v668_v27 = vmul.f32 %v666_v32, %v665_v13  ;;  %v713_v34 = vld [vmem:[#allocation5 + $0x4b] sm:$0xff]  ;;  %v706_v32 = vld [vmem:[#allocation5 + $0x33] sm:$0xff]  ;;  %v722_v51 = vstv %s2073_s1  ;;  %v720_v52 = vld [vmem:[#allocation5 + $0x63] sm:$0xff]  ;;  %s2174_s1 = sld [smem:[#allocation7 + $0x2a]] }
  0xff   : > { %v2046_v57 = vpop.permute.xlu0 %500  ;;  %v2048_v58 = vpop.permute.xlu1 %502  ;;  %v716_v40 = vmul.f32 %v715_v26, %v713_v34  ;;  %v709_v47 = vmul.f32 %v708_v36, %v706_v32  ;;  %v686_v53 = vld [vmem:[#allocation5 + $0x9a] sm:$0xff]  ;;  %v736_v6 = vstv %s2096_s22  ;;  %v762_v32 = vld [vmem:[#allocation5 + $0x4c] sm:$0xff]  ;;  %s2179_s22 = sld [smem:[#allocation7 + $0x2d]] }
 0x100   : > { %507 = vst [vmem:[#allocation5 + $0xd8] sm:$0xff] %v2046_v57  ;;  %508 = vst [vmem:[#allocation5 + $0xe0] sm:$0xff] %v2048_v58  ;;  %v669_v2 = vadd.f32 %v667_v48, %v662_v59  ;;  %v635_v4 = vadd.f32 %v633_v61, %v628_v60  ;;  %v682_v59 = vmul.f32 %v680_v62, %v679_v42  ;;  %v727_v60 = vld [vmem:[#allocation5 + $0x7b] sm:$0xff]  ;;  %v693_v61 = vld [vmem:[#allocation5 + $0xb] sm:$0xff] }
 0x101   : > { %v734_v62 = vld [vmem:[#allocation5 + $0x93] sm:$0xff] }
 0x102   : > { %v676_v11 = vadd.f32 %v674_v1, %v669_v2  ;;  %v642_v14 = vadd.f32 %v640_v3, %v635_v4  ;;  %v723_v1 = vmul.f32 %v722_v51, %v720_v52  ;;  %v689_v3 = vmul.f32 %v687_v5, %v686_v53  ;;  %v714_v13 = vld [vmem:[#allocation5 + $0x53] sm:$0xff]  ;;  %v707_v5 = vld [vmem:[#allocation5 + $0x3b] sm:$0xff] }
 0x103   : > { %v2062_v8 = vpop.permute.xlu0 %514  ;;  %v2064_v9 = vpop.permute.xlu1 %516  ;;  %v717_v34 = vmul.f32 %v715_v26, %v714_v13  ;;  %v710_v37 = vmul.f32 %v708_v36, %v707_v5  ;;  %v728_v36 = vld [vmem:[#allocation5 + $0x83] sm:$0xff]  ;;  %v724_v53 = vmul.f32 %v722_v51, %v721_v22  ;;  %v806_v22 = vstv %s2160_s12  ;;  %s2213_s12 = sld [smem:[#allocation7 + $0x37]] }
 0x104   : > { %521 = vst [vmem:[#allocation5 + $0x108] sm:$0xff] %v2062_v8  ;;  %522 = vst [vmem:[#allocation5 + $0x110] sm:$0xff] %v2064_v9  ;;  %v683_v18 = vadd.f32 %v681_v10, %v676_v11  ;;  %v649_v21 = vadd.f32 %v647_v12, %v642_v14  ;;  %v730_v10 = vmul.f32 %v729_v54, %v727_v60  ;;  %v735_v60 = vld [vmem:[#allocation5 + $0x9b] sm:$0xff] }
 0x105   : > { %v696_v12 = vmul.f32 %v694_v15, %v693_v61  ;;  %v750_v15 = vstv %s2108_s30  ;;  %v738_v51 = vmul.f32 %v736_v6, %v735_v60  ;;  %s2186_s30 = sld [smem:[#allocation7 + $0x2e]] }
 0x106   : > { %v690_v33 = vadd.f32 %v688_v19, %v683_v18  ;;  %v656_v35 = vadd.f32 %v654_v20, %v649_v21  ;;  %v737_v21 = vmul.f32 %v736_v6, %v734_v62 }
 0x107   : > { %v2085_v28 = vpop.permute.xlu0 %524  ;;  %v2087_v29 = vpop.permute.xlu1 %526 }
 0x108   : > { %531 = vst [vmem:[#allocation5 + $0x120] sm:$0xff] %v2085_v28  ;;  %532 = vst [vmem:[#allocation5 + $0x128] sm:$0xff] %v2087_v29  ;;  %v697_v39 = vadd.f32 %v695_v31, %v690_v33  ;;  %v663_v41 = vadd.f32 %v661_v30, %v656_v35  ;;  %v748_v31 = vld [vmem:[#allocation5 + $0x1c] sm:$0xff]  ;;  %v764_v33 = vstv %s2117_s4  ;;  %v744_v30 = vmul.f32 %v743_v16, %v741_v17  ;;  %s2189_s4 = sld [smem:[#allocation7 + $0x2f]] }
 0x109   : > { %v765_v26 = vmul.f32 %v764_v33, %v762_v32 }
 0x10a   : > { %v704_v48 = vadd.f32 %v702_v38, %v697_v39  ;;  %v670_v50 = vadd.f32 %v668_v27, %v663_v41  ;;  %v757_v39 = vstv %s2121_s23  ;;  %v755_v41 = vld [vmem:[#allocation5 + $0x34] sm:$0xff]  ;;  %s2193_s23 = sld [smem:[#allocation7 + $0x30]] }
 0x10b   : > { %v2104_v45 = vpop.permute.xlu0 %534  ;;  %v2106_v46 = vpop.permute.xlu1 %536 }
 0x10c   : > { %541 = vst [vmem:[#allocation5 + $0x138] sm:$0xff] %v2104_v45  ;;  %542 = vst [vmem:[#allocation5 + $0x140] sm:$0xff] %v2106_v46  ;;  %v711_v55 = vadd.f32 %v709_v47, %v704_v48  ;;  %v677_v56 = vadd.f32 %v675_v49, %v670_v50  ;;  %v751_v47 = vmul.f32 %v750_v15, %v748_v31  ;;  %v799_v31 = vstv %s2151_s7  ;;  %s2207_s7 = sld [smem:[#allocation7 + $0x35]] }
 0x10d   : > { %v758_v50 = vmul.f32 %v757_v39, %v755_v41 }
 0x10e   : > { %v718_v2 = vadd.f32 %v716_v40, %v711_v55  ;;  %v684_v4 = vadd.f32 %v682_v59, %v677_v56  ;;  %v771_v56 = vstv %s2134_s27  ;;  %v769_v59 = vld [vmem:[#allocation5 + $0x64] sm:$0xff]  ;;  %s2195_s27 = sld [smem:[#allocation7 + $0x31]] }
 0x10f   : > { %v485_v63 = vpop.permute.xlu0 %484  ;;  %v495_v0 = vpop.permute.xlu1 %494 }
 0x110   : > { %489 = vst [vmem:[#allocation5 + $0xb8] sm:$0xff] %v485_v63  ;;  %499 = vst [vmem:[#allocation5 + $0xd0] sm:$0xff] %v495_v0  ;;  %v725_v11 = vadd.f32 %v723_v1, %v718_v2  ;;  %v691_v14 = vadd.f32 %v689_v3, %v684_v4  ;;  %v731_v0 = vmul.f32 %v729_v54, %v728_v36  ;;  %v778_v1 = vstv %s2139_s28  ;;  %v776_v2 = vld [vmem:[#allocation5 + $0x7c] sm:$0xff]  ;;  %v742_v3 = vld [vmem:[#allocation5 + $0xc] sm:$0xff]  ;;  %s2197_s28 = sld [smem:[#allocation7 + $0x32]] }
 0x111   : > { %v772_v4 = vmul.f32 %v771_v56, %v769_v59  ;;  %v745_v17 = vmul.f32 %v743_v16, %v742_v3  ;;  %v763_v54 = vld [vmem:[#allocation5 + $0x54] sm:$0xff] }
 0x112   : > { %v732_v20 = vadd.f32 %v730_v10, %v725_v11  ;;  %v698_v27 = vadd.f32 %v696_v12, %v691_v14  ;;  %v785_v10 = vstv %s2147_s9  ;;  %v783_v11 = vld [vmem:[#allocation5 + $0x94] sm:$0xff]  ;;  %v749_v12 = vld [vmem:[#allocation5 + $0x24] sm:$0xff]  ;;  %v779_v14 = vmul.f32 %v778_v1, %v776_v2  ;;  %s2200_s9 = sld [smem:[#allocation7 + $0x34]] }
 0x113   : > { %v505_v18 = vpop.permute.xlu0 %504  ;;  %v519_v19 = vpop.permute.xlu1 %518  ;;  %v752_v6 = vmul.f32 %v750_v15, %v749_v12  ;;  %v791_v2 = vld [vmem:[#allocation5 + $0xd] sm:$0xff] }
 0x114   : > { %509 = vst [vmem:[#allocation5 + $0xe8] sm:$0xff] %v505_v18  ;;  %523 = vst [vmem:[#allocation5 + $0x118] sm:$0xff] %v519_v19  ;;  %v739_v35 = vadd.f32 %v737_v21, %v732_v20  ;;  %v705_v38 = vadd.f32 %v703_v23, %v698_v27  ;;  %v792_v18 = vstv %s2149_s29  ;;  %v790_v19 = vld [vmem:[#allocation5 + $0x5] sm:$0xff]  ;;  %v756_v20 = vld [vmem:[#allocation5 + $0x3c] sm:$0xff]  ;;  %v786_v23 = vmul.f32 %v785_v10, %v783_v11  ;;  %s2203_s29 = sld [smem:[#allocation7 + $0x33]] }
 0x115   : > { %v793_v32 = vmul.f32 %v792_v18, %v790_v19  ;;  %v798_v11 = vld [vmem:[#allocation5 + $0x25] sm:$0xff]  ;;  %v805_v19 = vld [vmem:[#allocation5 + $0x3d] sm:$0xff] }
 0x116   : > { %v746_v48 = vadd.f32 %v744_v30, %v739_v35  ;;  %v712_v49 = vadd.f32 %v710_v37, %v705_v38  ;;  %v813_v30 = vstv %s2156_s10  ;;  %v766_v35 = vmul.f32 %v764_v33, %v763_v54  ;;  %v811_v37 = vld [vmem:[#allocation5 + $0x4d] sm:$0xff]  ;;  %s2209_s10 = sld [smem:[#allocation7 + $0x36]] }
 0x117   : > { %v529_v40 = vpop.permute.xlu0 %528  ;;  %v539_v42 = vpop.permute.xlu1 %538  ;;  %v759_v38 = vmul.f32 %v757_v39, %v756_v20  ;;  %v839_v54 = vld [vmem:[#allocation5 + $0x6] sm:$0xff] }
 0x118   : > { %533 = vst [vmem:[#allocation5 + $0x130] sm:$0xff] %v529_v40  ;;  %543 = vst [vmem:[#allocation5 + $0x148] sm:$0xff] %v539_v42  ;;  %v753_v52 = vadd.f32 %v751_v47, %v746_v48  ;;  %v719_v55 = vadd.f32 %v717_v34, %v712_v49  ;;  %v797_v34 = vld [vmem:[#allocation5 + $0x1d] sm:$0xff]  ;;  %v804_v40 = vld [vmem:[#allocation5 + $0x35] sm:$0xff]  ;;  %v814_v49 = vmul.f32 %v813_v30, %v811_v37 }
 0x119   : > { %v770_v42 = vld [vmem:[#allocation5 + $0x6c] sm:$0xff]  ;;  %v800_v47 = vmul.f32 %v799_v31, %v797_v34  ;;  %v807_v33 = vmul.f32 %v806_v22, %v804_v40  ;;  %v862_v34 = vstv %s2179_s22  ;;  %v808_v37 = vmul.f32 %v806_v22, %v805_v19  ;;  %v853_v40 = vld [vmem:[#allocation5 + $0x36] sm:$0xff]  ;;  %s2239_s22 = sld [smem:[#allocation7 + $0x3d]] }
 0x11a   : > { %v760_v61 = vadd.f32 %v758_v50, %v753_v52  ;;  %v726_v63 = vadd.f32 %v724_v53, %v719_v55  ;;  %v773_v39 = vmul.f32 %v771_v56, %v770_v42  ;;  %v820_v52 = vstv %s2165_s11  ;;  %v818_v53 = vld [vmem:[#allocation5 + $0x65] sm:$0xff]  ;;  %v784_v55 = vld [vmem:[#allocation5 + $0x9c] sm:$0xff]  ;;  %v819_v42 = vld [vmem:[#allocation5 + $0x6d] sm:$0xff]  ;;  %s2218_s11 = sld [smem:[#allocation7 + $0x38]] }
 0x11b   : > { %v821_v3 = vmul.f32 %v820_v52, %v818_v53  ;;  %v869_v22 = vstv %s2186_s30  ;;  %s2246_s30 = sld [smem:[#allocation7 + $0x3f]] }
 0x11c   : > { %v767_v62 = vadd.f32 %v765_v26, %v760_v61  ;;  %v733_v7 = vadd.f32 %v731_v0, %v726_v63  ;;  %v777_v26 = vld [vmem:[#allocation5 + $0x84] sm:$0xff]  ;;  %v827_v63 = vstv %s2168_s21  ;;  %s2220_s21 = sld [smem:[#allocation7 + $0x39]] }
 0x11d   : > { %v780_v61 = vmul.f32 %v778_v1, %v777_v26  ;;  %v825_v0 = vld [vmem:[#allocation5 + $0x7d] sm:$0xff]  ;;  %v812_v1 = vld [vmem:[#allocation5 + $0x55] sm:$0xff] }
 0x11e   : > { %v774_v13 = vadd.f32 %v772_v4, %v767_v62  ;;  %v740_v5 = vadd.f32 %v738_v51, %v733_v7  ;;  %v787_v62 = vmul.f32 %v785_v10, %v784_v55  ;;  %v834_v51 = vstv %s2172_s13  ;;  %v832_v7 = vld [vmem:[#allocation5 + $0x95] sm:$0xff]  ;;  %s2224_s13 = sld [smem:[#allocation7 + $0x3b]] }
 0x11f   : > { %v828_v12 = vmul.f32 %v827_v63, %v825_v0  ;;  %v801_v10 = vmul.f32 %v799_v31, %v798_v11  ;;  %v840_v0 = vld [vmem:[#allocation5 + $0xe] sm:$0xff] }
 0x120   : > { %v781_v21 = vadd.f32 %v779_v14, %v774_v13  ;;  %v747_v27 = vadd.f32 %v745_v17, %v740_v5  ;;  %v794_v13 = vmul.f32 %v792_v18, %v791_v2  ;;  %v841_v5 = vstv %s2174_s1  ;;  %s2226_s1 = sld [smem:[#allocation7 + $0x3a]] }
 0x122   : > { %v788_v16 = vadd.f32 %v786_v23, %v781_v21  ;;  %v754_v41 = vadd.f32 %v752_v6, %v747_v27  ;;  %v835_v21 = vmul.f32 %v834_v51, %v832_v7  ;;  %v848_v6 = vstv %s2176_s20  ;;  %v846_v27 = vld [vmem:[#allocation5 + $0x1e] sm:$0xff]  ;;  %v847_v7 = vld [vmem:[#allocation5 + $0x26] sm:$0xff]  ;;  %s2235_s20 = sld [smem:[#allocation7 + $0x3c]] }
 0x124   : > { %v795_v15 = vadd.f32 %v793_v32, %v788_v16  ;;  %v761_v48 = vadd.f32 %v759_v38, %v754_v41  ;;  %v842_v32 = vmul.f32 %v841_v5, %v839_v54  ;;  %v860_v16 = vld [vmem:[#allocation5 + $0x4e] sm:$0xff]  ;;  %v855_v41 = vstv %s2181_s24  ;;  %s2244_s24 = sld [smem:[#allocation7 + $0x3e]] }
 0x126   : > { %v802_v36 = vadd.f32 %v800_v47, %v795_v15  ;;  %v768_v50 = vadd.f32 %v766_v35, %v761_v48  ;;  %v815_v35 = vmul.f32 %v813_v30, %v812_v1  ;;  %v849_v47 = vmul.f32 %v848_v6, %v846_v27 }
 0x127   : > { %v863_v48 = vmul.f32 %v862_v34, %v860_v16  ;;  %v856_v30 = vmul.f32 %v855_v41, %v853_v40  ;;  %v890_v1 = vstv %s2195_s27  ;;  %v868_v16 = vld [vmem:[#allocation5 + $0x6e] sm:$0xff]  ;;  %s2255_s27 = sld [smem:[#allocation7 + $0x41]] }
 0x128   : > { %v809_v59 = vadd.f32 %v807_v33, %v802_v36  ;;  %v775_v60 = vadd.f32 %v773_v39, %v768_v50  ;;  %v822_v33 = vmul.f32 %v820_v52, %v819_v42  ;;  %v867_v39 = vld [vmem:[#allocation5 + $0x66] sm:$0xff]  ;;  %v833_v50 = vld [vmem:[#allocation5 + $0x9d] sm:$0xff] }
 0x129   : > { %v870_v2 = vmul.f32 %v869_v22, %v867_v39  ;;  %v875_v42 = vld [vmem:[#allocation5 + $0x86] sm:$0xff] }
 0x12a   : > { %v816_v4 = vadd.f32 %v814_v49, %v809_v59  ;;  %v782_v56 = vadd.f32 %v780_v61, %v775_v60  ;;  %v826_v49 = vld [vmem:[#allocation5 + $0x85] sm:$0xff]  ;;  %v876_v60 = vstv %s2189_s4  ;;  %s2248_s4 = sld [smem:[#allocation7 + $0x40]] }
 0x12b   : > { %v829_v59 = vmul.f32 %v827_v63, %v826_v49  ;;  %v874_v61 = vld [vmem:[#allocation5 + $0x7e] sm:$0xff]  ;;  %v861_v63 = vld [vmem:[#allocation5 + $0x56] sm:$0xff] }
 0x12c   : > { %v823_v14 = vadd.f32 %v821_v3, %v816_v4  ;;  %v789_v17 = vadd.f32 %v787_v62, %v782_v56  ;;  %v836_v3 = vmul.f32 %v834_v51, %v833_v50  ;;  %v883_v62 = vstv %s2193_s23  ;;  %v881_v56 = vld [vmem:[#allocation5 + $0x96] sm:$0xff]  ;;  %s2252_s23 = sld [smem:[#allocation7 + $0x42]] }
 0x12d   : > { %v877_v11 = vmul.f32 %v876_v60, %v874_v61  ;;  %v884_v19 = vmul.f32 %v883_v62, %v881_v56  ;;  %v960_v56 = vstv %s2224_s13  ;;  %s2285_s13 = sld [smem:[#allocation7 + $0x4b]] }
 0x12e   : > { %v830_v20 = vadd.f32 %v828_v12, %v823_v14  ;;  %v796_v23 = vadd.f32 %v794_v13, %v789_v17  ;;  %v843_v14 = vmul.f32 %v841_v5, %v840_v0  ;;  %v854_v17 = vld [vmem:[#allocation5 + $0x3e] sm:$0xff]  ;;  %v939_v0 = vstv %s2218_s11  ;;  %s2277_s11 = sld [smem:[#allocation7 + $0x48]] }
 0x12f   : > { %v857_v5 = vmul.f32 %v855_v41, %v854_v17 }
 0x130   : > { %v837_v18 = vadd.f32 %v835_v21, %v830_v20  ;;  %v803_v38 = vadd.f32 %v801_v10, %v796_v23  ;;  %v850_v20 = vmul.f32 %v848_v6, %v847_v7  ;;  %v864_v21 = vmul.f32 %v862_v34, %v861_v63 }
 0x131   : > { %v897_v10 = vstv %s2197_s28  ;;  %v911_v23 = vstv %s2200_s9  ;;  %s2261_s28 = sld [smem:[#allocation7 + $0x43]] }
 0x132   : > { %v844_v31 = vadd.f32 %v842_v32, %v837_v18  ;;  %v810_v15 = vadd.f32 %v808_v37, %v803_v38  ;;  %v891_v32 = vmul.f32 %v890_v1, %v2006_v24  ;;  %v909_v18 = vld [vmem:[#allocation5 + $0xf0] sm:$0xff]  ;;  %v904_v37 = vstv %s2203_s29  ;;  %s2264_s9 = sld [smem:[#allocation7 + $0x44]] }
 0x133   : > { %v898_v6 = vmul.f32 %v897_v10, %v2025_v43  ;;  %v912_v34 = vmul.f32 %v911_v23, %v909_v18  ;;  %v905_v24 = vmul.f32 %v904_v37, %v2046_v57  ;;  %v878_v43 = vmul.f32 %v876_v60, %v875_v42  ;;  %s2268_s29 = sld [smem:[#allocation7 + $0x45]] }
 0x134   : > { %v851_v26 = vadd.f32 %v849_v47, %v844_v31  ;;  %v817_v36 = vadd.f32 %v815_v35, %v810_v15  ;;  %v871_v47 = vmul.f32 %v869_v22, %v868_v16  ;;  %v882_v15 = vld [vmem:[#allocation5 + $0x9e] sm:$0xff]  ;;  %v892_v57 = vmul.f32 %v890_v1, %v2008_v25 }
 0x136   : > { %v858_v53 = vadd.f32 %v856_v30, %v851_v26  ;;  %v824_v55 = vadd.f32 %v822_v33, %v817_v36  ;;  %v925_v26 = vstv %s2209_s10  ;;  %v932_v33 = vstv %s2213_s12  ;;  %s2272_s10 = sld [smem:[#allocation7 + $0x47]] }
 0x137   : > { %v885_v36 = vmul.f32 %v883_v62, %v882_v15  ;;  %v926_v61 = vmul.f32 %v925_v26, %v2085_v28  ;;  %v933_v60 = vmul.f32 %v932_v33, %v2104_v45  ;;  %v944_v62 = vld [vmem:[#allocation5 + $0xc1] sm:$0xff]  ;;  %v906_v28 = vmul.f32 %v904_v37, %v2048_v58  ;;  %s2275_s12 = sld [smem:[#allocation7 + $0x49]] }
 0x138   : > { %v865_v52 = vadd.f32 %v863_v48, %v858_v53  ;;  %v831_v4 = vadd.f32 %v829_v59, %v824_v55  ;;  %v918_v48 = vstv %s2207_s7  ;;  %v910_v59 = vld [vmem:[#allocation5 + $0xf8] sm:$0xff]  ;;  %v952_v15 = vld [vmem:[#allocation5 + $0xe1] sm:$0xff]  ;;  %s2270_s7 = sld [smem:[#allocation7 + $0x46]] }
 0x139   : > { %v919_v50 = vmul.f32 %v918_v48, %v2062_v8  ;;  %v946_v8 = vstv %s2220_s21  ;;  %v913_v25 = vmul.f32 %v911_v23, %v910_v59  ;;  %v920_v58 = vmul.f32 %v918_v48, %v2064_v9  ;;  %v1000_v59 = vld [vmem:[#allocation5 + $0xda] sm:$0xff]  ;;  %s2282_s21 = sld [smem:[#allocation7 + $0x4a]] }
 0x13a   : > { %v872_v12 = vadd.f32 %v870_v2, %v865_v52  ;;  %v838_v13 = vadd.f32 %v836_v3, %v831_v4  ;;  %v937_v2 = vld [vmem:[#allocation5 + $0xa9] sm:$0xff]  ;;  %v899_v3 = vmul.f32 %v897_v10, %v2027_v44  ;;  %v947_v63 = vmul.f32 %v946_v8, %v944_v62 }
 0x13b   : > { %v940_v7 = vmul.f32 %v939_v0, %v937_v2  ;;  %v927_v23 = vmul.f32 %v925_v26, %v2087_v29  ;;  %v934_v9 = vmul.f32 %v932_v33, %v2106_v46  ;;  %v993_v26 = vld [vmem:[#allocation5 + $0xc2] sm:$0xff]  ;;  %v1009_v33 = vstv %s2252_s23  ;;  %s2308_s23 = sld [smem:[#allocation7 + $0x52]] }
 0x13c   : > { %v879_v54 = vadd.f32 %v877_v11, %v872_v12  ;;  %v845_v51 = vadd.f32 %v843_v14, %v838_v13  ;;  %v958_v12 = vld [vmem:[#allocation5 + $0xf1] sm:$0xff]  ;;  %v953_v14 = vstv %s2226_s1  ;;  %v951_v13 = vld [vmem:[#allocation5 + $0xd9] sm:$0xff]  ;;  %s2288_s1 = sld [smem:[#allocation7 + $0x4d]] }
 0x13d   : > { %v961_v1 = vmul.f32 %v960_v56, %v958_v12 }
 0x13e   : > { %v886_v27 = vadd.f32 %v884_v19, %v879_v54  ;;  %v852_v35 = vadd.f32 %v850_v20, %v845_v51  ;;  %v954_v54 = vmul.f32 %v953_v14, %v951_v13  ;;  %v967_v51 = vstv %s2235_s20  ;;  %v1021_v13 = vld [vmem:[#allocation5 + $0x122] sm:$0xff]  ;;  %s2291_s20 = sld [smem:[#allocation7 + $0x4c]] }
 0x140   : > { %v859_v38 = vadd.f32 %v857_v5, %v852_v35  ;;  %v893_v40 = vadd.f32 %v891_v32, %v886_v27  ;;  %v974_v5 = vstv %s2239_s22  ;;  %v972_v35 = vld [vmem:[#allocation5 + $0x121] sm:$0xff]  ;;  %v938_v32 = vld [vmem:[#allocation5 + $0xb1] sm:$0xff]  ;;  %s2293_s22 = sld [smem:[#allocation7 + $0x4e]] }
 0x141   : > { %v975_v42 = vmul.f32 %v974_v5, %v972_v35  ;;  %v1035_v35 = vld [vmem:[#allocation5 + $0xab] sm:$0xff] }
 0x142   : > { %v866_v31 = vadd.f32 %v864_v21, %v859_v38  ;;  %v900_v41 = vadd.f32 %v898_v6, %v893_v40  ;;  %v965_v21 = vld [vmem:[#allocation5 + $0x109] sm:$0xff]  ;;  %v981_v38 = vstv %s2244_s24  ;;  %v979_v40 = vld [vmem:[#allocation5 + $0x139] sm:$0xff]  ;;  %s2296_s24 = sld [smem:[#allocation7 + $0x50]] }
 0x143   : > { %v968_v18 = vmul.f32 %v967_v51, %v965_v21  ;;  %v945_v6 = vld [vmem:[#allocation5 + $0xc9] sm:$0xff] }
 0x144   : > { %v873_v49 = vadd.f32 %v871_v47, %v866_v31  ;;  %v907_v30 = vadd.f32 %v905_v24, %v900_v41  ;;  %v941_v47 = vmul.f32 %v939_v0, %v938_v32  ;;  %v959_v31 = vld [vmem:[#allocation5 + $0xf9] sm:$0xff]  ;;  %v988_v41 = vstv %s2246_s30  ;;  %v986_v24 = vld [vmem:[#allocation5 + $0xaa] sm:$0xff]  ;;  %v1001_v32 = vld [vmem:[#allocation5 + $0xe2] sm:$0xff]  ;;  %s2298_s30 = sld [smem:[#allocation7 + $0x4f]] }
 0x146   : > { %v880_v22 = vadd.f32 %v878_v43, %v873_v49  ;;  %v914_v39 = vadd.f32 %v912_v34, %v907_v30  ;;  %v982_v49 = vmul.f32 %v981_v38, %v979_v40  ;;  %v948_v43 = vmul.f32 %v946_v8, %v945_v6  ;;  %v1042_v40 = vld [vmem:[#allocation5 + $0xc3] sm:$0xff] }
 0x147   : > { %v995_v30 = vstv %s2248_s4  ;;  %v1058_v6 = vstv %s2275_s12  ;;  %s2303_s4 = sld [smem:[#allocation7 + $0x51]] }
 0x148   : > { %v887_v53 = vadd.f32 %v885_v36, %v880_v22  ;;  %v921_v55 = vadd.f32 %v919_v50, %v914_v39  ;;  %v962_v36 = vmul.f32 %v960_v56, %v959_v31  ;;  %v989_v22 = vmul.f32 %v988_v41, %v986_v24  ;;  %v1007_v39 = vld [vmem:[#allocation5 + $0xf2] sm:$0xff]  ;;  %s2333_s12 = sld [smem:[#allocation7 + $0x59]] }
 0x149   : > { %v1016_v56 = vstv %s2261_s28  ;;  %v1051_v24 = vstv %s2277_s11  ;;  %s2314_s28 = sld [smem:[#allocation7 + $0x53]] }
 0x14a   : > { %v894_v52 = vadd.f32 %v892_v57, %v887_v53  ;;  %v928_v4 = vadd.f32 %v926_v61, %v921_v55  ;;  %v955_v53 = vmul.f32 %v953_v14, %v952_v15  ;;  %v1002_v55 = vstv %s2255_s27  ;;  %v966_v61 = vld [vmem:[#allocation5 + $0x111] sm:$0xff]  ;;  %v1049_v15 = vld [vmem:[#allocation5 + $0xdb] sm:$0xff]  ;;  %s2311_s27 = sld [smem:[#allocation7 + $0x54]] }
 0x14b   : > { %v1023_v14 = vstv %s2264_s9  ;;  %v1004_v31 = vmul.f32 %v1002_v55, %v1001_v32  ;;  %v1098_v32 = vld [vmem:[#allocation5 + $0xdc] sm:$0xff]  ;;  %s2316_s9 = sld [smem:[#allocation7 + $0x55]] }
 0x14c   : > { %v901_v11 = vadd.f32 %v899_v3, %v894_v52  ;;  %v935_v45 = vadd.f32 %v933_v60, %v928_v4  ;;  %v996_v60 = vmul.f32 %v995_v30, %v993_v26  ;;  %v1010_v52 = vmul.f32 %v1009_v33, %v1007_v39  ;;  %v973_v3 = vld [vmem:[#allocation5 + $0x129] sm:$0xff]  ;;  %s2336_s11 = sld [smem:[#allocation7 + $0x5b]] }
 0x14d   : > { %v1003_v4 = vmul.f32 %v1002_v55, %v1000_v59  ;;  %v976_v12 = vmul.f32 %v974_v5, %v973_v3  ;;  %v1037_v5 = vstv %s2270_s7  ;;  %v1022_v26 = vld [vmem:[#allocation5 + $0x12a] sm:$0xff]  ;;  %s2321_s7 = sld [smem:[#allocation7 + $0x56]] }
 0x14e   : > { %v908_v44 = vadd.f32 %v906_v28, %v901_v11  ;;  %v942_v17 = vadd.f32 %v940_v7, %v935_v45  ;;  %v1014_v7 = vld [vmem:[#allocation5 + $0x10a] sm:$0xff]  ;;  %v980_v11 = vld [vmem:[#allocation5 + $0x141] sm:$0xff]  ;;  %v1025_v59 = vmul.f32 %v1023_v14, %v1022_v26 }
 0x150   : > { %v915_v19 = vadd.f32 %v913_v25, %v908_v44  ;;  %v949_v20 = vadd.f32 %v947_v63, %v942_v17  ;;  %v969_v25 = vmul.f32 %v967_v51, %v966_v61  ;;  %v987_v63 = vld [vmem:[#allocation5 + $0xb2] sm:$0xff]  ;;  %v1017_v44 = vmul.f32 %v1016_v56, %v1014_v7 }
 0x151   : > { %v1024_v51 = vmul.f32 %v1023_v14, %v1021_v13  ;;  %v1043_v7 = vld [vmem:[#allocation5 + $0xcb] sm:$0xff]  ;;  %v1050_v13 = vld [vmem:[#allocation5 + $0xe3] sm:$0xff] }
 0x152   : > { %v922_v10 = vadd.f32 %v920_v58, %v915_v19  ;;  %v956_v27 = vadd.f32 %v954_v54, %v949_v20  ;;  %v983_v54 = vmul.f32 %v981_v38, %v980_v11  ;;  %v1030_v19 = vstv %s2268_s29  ;;  %v1028_v58 = vld [vmem:[#allocation5 + $0x13a] sm:$0xff]  ;;  %v994_v20 = vld [vmem:[#allocation5 + $0xca] sm:$0xff]  ;;  %s2319_s29 = sld [smem:[#allocation7 + $0x57]] }
 0x153   : > { %v1044_v38 = vstv %s2272_s10  ;;  %v1084_v11 = vld [vmem:[#allocation5 + $0xac] sm:$0xff]  ;;  %s2328_s10 = sld [smem:[#allocation7 + $0x58]] }
 0x154   : > { %v929_v16 = vadd.f32 %v927_v23, %v922_v10  ;;  %v963_v37 = vadd.f32 %v961_v1, %v956_v27  ;;  %v990_v10 = vmul.f32 %v988_v41, %v987_v63  ;;  %v1008_v23 = vld [vmem:[#allocation5 + $0xfa] sm:$0xff] }
 0x155   : > { %v1057_v63 = vld [vmem:[#allocation5 + $0xfb] sm:$0xff] }
 0x156   : > { %v936_v34 = vadd.f32 %v934_v9, %v929_v16  ;;  %v970_v29 = vadd.f32 %v968_v18, %v963_v37  ;;  %v1031_v16 = vmul.f32 %v1030_v19, %v1028_v58  ;;  %v997_v9 = vmul.f32 %v995_v30, %v994_v20  ;;  %v1091_v20 = vld [vmem:[#allocation5 + $0xc4] sm:$0xff] }
 0x157   : > { %v1093_v58 = vstv %s2293_s22  ;;  %s2353_s22 = sld [smem:[#allocation7 + $0x5f]] }
 0x158   : > { %v977_v48 = vadd.f32 %v975_v42, %v970_v29  ;;  %v943_v46 = vadd.f32 %v941_v47, %v936_v34  ;;  %v1011_v42 = vmul.f32 %v1009_v33, %v1008_v23  ;;  %v1038_v34 = vmul.f32 %v1037_v5, %v1035_v35  ;;  %v1056_v29 = vld [vmem:[#allocation5 + $0xf3] sm:$0xff] }
 0x159   : > { %v1059_v30 = vmul.f32 %v1058_v6, %v1056_v29  ;;  %v1052_v33 = vmul.f32 %v1051_v24, %v1049_v15  ;;  %v1053_v23 = vmul.f32 %v1051_v24, %v1050_v13  ;;  %v1100_v35 = vstv %s2298_s30  ;;  %s2359_s30 = sld [smem:[#allocation7 + $0x61]] }
 0x15a   : > { %v984_v50 = vadd.f32 %v982_v49, %v977_v48  ;;  %v950_v57 = vadd.f32 %v948_v43, %v943_v46  ;;  %v1015_v48 = vld [vmem:[#allocation5 + $0x112] sm:$0xff]  ;;  %v1045_v49 = vmul.f32 %v1044_v38, %v1042_v40  ;;  %v1149_v13 = vstv %s2321_s7 }
 0x15b   : > { %v1071_v40 = vld [vmem:[#allocation5 + $0x12b] sm:$0xff] }
 0x15c   : > { %v991_v0 = vadd.f32 %v989_v22, %v984_v50  ;;  %v957_v2 = vadd.f32 %v955_v53, %v950_v57  ;;  %v1018_v22 = vmul.f32 %v1016_v56, %v1015_v48  ;;  %v1065_v50 = vstv %s2282_s21  ;;  %v1063_v57 = vld [vmem:[#allocation5 + $0x10b] sm:$0xff]  ;;  %v1029_v53 = vld [vmem:[#allocation5 + $0x142] sm:$0xff]  ;;  %s2339_s21 = sld [smem:[#allocation7 + $0x5a]] }
 0x15d   : > { %v1077_v56 = vld [vmem:[#allocation5 + $0x13b] sm:$0xff] }
 0x15e   : > { %v998_v8 = vadd.f32 %v996_v60, %v991_v0  ;;  %v964_v62 = vadd.f32 %v962_v36, %v957_v2  ;;  %v1072_v60 = vstv %s2285_s13  ;;  %v1070_v0 = vld [vmem:[#allocation5 + $0x123] sm:$0xff]  ;;  %v1036_v2 = vld [vmem:[#allocation5 + $0xb3] sm:$0xff]  ;;  %s2341_s13 = sld [smem:[#allocation7 + $0x5c]] }
 0x15f   : > { %v1074_v15 = vmul.f32 %v1072_v60, %v1071_v40 }
 0x160   : > { %v1005_v28 = vadd.f32 %v1003_v4, %v998_v8  ;;  %v971_v45 = vadd.f32 %v969_v25, %v964_v62  ;;  %v1032_v8 = vmul.f32 %v1030_v19, %v1029_v53  ;;  %v1086_v62 = vstv %s2288_s1  ;;  %v1133_v53 = vld [vmem:[#allocation5 + $0xad] sm:$0xff]  ;;  %s2343_s1 = sld [smem:[#allocation7 + $0x5d]] }
 0x161   : > { %v1079_v25 = vstv %s2291_s20  ;;  %v1087_v19 = vmul.f32 %v1086_v62, %v1084_v11  ;;  %v1156_v11 = vstv %s2319_s29  ;;  %s2347_s20 = sld [smem:[#allocation7 + $0x5e]] }
 0x162   : > { %v1012_v17 = vadd.f32 %v1010_v52, %v1005_v28  ;;  %v978_v1 = vadd.f32 %v976_v12, %v971_v45  ;;  %v1066_v52 = vmul.f32 %v1065_v50, %v1063_v57  ;;  %v1073_v28 = vmul.f32 %v1072_v60, %v1070_v0  ;;  %v1092_v57 = vld [vmem:[#allocation5 + $0xcc] sm:$0xff]  ;;  %v1099_v0 = vld [vmem:[#allocation5 + $0xe4] sm:$0xff] }
 0x163   : > { %v1039_v12 = vmul.f32 %v1037_v5, %v1036_v2  ;;  %v1106_v2 = vld [vmem:[#allocation5 + $0xfc] sm:$0xff] }
 0x164   : > { %v1019_v21 = vadd.f32 %v1017_v44, %v1012_v17  ;;  %v985_v27 = vadd.f32 %v983_v54, %v978_v1  ;;  %v1080_v17 = vmul.f32 %v1079_v25, %v1077_v56  ;;  %v1046_v1 = vmul.f32 %v1044_v38, %v1043_v7  ;;  %v1140_v7 = vld [vmem:[#allocation5 + $0xc5] sm:$0xff] }
 0x165   : > { %v1142_v56 = vstv %s2316_s9 }
 0x166   : > { %v1026_v18 = vadd.f32 %v1024_v51, %v1019_v21  ;;  %v992_v37 = vadd.f32 %v990_v10, %v985_v27  ;;  %v1107_v51 = vstv %s2296_s24  ;;  %v1105_v21 = vld [vmem:[#allocation5 + $0xf4] sm:$0xff]  ;;  %v1060_v27 = vmul.f32 %v1058_v6, %v1057_v63  ;;  %v1147_v63 = vld [vmem:[#allocation5 + $0xdd] sm:$0xff]  ;;  %s2357_s24 = sld [smem:[#allocation7 + $0x60]] }
 0x167   : > { %v1108_v38 = vmul.f32 %v1107_v51, %v1105_v21  ;;  %v1114_v6 = vstv %s2303_s4  ;;  %s1366_s4 = sshll.u32 %s1854_s8, 4 }
 0x168   : > { %v1033_v47 = vadd.f32 %v1031_v16, %v1026_v18  ;;  %v999_v41 = vadd.f32 %v997_v9, %v992_v37  ;;  %v1064_v18 = vld [vmem:[#allocation5 + $0x113] sm:$0xff]  ;;  %v1094_v16 = vmul.f32 %v1093_v58, %v1091_v20  ;;  %v1150_v20 = vmul.f32 %v1149_v13, %v1147_v63 }
 0x169   : > { %v1067_v29 = vmul.f32 %v1065_v50, %v1064_v18  ;;  %v1126_v50 = vld [vmem:[#allocation5 + $0x13c] sm:$0xff] }
 0x16a   : > { %v1040_v46 = vadd.f32 %v1038_v34, %v1033_v47  ;;  %v1006_v43 = vadd.f32 %v1004_v31, %v999_v41  ;;  %v1112_v31 = vld [vmem:[#allocation5 + $0x10c] sm:$0xff]  ;;  %v1078_v41 = vld [vmem:[#allocation5 + $0x143] sm:$0xff] }
 0x16c   : > { %v1047_v36 = vadd.f32 %v1045_v49, %v1040_v46  ;;  %v1013_v39 = vadd.f32 %v1011_v42, %v1006_v43  ;;  %v1101_v42 = vmul.f32 %v1100_v35, %v1098_v32  ;;  %v1121_v49 = vstv %s2308_s23  ;;  %v1119_v46 = vld [vmem:[#allocation5 + $0x124] sm:$0xff]  ;;  %v1085_v43 = vld [vmem:[#allocation5 + $0xb4] sm:$0xff]  ;;  %s220_s23 = scalar_lea.vmem [#allocation12], %s1366_s4 }
 0x16e   : > { %v1054_v55 = vadd.f32 %v1052_v33, %v1047_v36  ;;  %v1020_v61 = vadd.f32 %v1018_v22, %v1013_v39  ;;  %v1081_v36 = vmul.f32 %v1079_v25, %v1078_v41  ;;  %v1135_v22 = vstv %s2311_s27  ;;  %v1182_v41 = vld [vmem:[#allocation5 + $0xae] sm:$0xff]  ;;  %s1472_s27 = sshll.u32 %s1685_s17, 8  ;;  %s1707_s17 = smov [#allocation12]  }
 0x16f   : > { %v1128_v39 = vstv %s2314_s28  ;;  %v1136_v25 = vmul.f32 %v1135_v22, %v1133_v53  ;;  %v1198_v53 = vstv %s2343_s1  ;;  %s1259_s28 = sshll.u32 %s220_s23, 4  ;;  %s2370_s7 = scalar_lea.hbm %s2423_s3, %s1472_s27  ;;  %s2372_s28 = int_to_ptr.vmem [resolvable:$true] %s1259_s28 }
 0x170   : > { %v1061_v3 = vadd.f32 %v1059_v30, %v1054_v55  ;;  %v1027_v4 = vadd.f32 %v1025_v59, %v1020_v61  ;;  %v1115_v30 = vmul.f32 %v1114_v6, %v1112_v31  ;;  %v1122_v55 = vmul.f32 %v1121_v49, %v1119_v46  ;;  %v1141_v31 = vld [vmem:[#allocation5 + $0xcd] sm:$0xff]  ;;  %v1148_v46 = vld [vmem:[#allocation5 + $0xe5] sm:$0xff] }
 0x171   : > { %v1088_v61 = vmul.f32 %v1086_v62, %v1085_v43  ;;  %v1154_v62 = vld [vmem:[#allocation5 + $0xf5] sm:$0xff]  ;;  %v1155_v43 = vld [vmem:[#allocation5 + $0xfd] sm:$0xff] }
 0x172   : > { %v1068_v45 = vadd.f32 %v1066_v52, %v1061_v3  ;;  %v1034_v14 = vadd.f32 %v1032_v8, %v1027_v4  ;;  %v1129_v3 = vmul.f32 %v1128_v39, %v1126_v50  ;;  %v1095_v4 = vmul.f32 %v1093_v58, %v1092_v57  ;;  %v1120_v58 = vld [vmem:[#allocation5 + $0x12c] sm:$0xff] }
 0x173   : > { %v1123_v32 = vmul.f32 %v1121_v49, %v1120_v58  ;;  %v1191_v50 = vstv %s2341_s13  ;;  %v1189_v57 = vld [vmem:[#allocation5 + $0xc6] sm:$0xff] }
 0x174   : > { %v1075_v44 = vadd.f32 %v1073_v28, %v1068_v45  ;;  %v1041_v54 = vadd.f32 %v1039_v12, %v1034_v14  ;;  %v1102_v45 = vmul.f32 %v1100_v35, %v1099_v0  ;;  %v1109_v12 = vmul.f32 %v1107_v51, %v1106_v2  ;;  %v1162_v0 = vld [vmem:[#allocation5 + $0x115] sm:$0xff] }
 0x175   : > { %v1163_v51 = vstv %s2328_s10  ;;  %v1203_v2 = vld [vmem:[#allocation5 + $0xf6] sm:$0xff]  ;;  %s1246_s10 = scalar_lea.sflag [#allocation9], %s1854_s8 }
 0x176   : > { %v1082_v10 = vadd.f32 %v1080_v17, %v1075_v44  ;;  %v1048_v5 = vadd.f32 %v1046_v1, %v1041_v54  ;;  %v1113_v44 = vld [vmem:[#allocation5 + $0x114] sm:$0xff]  ;;  %v1143_v17 = vmul.f32 %v1142_v56, %v1140_v7 }
 0x178   : > { %v1089_v9 = vadd.f32 %v1087_v19, %v1082_v10  ;;  %v1055_v37 = vadd.f32 %v1053_v23, %v1048_v5  ;;  %v1157_v19 = vmul.f32 %v1156_v11, %v1154_v62  ;;  %v1116_v10 = vmul.f32 %v1114_v6, %v1113_v44  ;;  %v1127_v5 = vld [vmem:[#allocation5 + $0x144] sm:$0xff] }
 0x179   : > { %v1175_v6 = vld [vmem:[#allocation5 + $0x13d] sm:$0xff]  ;;  %v1165_v62 = vmul.f32 %v1163_v51, %v1162_v0 }
 0x17a   : > { %v1096_v34 = vadd.f32 %v1094_v16, %v1089_v9  ;;  %v1062_v47 = vadd.f32 %v1060_v27, %v1055_v37  ;;  %v1161_v27 = vld [vmem:[#allocation5 + $0x10d] sm:$0xff]  ;;  %v1170_v16 = vstv %s2333_s12  ;;  %v1168_v9 = vld [vmem:[#allocation5 + $0x125] sm:$0xff]  ;;  %v1134_v37 = vld [vmem:[#allocation5 + $0xb5] sm:$0xff]  ;;  %s1609_s12 = scalar_lea.vmem %s2372_s28, 256 }
 0x17b   : > { %p1610_p3 = scmp.ne.s32.totalorder %s2372_s28, %s1609_s12 }
 0x17c   : > { %v1103_v24 = vadd.f32 %v1101_v42, %v1096_v34  ;;  %v1069_v48 = vadd.f32 %v1067_v29, %v1062_v47  ;;  %v1130_v34 = vmul.f32 %v1128_v39, %v1127_v5  ;;  %v1184_v29 = vstv %s2336_s11  ;;  %s1613_s11 = sshll.u32 %s1707_s17, 4  ;;  %s1614_s11 = int_to_ptr.vmem [resolvable:$false] %s1613_s11 }
 0x17d   : > { %v1177_v47 = vstv %s2339_s21  ;;  %v1185_v39 = vmul.f32 %v1184_v29, %v1182_v41  ;;  %v1211_v41 = vld [vmem:[#allocation5 + $0x116] sm:$0xff]  ;;  %p1611_p12 = pnand %p1610_p3, %p2434_p7  ;;  %s1615_s21 = scalar_lea.vmem %s1614_s11, 512 }
 0x17e   : > { %v1110_v26 = vadd.f32 %v1108_v38, %v1103_v24  ;;  %v1076_v33 = vadd.f32 %v1074_v15, %v1069_v48  ;;  %v1164_v38 = vmul.f32 %v1163_v51, %v1161_v27  ;;  %v1171_v24 = vmul.f32 %v1170_v16, %v1168_v9  ;;  %v1204_v9 = vld [vmem:[#allocation5 + $0xfe] sm:$0xff]  ;;  %p1616_p1 = scmp.lt.s32.totalorder %s2372_s28, %s1614_s11  ;;  %p1617_p10 = scmp.lt.s32.totalorder %s1615_s21, %s1609_s12 }
 0x17f   : > { %v1137_v48 = vmul.f32 %v1135_v22, %v1134_v37  ;;  %v1158_v22 = vmul.f32 %v1156_v11, %v1155_v43  ;;  %v1176_v11 = vld [vmem:[#allocation5 + $0x145] sm:$0xff]  ;;  %v1226_v27 = vstv %s2359_s30  ;;  %p1612_p2 = pneg %p1611_p12 }
 0x180   : > { %v1117_v59 = vadd.f32 %v1115_v30, %v1110_v26  ;;  %v1083_v60 = vadd.f32 %v1081_v36, %v1076_v33  ;;  %v1178_v26 = vmul.f32 %v1177_v47, %v1175_v6  ;;  %v1144_v33 = vmul.f32 %v1142_v56, %v1141_v31  ;;  %v1169_v56 = vld [vmem:[#allocation5 + $0x12d] sm:$0xff]  ;;  %p1618_p8 = por %p1617_p10, %p1616_p1 }
 0x182   : > { %v1124_v52 = vadd.f32 %v1122_v55, %v1117_v59  ;;  %v1090_v8 = vadd.f32 %v1088_v61, %v1083_v60  ;;  %v1196_v55 = vld [vmem:[#allocation5 + $0xde] sm:$0xff]  ;;  %v1151_v61 = vmul.f32 %v1149_v13, %v1148_v46  ;;  %v1172_v13 = vmul.f32 %v1170_v16, %v1169_v56  ;;  %p1619_p9 = pnand %p1618_p8, %p1612_p2 }
 0x184   : > { %v1131_v28 = vadd.f32 %v1129_v3, %v1124_v52  ;;  %v1097_v14 = vadd.f32 %v1095_v4, %v1090_v8  ;;  %v1205_v52 = vstv %s2347_s20  ;;  %v1192_v3 = vmul.f32 %v1191_v50, %v1189_v57 }
 0x185   : > { %v1207_v6 = vmul.f32 %v1205_v52, %v1204_v9 }
 0x186   : > { %v1138_v1 = vadd.f32 %v1136_v25, %v1131_v28  ;;  %v1104_v54 = vadd.f32 %v1102_v45, %v1097_v14  ;;  %v1199_v25 = vmul.f32 %v1198_v53, %v1196_v55  ;;  %v1206_v45 = vmul.f32 %v1205_v52, %v1203_v2  ;;  %v1210_v14 = vld [vmem:[#allocation5 + $0x10e] sm:$0xff] }
 0x188   : > { %v1145_v21 = vadd.f32 %v1143_v17, %v1138_v1  ;;  %v1111_v23 = vadd.f32 %v1109_v12, %v1104_v54  ;;  %v1212_v12 = vstv %s2353_s22  ;;  %v1219_v17 = vstv %s2357_s24  ;;  %v1217_v1 = vld [vmem:[#allocation5 + $0x126] sm:$0xff]  ;;  %v1183_v54 = vld [vmem:[#allocation5 + $0xb6] sm:$0xff] }
 0x189   : > { %v1220_v51 = vmul.f32 %v1219_v17, %v1217_v1  ;;  %v1186_v5 = vmul.f32 %v1184_v29, %v1183_v54  ;;  %v1225_v29 = vld [vmem:[#allocation5 + $0x146] sm:$0xff] }
 0x18a   : > { %v1152_v35 = vadd.f32 %v1150_v20, %v1145_v21  ;;  %v1118_v18 = vadd.f32 %v1116_v10, %v1111_v23  ;;  %v1179_v20 = vmul.f32 %v1177_v47, %v1176_v11  ;;  %v1224_v10 = vld [vmem:[#allocation5 + $0x13e] sm:$0xff]  ;;  %v1190_v23 = vld [vmem:[#allocation5 + $0xce] sm:$0xff] }
 0x18b   : > { %v1193_v37 = vmul.f32 %v1191_v50, %v1190_v23 }
 0x18c   : > { %v1159_v40 = vadd.f32 %v1157_v19, %v1152_v35  ;;  %v1125_v42 = vadd.f32 %v1123_v32, %v1118_v18  ;;  %v1213_v19 = vmul.f32 %v1212_v12, %v1210_v14  ;;  %v1197_v18 = vld [vmem:[#allocation5 + $0xe6] sm:$0xff] }
 0x18e   : > { %v1166_v15 = vadd.f32 %v1164_v38, %v1159_v40  ;;  %v1132_v49 = vadd.f32 %v1130_v34, %v1125_v42  ;;  %v1227_v40 = vmul.f32 %v1226_v27, %v1224_v10  ;;  %v1200_v42 = vmul.f32 %v1198_v53, %v1197_v18 }
 0x190   : > { %v1173_v30 = vadd.f32 %v1171_v24, %v1166_v15  ;;  %v1139_v36 = vadd.f32 %v1137_v48, %v1132_v49  ;;  %v1218_v15 = vld [vmem:[#allocation5 + $0x12e] sm:$0xff]  ;;  %v1214_v48 = vmul.f32 %v1212_v12, %v1211_v41 }
 0x191   : > { %v1221_v46 = vmul.f32 %v1219_v17, %v1218_v15 }
 0x192   : > { %v1180_v59 = vadd.f32 %v1178_v26, %v1173_v30  ;;  %v1146_v60 = vadd.f32 %v1144_v33, %v1139_v36  ;;  %v1228_v26 = vmul.f32 %v1226_v27, %v1225_v29 }
 0x194   : > { %v1187_v4 = vadd.f32 %v1185_v39, %v1180_v59  ;;  %v1153_v8 = vadd.f32 %v1151_v61, %v1146_v60 }
 0x196   : > { %v1194_v7 = vadd.f32 %v1192_v3, %v1187_v4  ;;  %v1160_v28 = vadd.f32 %v1158_v22, %v1153_v8 }
 0x198   : > { %v1167_v63 = vadd.f32 %v1165_v62, %v1160_v28  ;;  %v1201_v44 = vadd.f32 %v1199_v25, %v1194_v7 }
 0x19a   : > { %v1174_v58 = vadd.f32 %v1172_v13, %v1167_v63  ;;  %v1208_v21 = vadd.f32 %v1206_v45, %v1201_v44 }
 0x19c   : > { %v1181_v35 = vadd.f32 %v1179_v20, %v1174_v58  ;;  %v1215_v32 = vadd.f32 %v1213_v19, %v1208_v21 }
 0x19e   : > { %v1188_v16 = vadd.f32 %v1186_v5, %v1181_v35  ;;  %v1222_v38 = vadd.f32 %v1220_v51, %v1215_v32 }
 0x1a0   : > { %v1195_v34 = vadd.f32 %v1193_v37, %v1188_v16  ;;  %v1229_v31 = vadd.f32 %v1227_v40, %v1222_v38 }
 0x1a2   : > { %v1202_v47 = vadd.f32 %v1200_v42, %v1195_v34  ;;  %v1464_v24 = vmul.f32 -1.442695, %v1229_v31 }
 0x1a4   : > { %v1209_v49 = vadd.f32 %v1207_v6, %v1202_v47  ;;  %1558 = vpow2.f32 %v1464_v24 }
 0x1a6   : > { %v1216_v43 = vadd.f32 %v1214_v48, %v1209_v49 }
 0x1a8   : > { %v1223_v30 = vadd.f32 %v1221_v46, %v1216_v43 }
 0x1aa   : > { %v1230_v33 = vadd.f32 %v1228_v26, %v1223_v30 }
 0x1ac   : > { %v1465_v36 = vmul.f32 -1.442695, %v1230_v33 }
 0x1ae   : > { %1560 = vpow2.f32 %v1465_v36 }
 0x1b1   : > { %v1559_v39 = vpop.eup %1558 }
 0x1b2   : > { %v1237_v50 = vadd.f32 1.0, %v1559_v39 }
 0x1b4   : > { %1562 = vrcp.f32 %v1237_v50 }
 0x1bb   : > { %v1561_v57 = vpop.eup %1560 }
 0x1bc   : > { %v1238_v53 = vadd.f32 1.0, %v1561_v57 }
 0x1be   : > { %1564 = vrcp.f32 %v1238_v53 }
 0x1c1   : > { %v1563_v55 = vpop.eup %1562 }
 0x1c2   : > { %1243 = vst [vmem:[%s220_s23] sm:$0xff] %v1563_v55 }
 0x1cb   : > { %v1565_v59 = vpop.eup %1564 }
 0x1cc   : > { %1244 = vst [vmem:[%s220_s23 + $0x8] sm:$0xff] %v1565_v59 }
 0x1cd   : > { %1622 = shalt.err (!%p1619_p9)
}
 0x1ce   : > { %s1623_s13 = scalar_lea.hbm %s2370_s7, 256  ;;  %s1627_s22 = scalar_lea.hbm %s2423_s3, 512 }
 0x1cf   : > { %p1624_p13 = scmp.ne.s32.totalorder %s2370_s7, %s1623_s13  ;;  %p1628_p11 = scmp.lt.s32.totalorder %s2370_s7, %s2423_s3 }
 0x1d0   : > { %p1629_p5 = scmp.lt.s32.totalorder %s1627_s22, %s1623_s13 }
 0x1d1   : > { %p1625_p4 = pnand %p1624_p13, %p2434_p7 }
 0x1d2   : > { %p1630_p0 = por %p1629_p5, %p1628_p11 }
 0x1d3   : > { %p1626_p6 = pneg %p1625_p4 }
 0x1d5   : > { %p1631_p3 = pnand %p1630_p0, %p1626_p6 }
 0x1d7   : > { %1634 = shalt.err (!%p1631_p3)
}
 0x1d8   : > { %s1708_s4 = smov 128   ;;  %s1709_s23 = smov 8  }
 0x1d9   : > { %1479 = dma.vmem_to_hbm [thread:$0]  (%p2434_p7), %s2372_s28, 256, %s2370_s7, %s1246_s10, %s1708_s4, %s1708_s4, %s1709_s23  }
 0x1da PF: > { %s1274_s27 = sand.u32 1, %s1673_s14   ;;  %p2435_p12 = scmp.ne.s32.totalorder %s2429_s26, 0 }
 0x1db   : > { %p2436_p2 = scmp.ge.s32.totalorder %s1693_s19, 2  ;;  %s1275_s9 = scalar_lea.sflag [#allocation9], %s1274_s27 }
 0x1dd   : > { %p1490_p1 = pnand %p2436_p2, %p2435_p12 }
 0x1df   : > { %p1491_p10 = pneg %p1490_p1 }
 0x1e1   : > { %1668 = dma.done.wait (%p1491_p10), %s1275_s9, 256  }
 0x1e2   : > { %1670 = vsyncadd (%p1491_p10), %s1275_s9, 4294967040  ;;  %s21_s19 = sadd.s32 1, %s1693_s19   ;;  %s2437_s14 = smov %s1677_s15 }
 0x1e3   : > { %p18_p8 = scmp.ge.s32.totalorder %s21_s19, 4   ;;  %s2438_s15 = smov %s1681_s16 }
 0x1e4   : > { %s2439_s16 = smov %s1841_s5  ;;  %s2440_s17 = smov %s1689_s18 }
 0x1e5   : > { %s2441_s18 = smov %s2443_s6  ;;  %20 = sbr.rel (!%p18_p8) target bundleno = 9 (0x9), region = 103 }
 0x1ea   :  { %1280 = vsyncpa [#allocation8], 1 }
 0x1eb   :  { %1282 = vsyncpa [#allocation8 + $0x1], 1 }
 0x1ec   :  { %1283 = vsyncpa [#allocation9], 1 }
 0x1ed   :  { %1285 = vsyncpa [#allocation9 + $0x1], 1 }
 0x1ee   :  { %1286 = vsyncpa [#allocation10], 1 }
 0x1ef   :  { %1288 = vsyncpa [#allocation10 + $0x1], 1 }

</bundles_post_ra>
